<compile_context>
chip_gen: v6e
topology: v6e:2x2x1
jax: 0.10.0
libtpu: 0.0.40
codegen_flags: <defaults>
</compile_context>

<pallas_src>
import functools
from math import sqrt

import jax
import jax.numpy as jnp
from jax import lax
from jax.experimental import pallas as pl
from jax.experimental.pallas import tpu as pltpu


_VMEM_LIMIT = 32 * 1024 * 1024
_TM, _TN, _TK = 256, 256, 2048   # max tile sizes (K usually kept un-tiled for ViT dims)


# ------------------------------- helpers -------------------------------------

def _ru(x, m):
    return (x + m - 1) // m * m


def _tile(dim, max_tile, align):
    """Pick (tile, padded_dim) such that tile divides padded_dim and satisfies the
    (8,128) layout rule (tile is either the full padded dim or a multiple of `align`)."""
    if dim <= max_tile:
        pad = dim if dim <= align else _ru(dim, align)
        return pad, pad
    for t in (max_tile, max_tile // 2, max_tile // 4):
        if t % align == 0 and dim % t == 0:
            return t, dim
    return align, _ru(dim, align)


def _pad2(a, rows, cols):
    r, c = a.shape
    if (r, c) == (rows, cols):
        return a
    return jnp.pad(a, ((0, rows - r), (0, cols - c)))


# ------------------------- tiled matmul (+bias/act/residual) ------------------

def _matmul_kernel(x_ref, w_ref, b_ref, *rest, activation, has_residual):
    if has_residual:
        r_ref, o_ref, acc_ref = rest
    else:
        o_ref, acc_ref = rest
    k = pl.program_id(2)

    @pl.when(k == 0)
    def _():
        acc_ref[...] = jnp.zeros_like(acc_ref)

    acc_ref[...] += jnp.dot(x_ref[...], w_ref[...],
                            preferred_element_type=jnp.float32)

    @pl.when(k == pl.num_programs(2) - 1)
    def _():
        y = acc_ref[...] + b_ref[...]
        if activation == "relu":
            y = jnp.maximum(y, 0.0)
        elif activation == "gelu":
            # TODO(synk): PyTorch F.gelu defaults to exact erf; tanh approximation is
            # used for Mosaic-safe lowering (|delta| ~ 1e-3).
            y = jax.nn.gelu(y, approximate=True)
        if has_residual:
            y = y + r_ref[...].astype(jnp.float32)
        o_ref[...] = y.astype(o_ref.dtype)


def matmul(x, w, b=None, *, activation=None, residual=None, out_dtype=jnp.bfloat16):
    """out = act(x @ w + b) (+ residual).  x:(M,K), w:(K,N) -> (M,N).
    bf16 MXU inputs, fp32 accumulation and epilogue."""
    M, K = x.shape
    K2, N = w.shape
    assert K == K2
    tm, Mp = _tile(M, _TM, 8)
    tn, Np = _tile(N, _TN, 128)
    tk, Kp = _tile(K, _TK, 128)

    xb = _pad2(x.astype(jnp.bfloat16), Mp, Kp)
    wb = _pad2(w.astype(jnp.bfloat16), Kp, Np)
    if b is None:
        bb = jnp.zeros((1, Np), jnp.float32)
    else:
        bb = _pad2(b.reshape(1, N).astype(jnp.float32), 1, Np)

    args = [xb, wb, bb]
    in_specs = [
        pl.BlockSpec((tm, tk), lambda i, j, k: (i, k)),
        pl.BlockSpec((tk, tn), lambda i, j, k: (k, j)),
        pl.BlockSpec((1, tn), lambda i, j, k: (0, j)),
    ]
    if residual is not None:
        assert residual.shape == (M, N)
        args.append(_pad2(residual.astype(jnp.bfloat16), Mp, Np))
        in_specs.append(pl.BlockSpec((tm, tn), lambda i, j, k: (i, j)))

    grid = (Mp // tm, Np // tn, Kp // tk)
    kern = functools.partial(_matmul_kernel, activation=activation,
                             has_residual=residual is not None)
    out = pl.pallas_call(
        kern,
        out_shape=jax.ShapeDtypeStruct((Mp, Np), out_dtype),
        grid=grid,
        in_specs=in_specs,
        out_specs=pl.BlockSpec((tm, tn), lambda i, j, k: (i, j)),
        scratch_shapes=[pltpu.VMEM((tm, tn), jnp.float32)],
        compiler_params=pltpu.CompilerParams(
            dimension_semantics=("parallel", "parallel", "arbitrary"),
            vmem_limit_bytes=_VMEM_LIMIT),
        cost_estimate=pl.CostEstimate(
            flops=2 * Mp * Np * Kp, transcendentals=0,
            bytes_accessed=2 * (Mp * Kp + Kp * Np + 2 * Mp * Np)),
    )(*args)
    if (Mp, Np) != (M, N):
        out = out[:M, :N]
    return out


# -------------------- fused LayerNorm -> matmul (pre-norm + qkv) ---------------

def _ln_matmul_kernel(x_ref, g_ref, b_ref, w_ref, o_ref, *, eps):
    x = x_ref[...].astype(jnp.float32)
    mean = jnp.mean(x, axis=-1, keepdims=True)
    var = jnp.mean(jnp.square(x - mean), axis=-1, keepdims=True)
    xn = (x - mean) * lax.rsqrt(var + eps)
    xn = xn * g_ref[...] + b_ref[...]
    o_ref[...] = jnp.dot(xn.astype(w_ref.dtype), w_ref[...],
                         preferred_element_type=jnp.float32).astype(o_ref.dtype)


def layernorm_matmul(x, gamma, beta, w, *, eps=1e-5, out_dtype=jnp.bfloat16):
    """(LayerNorm(x) @ w) with LN fused into the matmul prologue (bias-free matmul)."""
    M, D = x.shape
    D2, N = w.shape
    assert D == D2
    tm, Mp = _tile(M, _TM, 8)
    tn, Np = _tile(N, _TN, 128)
    xb = _pad2(x.astype(jnp.bfloat16), Mp, D)
    wb = _pad2(w.astype(jnp.bfloat16), D, Np)
    g2 = gamma.reshape(1, D).astype(jnp.float32)
    b2 = beta.reshape(1, D).astype(jnp.float32)
    out = pl.pallas_call(
        functools.partial(_ln_matmul_kernel, eps=eps),
        out_shape=jax.ShapeDtypeStruct((Mp, Np), out_dtype),
        grid=(Mp // tm, Np // tn),
        in_specs=[
            pl.BlockSpec((tm, D), lambda i, j: (i, 0)),
            pl.BlockSpec((1, D), lambda i, j: (0, 0)),
            pl.BlockSpec((1, D), lambda i, j: (0, 0)),
            pl.BlockSpec((D, tn), lambda i, j: (0, j)),
        ],
        out_specs=pl.BlockSpec((tm, tn), lambda i, j: (i, j)),
        compiler_params=pltpu.CompilerParams(
            dimension_semantics=("parallel", "parallel"),
            vmem_limit_bytes=_VMEM_LIMIT),
        cost_estimate=pl.CostEstimate(
            flops=2 * Mp * D * Np, transcendentals=0,
            bytes_accessed=2 * (Mp * D + D * Np + Mp * Np)),
    )(xb, g2, b2, wb)
    if (Mp, Np) != (M, N):
        out = out[:M, :N]
    return out


# ------------------------------- LayerNorm ------------------------------------

def _layernorm_kernel(x_ref, g_ref, b_ref, o_ref, *, eps):
    x = x_ref[...].astype(jnp.float32)
    mean = jnp.mean(x, axis=-1, keepdims=True)
    var = jnp.mean(jnp.square(x - mean), axis=-1, keepdims=True)
    y = (x - mean) * lax.rsqrt(var + eps)
    o_ref[...] = (y * g_ref[...] + b_ref[...]).astype(o_ref.dtype)


def layernorm(x, gamma, beta, *, eps=1e-5, out_dtype=jnp.bfloat16):
    """Row-tiled LayerNorm over the last dim (matches nn.LayerNorm, eps=1e-5)."""
    M, D = x.shape
    tm, Mp = _tile(M, 512, 8)
    xb = _pad2(x.astype(jnp.bfloat16), Mp, D)
    out = pl.pallas_call(
        functools.partial(_layernorm_kernel, eps=eps),
        out_shape=jax.ShapeDtypeStruct((Mp, D), out_dtype),
        grid=(Mp // tm,),
        in_specs=[
            pl.BlockSpec((tm, D), lambda i: (i, 0)),
            pl.BlockSpec((1, D), lambda i: (0, 0)),
            pl.BlockSpec((1, D), lambda i: (0, 0)),
        ],
        out_specs=pl.BlockSpec((tm, D), lambda i: (i, 0)),
        compiler_params=pltpu.CompilerParams(
            dimension_semantics=("parallel",),
            vmem_limit_bytes=_VMEM_LIMIT),
    )(xb, gamma.reshape(1, D).astype(jnp.float32),
      beta.reshape(1, D).astype(jnp.float32))
    return out[:M] if Mp != M else out


# --------------------------- multi-head attention ------------------------------

def _attention_kernel(qkv_ref, o_ref, *, num_heads, dh, seq_len, scale):
    qkv = qkv_ref[...]                       # (S_pad, 3*D), feature layout [3, heads, dh]
    s_pad = qkv.shape[0]
    d = num_heads * dh
    key_valid = lax.broadcasted_iota(jnp.int32, (s_pad, s_pad), 1) < seq_len
    outs = []
    for h in range(num_heads):               # static loop: all heads of one batch element
        q = qkv[:, h * dh:(h + 1) * dh]
        k = qkv[:, d + h * dh:d + (h + 1) * dh]
        v = qkv[:, 2 * d + h * dh:2 * d + (h + 1) * dh]
        s = lax.dot_general(q, k, (((1,), (1,)), ((), ())),
                            preferred_element_type=jnp.float32) * scale
        s = jnp.where(key_valid, s, -1e30)   # mask padded key positions
        m = jnp.max(s, axis=-1, keepdims=True)
        p = jnp.exp(s - m)
        l = jnp.sum(p, axis=-1, keepdims=True)
        o = jnp.dot(p.astype(v.dtype), v, preferred_element_type=jnp.float32)
        outs.append(o * pl.reciprocal(l, approx=True))
    # single lane-dense (S_pad, D) store
    o_ref[...] = jnp.concatenate(outs, axis=-1).astype(o_ref.dtype)


def attention(qkv, *, num_heads, seq_len, scale, out_dtype=jnp.bfloat16):
    """qkv: (B, S_pad, 3*D) with feature layout [3, heads, dh] -> (B, S_pad, D)."""
    B, S_pad, threeD = qkv.shape
    D = threeD // 3
    dh = D // num_heads
    kern = functools.partial(_attention_kernel, num_heads=num_heads, dh=dh,
                             seq_len=seq_len, scale=scale)
    return pl.pallas_call(
        kern,
        out_shape=jax.ShapeDtypeStruct((B, S_pad, D), out_dtype),
        grid=(B,),
        in_specs=[pl.BlockSpec((None, S_pad, threeD), lambda b: (b, 0, 0))],
        out_specs=pl.BlockSpec((None, S_pad, D), lambda b: (b, 0, 0)),
        compiler_params=pltpu.CompilerParams(
            dimension_semantics=("parallel",),
            vmem_limit_bytes=_VMEM_LIMIT),
    )(qkv.astype(jnp.bfloat16))


# ------------------------------- 3x3/s2 max-pool --------------------------------

def _maxpool_kernel(p00_ref, p01_ref, p10_ref, p11_ref, o_ref, *, pool_k, hp, wp):
    phases = {
        (0, 0): p00_ref[...].astype(jnp.float32),
        (0, 1): p01_ref[...].astype(jnp.float32),
        (1, 0): p10_ref[...].astype(jnp.float32),
        (1, 1): p11_ref[...].astype(jnp.float32),
    }
    acc = None
    for a in range(pool_k):
        for b in range(pool_k):
            ph = phases[(a % 2, b % 2)]
            tap = ph[a // 2:a // 2 + hp, b // 2:b // 2 + wp]
            acc = tap if acc is None else jnp.maximum(acc, tap)
    o_ref[...] = acc.astype(o_ref.dtype)


def maxpool2d(y, *, pool_k=3, pool_s=2, pool_p=1, out_dtype=jnp.bfloat16):
    """MaxPool2d(kernel=3, stride=2, padding=1) on an NHWC map via a polyphase split
    (avoids materialising 9 shifted copies of the feature map in HBM)."""
    assert pool_k == 3 and pool_s == 2, "polyphase maxpool assumes kernel=3, stride=2"
    B, H, W, D = y.shape
    Hp = (H + 2 * pool_p - pool_k) // pool_s + 1
    Wp = (W + 2 * pool_p - pool_k) // pool_s + 1
    yp = jnp.pad(y, ((0, 0), (pool_p, pool_p), (pool_p, pool_p), (0, 0)),
                 constant_values=-1e30)
    # even/odd polyphase components (total bytes == feature map, one XLA pass)
    p00 = yp[:, 0::2, 0::2, :]
    p01 = yp[:, 0::2, 1::2, :]
    p10 = yp[:, 1::2, 0::2, :]
    p11 = yp[:, 1::2, 1::2, :]

    def spec(a):
        _, u, v, d = a.shape
        return pl.BlockSpec((None, u, v, d), lambda b: (b, 0, 0, 0))

    kern = functools.partial(_maxpool_kernel, pool_k=pool_k, hp=Hp, wp=Wp)
    return pl.pallas_call(
        kern,
        out_shape=jax.ShapeDtypeStruct((B, Hp, Wp, D), out_dtype),
        grid=(B,),
        in_specs=[spec(p00), spec(p01), spec(p10), spec(p11)],
        out_specs=pl.BlockSpec((None, Hp, Wp, D), lambda b: (b, 0, 0, 0)),
        compiler_params=pltpu.CompilerParams(
            dimension_semantics=("parallel",),
            vmem_limit_bytes=_VMEM_LIMIT),
    )(p00, p01, p10, p11)


# ------------------------------- ConvTokenizer ----------------------------------

def conv_tokenizer_forward(x_nchw, conv_w, *, stride=2, padding=3,
                           pool_k=3, pool_s=2, pool_p=1):
    """ConvTokenizer.forward: Conv2d(bias=False) -> ReLU -> MaxPool2d -> flatten -> transpose.
    token_padding = -1 (default) => no pad-token branch."""
    B, C, H, W = x_nchw.shape
    Dout, Cin, kh, kw = conv_w.shape
    assert Cin == C
    Ho = (H + 2 * padding - kh) // stride + 1
    Wo = (W + 2 * padding - kw) // stride + 1

    # im2col (glue): feature order (c, ky, kx) matches conv_w.reshape(Dout, -1)
    xp = jnp.pad(x_nchw, ((0, 0), (0, 0), (padding, padding), (padding, padding)))
    patches = jnp.stack(
        [xp[:, :, dy:dy + (Ho - 1) * stride + 1:stride,
                  dx:dx + (Wo - 1) * stride + 1:stride]
         for dy in range(kh) for dx in range(kw)], axis=2)          # (B, C, kh*kw, Ho, Wo)
    patches = patches.transpose(0, 3, 4, 1, 2).reshape(B * Ho * Wo, C * kh * kw)
    wmat = conv_w.reshape(Dout, C * kh * kw).T                      # (K, Dout)

    conv_out = matmul(patches, wmat, None, activation="relu")       # fused conv + ReLU
    y = conv_out.reshape(B, Ho, Wo, Dout)                           # NHWC feature map
    pooled = maxpool2d(y, pool_k=pool_k, pool_s=pool_s, pool_p=pool_p)
    Hp, Wp = pooled.shape[1], pooled.shape[2]
    # Flatten(2,3).transpose(-2,-1) on NCHW == row-major (Hp, Wp) token order here.
    return pooled.reshape(B, Hp * Wp, Dout)                         # (B, seq_len, D)


# ----------------------------- TransformerClassifier ----------------------------
# TODO(synk): TransformerClassifier source not provided; this is the standard CCT
# classifier (learnable pos-emb, class token since seq_pool=False, pre-norm encoder).
# Dropout / attention-dropout / stochastic-depth are eval-mode identities.

def transformer_classifier_forward(tokens, params, *, num_heads):
    B, N, D = tokens.shape
    cls = jnp.broadcast_to(params["class_emb"], (B, 1, D))
    x = jnp.concatenate([cls, tokens.astype(jnp.bfloat16)], axis=1)   # (B, S, D)
    x = x + params["pos_emb"]
    S = N + 1
    S_pad = _ru(S, 8)                       # sublane-align the sequence once, mask in attn
    if S_pad != S:
        x = jnp.pad(x, ((0, 0), (0, S_pad - S), (0, 0)))
    dh = D // num_heads
    scale = dh ** -0.5
    x2 = x.reshape(B * S_pad, D)

    for lp in params["layers"]:
        # --- src = src + proj(attn(pre_norm(src))) ---
        qkv = layernorm_matmul(x2, lp["pre_g"], lp["pre_b"], lp["qkv_w"])   # LN + qkv fused
        attn = attention(qkv.reshape(B, S_pad, 3 * D),
                         num_heads=num_heads, seq_len=S, scale=scale)
        x2 = matmul(attn.reshape(B * S_pad, D), lp["proj_w"], lp["proj_b"],
                    residual=x2)                                            # proj + residual
        # --- src = norm1(src); src = src + linear2(gelu(linear1(src))) ---
        src = layernorm(x2, lp["n1_g"], lp["n1_b"])
        ff = matmul(src, lp["l1_w"], lp["l1_b"], activation="gelu")         # l1 + GELU
        x2 = matmul(ff, lp["l2_w"], lp["l2_b"], residual=src)               # l2 + residual

    x2 = layernorm(x2, params["norm_g"], params["norm_b"])
    cls_tok = x2.reshape(B, S_pad, D)[:, 0]                                 # class token
    return matmul(cls_tok, params["fc_w"], params["fc_b"], out_dtype=jnp.float32)


def convvit_forward(x_nchw, params, *, stride, padding, num_heads):
    tokens = conv_tokenizer_forward(x_nchw, params["conv_w"], stride=stride, padding=padding)
    return transformer_classifier_forward(tokens, params, num_heads=num_heads)


# ------------------------------ parameter init -----------------------------------

def init_params(key, *, c_in, embedding_dim, kernel_size, seq_len,
                num_layers, num_heads, mlp_ratio, num_classes):
    kit = iter(jax.random.split(key, 8 + 4 * num_layers))

    def nrm(shape, std=0.02, dtype=jnp.bfloat16):   # weights stored bf16 once, at init
        return (std * jax.random.normal(next(kit), shape, jnp.float32)).astype(dtype)

    D = embedding_dim
    ff = int(D * mlp_ratio)
    params = {
        "conv_w": nrm((D, c_in, kernel_size, kernel_size),
                      std=1.0 / sqrt(c_in * kernel_size * kernel_size)),
        "class_emb": nrm((1, 1, D)),
        "pos_emb": nrm((1, seq_len + 1, D), std=0.2),
        "norm_g": jnp.ones((D,), jnp.float32),
        "norm_b": jnp.zeros((D,), jnp.float32),
        "fc_w": nrm((D, num_classes), std=1.0 / sqrt(D)),
        "fc_b": jnp.zeros((num_classes,), jnp.float32),
        "layers": [],
    }
    for _ in range(num_layers):
        params["layers"].append({
            "pre_g": jnp.ones((D,), jnp.float32), "pre_b": jnp.zeros((D,), jnp.float32),
            "qkv_w": nrm((D, 3 * D), std=1.0 / sqrt(D)),
            "proj_w": nrm((D, D), std=1.0 / sqrt(D)),
            "proj_b": jnp.zeros((D,), jnp.float32),
            "n1_g": jnp.ones((D,), jnp.float32), "n1_b": jnp.zeros((D,), jnp.float32),
            "l1_w": nrm((D, ff), std=1.0 / sqrt(D)),
            "l1_b": jnp.zeros((ff,), jnp.float32),
            "l2_w": nrm((ff, D), std=1.0 / sqrt(ff)),
            "l2_b": jnp.zeros((D,), jnp.float32),
        })
    return params


# ------------------------------------ main ----------------------------------------

if __name__ == "__main__":
    # small, module-consistent shapes
    B, C, H, W = 2, 3, 16, 16
    embedding_dim = 32
    kernel_size, stride, padding = 7, 2, 3
    pool_k, pool_s, pool_p = 3, 2, 1
    num_layers, num_heads, mlp_ratio, num_classes = 2, 2, 2.0, 10

    key = jax.random.PRNGKey(0)
    kx, kp = jax.random.split(key)
    x = jax.random.normal(kx, (B, C, H, W), jnp.float32)

    # sequence_length (as ConvTokenizer.sequence_length would compute it)
    Ho = (H + 2 * padding - kernel_size) // stride + 1
    Hp = (Ho + 2 * pool_p - pool_k) // pool_s + 1
    seq_len = Hp * Hp

    params = init_params(kp, c_in=C, embedding_dim=embedding_dim, kernel_size=kernel_size,
                         seq_len=seq_len, num_layers=num_layers, num_heads=num_heads,
                         mlp_ratio=mlp_ratio, num_classes=num_classes)

    fwd = jax.jit(functools.partial(convvit_forward, stride=stride, padding=padding,
                                    num_heads=num_heads))
    logits = fwd(x, params)
    logits = jax.block_until_ready(logits)

    assert logits.shape == (B, num_classes), logits.shape
    assert bool(jnp.all(jnp.isfinite(logits)))
    print("KERNEL_OK")
</pallas_src>

<mosaic_0001>
module attributes {stable_mosaic.version = 11 : i64} {
  func.func @_matmul_kernel(%arg0: i32, %arg1: i32, %arg2: i32, %arg3: memref<128x256xbf16, #tpu.memory_space<vmem>>, %arg4: memref<256x32xbf16, #tpu.memory_space<vmem>>, %arg5: memref<1x32xf32, #tpu.memory_space<vmem>>, %arg6: memref<128x32xbf16, #tpu.memory_space<vmem>>, %arg7: memref<128x32xf32, #tpu.memory_space<vmem>>) attributes {dimension_semantics = [#tpu.dimension_semantics<parallel>, #tpu.dimension_semantics<parallel>, #tpu.dimension_semantics<arbitrary>], iteration_bounds = array<i64: 1, 1, 1>, scalar_prefetch = 0 : i64, scratch_operands = 1 : i64, tpu.core_type = #tpu.core_type<tc>, window_params = [{transform_indices = @transform_0, window_bounds = array<i64: 128, 256>}, {transform_indices = @transform_1, window_bounds = array<i64: 256, 32>}, {transform_indices = @transform_2, window_bounds = array<i64: 1, 32>}, {transform_indices = @transform_3, window_bounds = array<i64: 128, 32>}]} {
    %c0_i32 = arith.constant 0 : i32
    %0 = arith.cmpi eq, %arg2, %c0_i32 : i32
    %1 = arith.extui %0 : i1 to i32
    %c0_i32_0 = arith.constant 0 : i32
    %2 = arith.cmpi ne, %1, %c0_i32_0 : i32
    scf.if %2 {
      %cst_10 = arith.constant 0.000000e+00 : f32
      %12 = vector.broadcast %cst_10 : f32 to vector<128x32xf32>
      %c0_11 = arith.constant 0 : index
      %c0_12 = arith.constant 0 : index
      %13 = vector.load %arg7[%c0_11, %c0_12] : memref<128x32xf32, #tpu.memory_space<vmem>>, vector<128x32xf32>
      tpu.vector_store %arg7[%c0_11, %c0_12], %12 {strides = array<i32>} : memref<128x32xf32, #tpu.memory_space<vmem>>, vector<128x32xf32>,
    } else {
    }
    %c0 = arith.constant 0 : index
    %c0_1 = arith.constant 0 : index
    %3 = vector.load %arg7[%c0, %c0_1] : memref<128x32xf32, #tpu.memory_space<vmem>>, vector<128x32xf32>
    %c0_2 = arith.constant 0 : index
    %c0_3 = arith.constant 0 : index
    %4 = vector.load %arg3[%c0_2, %c0_3] : memref<128x256xbf16, #tpu.memory_space<vmem>>, vector<128x256xbf16>
    %c0_4 = arith.constant 0 : index
    %c0_5 = arith.constant 0 : index
    %5 = vector.load %arg4[%c0_4, %c0_5] : memref<256x32xbf16, #tpu.memory_space<vmem>>, vector<256x32xbf16>
    %cst = arith.constant dense<0.000000e+00> : vector<128x32xf32>
    %6 = tpu.matmul %4, %5, %cst {dimension_numbers = #tpu.dot_dimension_numbers<[1], [0], [0], [1], [0, 0, 1, 1], [], []>} : vector<128x256xbf16>, vector<256x32xbf16>, vector<128x32xf32> -> vector<128x32xf32>
    %7 = arith.addf %3, %6 : vector<128x32xf32>
    %c0_6 = arith.constant 0 : index
    %c0_7 = arith.constant 0 : index
    %8 = vector.load %arg7[%c0_6, %c0_7] : memref<128x32xf32, #tpu.memory_space<vmem>>, vector<128x32xf32>
    tpu.vector_store %arg7[%c0_6, %c0_7], %7 {strides = array<i32>} : memref<128x32xf32, #tpu.memory_space<vmem>>, vector<128x32xf32>,
    %c0_i32_8 = arith.constant 0 : i32
    %9 = arith.cmpi eq, %arg2, %c0_i32_8 : i32
    %10 = arith.extui %9 : i1 to i32
    %c0_i32_9 = arith.constant 0 : i32
    %11 = arith.cmpi ne, %10, %c0_i32_9 : i32
    scf.if %11 {
      %c0_10 = arith.constant 0 : index
      %c0_11 = arith.constant 0 : index
      %12 = vector.load %arg7[%c0_10, %c0_11] : memref<128x32xf32, #tpu.memory_space<vmem>>, vector<128x32xf32>
      %c0_12 = arith.constant 0 : index
      %c0_13 = arith.constant 0 : index
      %13 = vector.load %arg5[%c0_12, %c0_13] : memref<1x32xf32, #tpu.memory_space<vmem>>, vector<1x32xf32>
      %14 = vector.broadcast %13 : vector<1x32xf32> to vector<128x32xf32>
      %15 = arith.addf %12, %14 : vector<128x32xf32>
      %cst_14 = arith.constant 0.000000e+00 : f32
      %16 = vector.broadcast %cst_14 : f32 to vector<128x32xf32>
      %17 = arith.maximumf %15, %16 : vector<128x32xf32>
      %18 = arith.truncf %17 : vector<128x32xf32> to vector<128x32xbf16>
      %c0_15 = arith.constant 0 : index
      %c0_16 = arith.constant 0 : index
      %19 = vector.load %arg6[%c0_15, %c0_16] : memref<128x32xbf16, #tpu.memory_space<vmem>>, vector<128x32xbf16>
      tpu.vector_store %arg6[%c0_15, %c0_16], %18 {strides = array<i32>} : memref<128x32xbf16, #tpu.memory_space<vmem>>, vector<128x32xbf16>,
    } else {
    }
    return
  }
  func.func @transform_0(%arg0: i32, %arg1: i32, %arg2: i32) -> (i32, i32) {
    %c0_i32 = arith.constant 0 : i32
    return %arg0, %arg2 : i32, i32
  }
  func.func @transform_1(%arg0: i32, %arg1: i32, %arg2: i32) -> (i32, i32) {
    %c0_i32 = arith.constant 0 : i32
    return %arg2, %arg1 : i32, i32
  }
  func.func @transform_2(%arg0: i32, %arg1: i32, %arg2: i32) -> (i32, i32) {
    %c0_i32 = arith.constant 0 : i32
    %c0_i32_0 = arith.constant 0 : i32
    return %c0_i32, %arg1 : i32, i32
  }
  func.func @transform_3(%arg0: i32, %arg1: i32, %arg2: i32) -> (i32, i32) {
    %c0_i32 = arith.constant 0 : i32
    return %arg0, %arg1 : i32, i32
  }
}

module attributes {stable_mosaic.version = 11 : i64} {
  func.func @_maxpool_kernel(%arg0: i32, %arg1: memref<1x5x5x32xbf16, #tpu.memory_space<vmem>>, %arg2: memref<1x5x5x32xbf16, #tpu.memory_space<vmem>>, %arg3: memref<1x5x5x32xbf16, #tpu.memory_space<vmem>>, %arg4: memref<1x5x5x32xbf16, #tpu.memory_space<vmem>>, %arg5: memref<1x4x4x32xbf16, #tpu.memory_space<vmem>>) attributes {dimension_semantics = [#tpu.dimension_semantics<parallel>], iteration_bounds = array<i64: 2>, scalar_prefetch = 0 : i64, scratch_operands = 0 : i64, tpu.core_type = #tpu.core_type<tc>, window_params = [{transform_indices = @transform_0, window_bounds = array<i64: 1, 5, 5, 32>}, {transform_indices = @transform_1, window_bounds = array<i64: 1, 5, 5, 32>}, {transform_indices = @transform_2, window_bounds = array<i64: 1, 5, 5, 32>}, {transform_indices = @transform_3, window_bounds = array<i64: 1, 5, 5, 32>}, {transform_indices = @transform_4, window_bounds = array<i64: 1, 4, 4, 32>}]} {
    %c0 = arith.constant 0 : index
    %c0_0 = arith.constant 0 : index
    %c0_1 = arith.constant 0 : index
    %c0_2 = arith.constant 0 : index
    %0 = vector.load %arg1[%c0, %c0_0, %c0_1, %c0_2] : memref<1x5x5x32xbf16, #tpu.memory_space<vmem>>, vector<1x5x5x32xbf16>
    %1 = vector.shape_cast %0 : vector<1x5x5x32xbf16> to vector<5x5x32xbf16>
    %2 = arith.extf %1 : vector<5x5x32xbf16> to vector<5x5x32xf32>
    %c0_3 = arith.constant 0 : index
    %c0_4 = arith.constant 0 : index
    %c0_5 = arith.constant 0 : index
    %c0_6 = arith.constant 0 : index
    %3 = vector.load %arg2[%c0_3, %c0_4, %c0_5, %c0_6] : memref<1x5x5x32xbf16, #tpu.memory_space<vmem>>, vector<1x5x5x32xbf16>
    %4 = vector.shape_cast %3 : vector<1x5x5x32xbf16> to vector<5x5x32xbf16>
    %5 = arith.extf %4 : vector<5x5x32xbf16> to vector<5x5x32xf32>
    %c0_7 = arith.constant 0 : index
    %c0_8 = arith.constant 0 : index
    %c0_9 = arith.constant 0 : index
    %c0_10 = arith.constant 0 : index
    %6 = vector.load %arg3[%c0_7, %c0_8, %c0_9, %c0_10] : memref<1x5x5x32xbf16, #tpu.memory_space<vmem>>, vector<1x5x5x32xbf16>
    %7 = vector.shape_cast %6 : vector<1x5x5x32xbf16> to vector<5x5x32xbf16>
    %8 = arith.extf %7 : vector<5x5x32xbf16> to vector<5x5x32xf32>
    %c0_11 = arith.constant 0 : index
    %c0_12 = arith.constant 0 : index
    %c0_13 = arith.constant 0 : index
    %c0_14 = arith.constant 0 : index
    %9 = vector.load %arg4[%c0_11, %c0_12, %c0_13, %c0_14] : memref<1x5x5x32xbf16, #tpu.memory_space<vmem>>, vector<1x5x5x32xbf16>
    %10 = vector.shape_cast %9 : vector<1x5x5x32xbf16> to vector<5x5x32xbf16>
    %11 = arith.extf %10 : vector<5x5x32xbf16> to vector<5x5x32xf32>
    %12 = vector.extract_strided_slice %2 {offsets = [0, 0, 0], sizes = [4, 4, 32], strides = [1, 1, 1]} : vector<5x5x32xf32> to vector<4x4x32xf32>
    %13 = vector.extract_strided_slice %5 {offsets = [0, 0, 0], sizes = [4, 4, 32], strides = [1, 1, 1]} : vector<5x5x32xf32> to vector<4x4x32xf32>
    %14 = arith.maximumf %12, %13 : vector<4x4x32xf32>
    %15 = vector.extract_strided_slice %2 {offsets = [0, 1, 0], sizes = [4, 4, 32], strides = [1, 1, 1]} : vector<5x5x32xf32> to vector<4x4x32xf32>
    %16 = arith.maximumf %14, %15 : vector<4x4x32xf32>
    %17 = vector.extract_strided_slice %8 {offsets = [0, 0, 0], sizes = [4, 4, 32], strides = [1, 1, 1]} : vector<5x5x32xf32> to vector<4x4x32xf32>
    %18 = arith.maximumf %16, %17 : vector<4x4x32xf32>
    %19 = vector.extract_strided_slice %11 {offsets = [0, 0, 0], sizes = [4, 4, 32], strides = [1, 1, 1]} : vector<5x5x32xf32> to vector<4x4x32xf32>
    %20 = arith.maximumf %18, %19 : vector<4x4x32xf32>
    %21 = vector.extract_strided_slice %8 {offsets = [0, 1, 0], sizes = [4, 4, 32], strides = [1, 1, 1]} : vector<5x5x32xf32> to vector<4x4x32xf32>
    %22 = arith.maximumf %20, %21 : vector<4x4x32xf32>
    %23 = vector.extract_strided_slice %2 {offsets = [1, 0, 0], sizes = [4, 4, 32], strides = [1, 1, 1]} : vector<5x5x32xf32> to vector<4x4x32xf32>
    %24 = arith.maximumf %22, %23 : vector<4x4x32xf32>
    %25 = vector.extract_strided_slice %5 {offsets = [1, 0, 0], sizes = [4, 4, 32], strides = [1, 1, 1]} : vector<5x5x32xf32> to vector<4x4x32xf32>
    %26 = arith.maximumf %24, %25 : vector<4x4x32xf32>
    %27 = vector.extract_strided_slice %2 {offsets = [1, 1, 0], sizes = [4, 4, 32], strides = [1, 1, 1]} : vector<5x5x32xf32> to vector<4x4x32xf32>
    %28 = arith.maximumf %26, %27 : vector<4x4x32xf32>
    %29 = arith.truncf %28 : vector<4x4x32xf32> to vector<4x4x32xbf16>
    %c0_15 = arith.constant 0 : index
    %c0_16 = arith.constant 0 : index
    %c0_17 = arith.constant 0 : index
    %c0_18 = arith.constant 0 : index
    %30 = vector.load %arg5[%c0_15, %c0_16, %c0_17, %c0_18] : memref<1x4x4x32xbf16, #tpu.memory_space<vmem>>, vector<1x4x4x32xbf16>
    %31 = vector.shape_cast %30 : vector<1x4x4x32xbf16> to vector<4x4x32xbf16>
    %32 = vector.shape_cast %29 : vector<4x4x32xbf16> to vector<1x4x4x32xbf16>
    tpu.vector_store %arg5[%c0_15, %c0_16, %c0_17, %c0_18], %32 {strides = array<i32>} : memref<1x4x4x32xbf16, #tpu.memory_space<vmem>>, vector<1x4x4x32xbf16>,
    return
  }
  func.func @transform_0(%arg0: i32) -> (i32, i32, i32, i32) {
    %c0_i32 = arith.constant 0 : i32
    %c0_i32_0 = arith.constant 0 : i32
    %c0_i32_1 = arith.constant 0 : i32
    %c0_i32_2 = arith.constant 0 : i32
    return %arg0, %c0_i32, %c0_i32_0, %c0_i32_1 : i32, i32, i32, i32
  }
  func.func @transform_1(%arg0: i32) -> (i32, i32, i32, i32) {
    %c0_i32 = arith.constant 0 : i32
    %c0_i32_0 = arith.constant 0 : i32
    %c0_i32_1 = arith.constant 0 : i32
    %c0_i32_2 = arith.constant 0 : i32
    return %arg0, %c0_i32, %c0_i32_0, %c0_i32_1 : i32, i32, i32, i32
  }
  func.func @transform_2(%arg0: i32) -> (i32, i32, i32, i32) {
    %c0_i32 = arith.constant 0 : i32
    %c0_i32_0 = arith.constant 0 : i32
    %c0_i32_1 = arith.constant 0 : i32
    %c0_i32_2 = arith.constant 0 : i32
    return %arg0, %c0_i32, %c0_i32_0, %c0_i32_1 : i32, i32, i32, i32
  }
  func.func @transform_3(%arg0: i32) -> (i32, i32, i32, i32) {
    %c0_i32 = arith.constant 0 : i32
    %c0_i32_0 = arith.constant 0 : i32
    %c0_i32_1 = arith.constant 0 : i32
    %c0_i32_2 = arith.constant 0 : i32
    return %arg0, %c0_i32, %c0_i32_0, %c0_i32_1 : i32, i32, i32, i32
  }
  func.func @transform_4(%arg0: i32) -> (i32, i32, i32, i32) {
    %c0_i32 = arith.constant 0 : i32
    %c0_i32_0 = arith.constant 0 : i32
    %c0_i32_1 = arith.constant 0 : i32
    %c0_i32_2 = arith.constant 0 : i32
    return %arg0, %c0_i32, %c0_i32_0, %c0_i32_1 : i32, i32, i32, i32
  }
}

module attributes {stable_mosaic.version = 11 : i64} {
  func.func @_ln_matmul_kernel(%arg0: i32, %arg1: i32, %arg2: memref<48x32xbf16, #tpu.memory_space<vmem>>, %arg3: memref<1x32xf32, #tpu.memory_space<vmem>>, %arg4: memref<1x32xf32, #tpu.memory_space<vmem>>, %arg5: memref<32x96xbf16, #tpu.memory_space<vmem>>, %arg6: memref<48x96xbf16, #tpu.memory_space<vmem>>) attributes {dimension_semantics = [#tpu.dimension_semantics<parallel>, #tpu.dimension_semantics<parallel>], iteration_bounds = array<i64: 1, 1>, scalar_prefetch = 0 : i64, scratch_operands = 0 : i64, tpu.core_type = #tpu.core_type<tc>, window_params = [{transform_indices = @transform_0, window_bounds = array<i64: 48, 32>}, {pipeline_mode = #tpu.pipeline_mode<synchronous>, transform_indices = @transform_1, window_bounds = array<i64: 1, 32>}, {pipeline_mode = #tpu.pipeline_mode<synchronous>, transform_indices = @transform_2, window_bounds = array<i64: 1, 32>}, {transform_indices = @transform_3, window_bounds = array<i64: 32, 96>}, {transform_indices = @transform_4, window_bounds = array<i64: 48, 96>}]} {
    %c0 = arith.constant 0 : index
    %c0_0 = arith.constant 0 : index
    %0 = vector.load %arg2[%c0, %c0_0] : memref<48x32xbf16, #tpu.memory_space<vmem>>, vector<48x32xbf16>
    %1 = arith.extf %0 : vector<48x32xbf16> to vector<48x32xf32>
    %cst = arith.constant dense<0.000000e+00> : vector<48xf32>
    %2 = vector.multi_reduction <add>, %1, %cst [1] : vector<48x32xf32> to vector<48xf32>
    %3 = vector.shape_cast %2 : vector<48xf32> to vector<48x1xf32>
    %cst_1 = arith.constant 3.200000e+01 : f32
    %4 = vector.broadcast %cst_1 : f32 to vector<48x1xf32>
    %5 = arith.divf %3, %4 : vector<48x1xf32>
    %6 = vector.broadcast %5 : vector<48x1xf32> to vector<48x32xf32>
    %7 = arith.subf %1, %6 : vector<48x32xf32>
    %8 = arith.mulf %7, %7 : vector<48x32xf32>
    %cst_2 = arith.constant dense<0.000000e+00> : vector<48xf32>
    %9 = vector.multi_reduction <add>, %8, %cst_2 [1] : vector<48x32xf32> to vector<48xf32>
    %10 = vector.shape_cast %9 : vector<48xf32> to vector<48x1xf32>
    %cst_3 = arith.constant 3.200000e+01 : f32
    %11 = vector.broadcast %cst_3 : f32 to vector<48x1xf32>
    %12 = arith.divf %10, %11 : vector<48x1xf32>
    %13 = vector.broadcast %5 : vector<48x1xf32> to vector<48x32xf32>
    %14 = arith.subf %1, %13 : vector<48x32xf32>
    %cst_4 = arith.constant 9.99999974E-6 : f32
    %15 = vector.broadcast %cst_4 : f32 to vector<48x1xf32>
    %16 = arith.addf %12, %15 : vector<48x1xf32>
    %17 = math.rsqrt %16 : vector<48x1xf32>
    %18 = vector.broadcast %17 : vector<48x1xf32> to vector<48x32xf32>
    %19 = arith.mulf %14, %18 : vector<48x32xf32>
    %c0_5 = arith.constant 0 : index
    %c0_6 = arith.constant 0 : index
    %20 = vector.load %arg3[%c0_5, %c0_6] : memref<1x32xf32, #tpu.memory_space<vmem>>, vector<1x32xf32>
    %21 = vector.broadcast %20 : vector<1x32xf32> to vector<48x32xf32>
    %22 = arith.mulf %19, %21 : vector<48x32xf32>
    %c0_7 = arith.constant 0 : index
    %c0_8 = arith.constant 0 : index
    %23 = vector.load %arg4[%c0_7, %c0_8] : memref<1x32xf32, #tpu.memory_space<vmem>>, vector<1x32xf32>
    %24 = vector.broadcast %23 : vector<1x32xf32> to vector<48x32xf32>
    %25 = arith.addf %22, %24 : vector<48x32xf32>
    %26 = arith.truncf %25 : vector<48x32xf32> to vector<48x32xbf16>
    %c0_9 = arith.constant 0 : index
    %c0_10 = arith.constant 0 : index
    %27 = vector.load %arg5[%c0_9, %c0_10] : memref<32x96xbf16, #tpu.memory_space<vmem>>, vector<32x96xbf16>
    %cst_11 = arith.constant dense<0.000000e+00> : vector<48x96xf32>
    %28 = tpu.matmul %26, %27, %cst_11 {dimension_numbers = #tpu.dot_dimension_numbers<[1], [0], [0], [1], [0, 0, 1, 1], [], []>} : vector<48x32xbf16>, vector<32x96xbf16>, vector<48x96xf32> -> vector<48x96xf32>
    %29 = arith.truncf %28 : vector<48x96xf32> to vector<48x96xbf16>
    %c0_12 = arith.constant 0 : index
    %c0_13 = arith.constant 0 : index
    %30 = vector.load %arg6[%c0_12, %c0_13] : memref<48x96xbf16, #tpu.memory_space<vmem>>, vector<48x96xbf16>
    tpu.vector_store %arg6[%c0_12, %c0_13], %29 {strides = array<i32>} : memref<48x96xbf16, #tpu.memory_space<vmem>>, vector<48x96xbf16>,
    return
  }
  func.func @transform_0(%arg0: i32, %arg1: i32) -> (i32, i32) {
    %c0_i32 = arith.constant 0 : i32
    %c0_i32_0 = arith.constant 0 : i32
    return %arg0, %c0_i32 : i32, i32
  }
  func.func @transform_1(%arg0: i32, %arg1: i32) -> (i32, i32) {
    %c0_i32 = arith.constant 0 : i32
    %c0_i32_0 = arith.constant 0 : i32
    %c0_i32_1 = arith.constant 0 : i32
    return %c0_i32, %c0_i32_0 : i32, i32
  }
  func.func @transform_2(%arg0: i32, %arg1: i32) -> (i32, i32) {
    %c0_i32 = arith.constant 0 : i32
    %c0_i32_0 = arith.constant 0 : i32
    %c0_i32_1 = arith.constant 0 : i32
    return %c0_i32, %c0_i32_0 : i32, i32
  }
  func.func @transform_3(%arg0: i32, %arg1: i32) -> (i32, i32) {
    %c0_i32 = arith.constant 0 : i32
    %c0_i32_0 = arith.constant 0 : i32
    return %c0_i32, %arg1 : i32, i32
  }
  func.func @transform_4(%arg0: i32, %arg1: i32) -> (i32, i32) {
    %c0_i32 = arith.constant 0 : i32
    return %arg0, %arg1 : i32, i32
  }
}

module attributes {stable_mosaic.version = 11 : i64} {
  func.func @_attention_kernel(%arg0: i32, %arg1: memref<1x24x96xbf16, #tpu.memory_space<vmem>>, %arg2: memref<1x24x32xbf16, #tpu.memory_space<vmem>>) attributes {dimension_semantics = [#tpu.dimension_semantics<parallel>], iteration_bounds = array<i64: 2>, scalar_prefetch = 0 : i64, scratch_operands = 0 : i64, tpu.core_type = #tpu.core_type<tc>, window_params = [{transform_indices = @transform_0, window_bounds = array<i64: 1, 24, 96>}, {transform_indices = @transform_1, window_bounds = array<i64: 1, 24, 32>}]} {
    %c0 = arith.constant 0 : index
    %c0_0 = arith.constant 0 : index
    %c0_1 = arith.constant 0 : index
    %0 = vector.load %arg1[%c0, %c0_0, %c0_1] : memref<1x24x96xbf16, #tpu.memory_space<vmem>>, vector<1x24x96xbf16>
    %1 = vector.shape_cast %0 : vector<1x24x96xbf16> to vector<24x96xbf16>
    %2 = tpu.iota {dimensions = array<i32: 1>} : vector<24x24xi32>
    %c17_i32 = arith.constant 17 : i32
    %3 = vector.broadcast %c17_i32 : i32 to vector<24x24xi32>
    %4 = arith.cmpi slt, %2, %3 : vector<24x24xi32>
    %5 = vector.extract_strided_slice %1 {offsets = [0, 0], sizes = [24, 16], strides = [1, 1]} : vector<24x96xbf16> to vector<24x16xbf16>
    %6 = vector.extract_strided_slice %1 {offsets = [0, 32], sizes = [24, 16], strides = [1, 1]} : vector<24x96xbf16> to vector<24x16xbf16>
    %7 = vector.extract_strided_slice %1 {offsets = [0, 64], sizes = [24, 16], strides = [1, 1]} : vector<24x96xbf16> to vector<24x16xbf16>
    %cst = arith.constant dense<0.000000e+00> : vector<24x24xf32>
    %8 = tpu.matmul %5, %6, %cst {dimension_numbers = #tpu.dot_dimension_numbers<[1], [1], [0], [0], [0, 0, 1, 0], [], []>} : vector<24x16xbf16>, vector<24x16xbf16>, vector<24x24xf32> -> vector<24x24xf32>
    %cst_2 = arith.constant 2.500000e-01 : f32
    %9 = vector.broadcast %cst_2 : f32 to vector<24x24xf32>
    %10 = arith.mulf %8, %9 : vector<24x24xf32>
    %cst_3 = arith.constant -1.000000e+30 : f32
    %11 = vector.broadcast %cst_3 : f32 to vector<24x24xf32>
    %12 = arith.select %4, %10, %11 : vector<24x24xi1>, vector<24x24xf32>
    %cst_4 = arith.constant dense<0xFF800000> : vector<24xf32>
    %13 = vector.multi_reduction <maximumf>, %12, %cst_4 [1] : vector<24x24xf32> to vector<24xf32>
    %14 = vector.shape_cast %13 : vector<24xf32> to vector<24x1xf32>
    %15 = vector.broadcast %14 : vector<24x1xf32> to vector<24x24xf32>
    %16 = arith.subf %12, %15 : vector<24x24xf32>
    %17 = math.exp %16 : vector<24x24xf32>
    %cst_5 = arith.constant dense<0.000000e+00> : vector<24xf32>
    %18 = vector.multi_reduction <add>, %17, %cst_5 [1] : vector<24x24xf32> to vector<24xf32>
    %19 = vector.shape_cast %18 : vector<24xf32> to vector<24x1xf32>
    %20 = arith.truncf %17 : vector<24x24xf32> to vector<24x24xbf16>
    %cst_6 = arith.constant dense<0.000000e+00> : vector<24x16xf32>
    %21 = tpu.matmul %20, %7, %cst_6 {dimension_numbers = #tpu.dot_dimension_numbers<[1], [0], [0], [1], [0, 0, 1, 1], [], []>} : vector<24x24xbf16>, vector<24x16xbf16>, vector<24x16xf32> -> vector<24x16xf32>
    %22 = tpu.reciprocal %19 {approx = true} : vector<24x1xf32> -> vector<24x1xf32>
    %23 = vector.broadcast %22 : vector<24x1xf32> to vector<24x16xf32>
    %24 = arith.mulf %21, %23 : vector<24x16xf32>
    %25 = vector.extract_strided_slice %1 {offsets = [0, 16], sizes = [24, 16], strides = [1, 1]} : vector<24x96xbf16> to vector<24x16xbf16>
    %26 = vector.extract_strided_slice %1 {offsets = [0, 48], sizes = [24, 16], strides = [1, 1]} : vector<24x96xbf16> to vector<24x16xbf16>
    %27 = vector.extract_strided_slice %1 {offsets = [0, 80], sizes = [24, 16], strides = [1, 1]} : vector<24x96xbf16> to vector<24x16xbf16>
    %cst_7 = arith.constant dense<0.000000e+00> : vector<24x24xf32>
    %28 = tpu.matmul %25, %26, %cst_7 {dimension_numbers = #tpu.dot_dimension_numbers<[1], [1], [0], [0], [0, 0, 1, 0], [], []>} : vector<24x16xbf16>, vector<24x16xbf16>, vector<24x24xf32> -> vector<24x24xf32>
    %cst_8 = arith.constant 2.500000e-01 : f32
    %29 = vector.broadcast %cst_8 : f32 to vector<24x24xf32>
    %30 = arith.mulf %28, %29 : vector<24x24xf32>
    %cst_9 = arith.constant -1.000000e+30 : f32
    %31 = vector.broadcast %cst_9 : f32 to vector<24x24xf32>
    %32 = arith.select %4, %30, %31 : vector<24x24xi1>, vector<24x24xf32>
    %cst_10 = arith.constant dense<0xFF800000> : vector<24xf32>
    %33 = vector.multi_reduction <maximumf>, %32, %cst_10 [1] : vector<24x24xf32> to vector<24xf32>
    %34 = vector.shape_cast %33 : vector<24xf32> to vector<24x1xf32>
    %35 = vector.broadcast %34 : vector<24x1xf32> to vector<24x24xf32>
    %36 = arith.subf %32, %35 : vector<24x24xf32>
    %37 = math.exp %36 : vector<24x24xf32>
    %cst_11 = arith.constant dense<0.000000e+00> : vector<24xf32>
    %38 = vector.multi_reduction <add>, %37, %cst_11 [1] : vector<24x24xf32> to vector<24xf32>
    %39 = vector.shape_cast %38 : vector<24xf32> to vector<24x1xf32>
    %40 = arith.truncf %37 : vector<24x24xf32> to vector<24x24xbf16>
    %cst_12 = arith.constant dense<0.000000e+00> : vector<24x16xf32>
    %41 = tpu.matmul %40, %27, %cst_12 {dimension_numbers = #tpu.dot_dimension_numbers<[1], [0], [0], [1], [0, 0, 1, 1], [], []>} : vector<24x24xbf16>, vector<24x16xbf16>, vector<24x16xf32> -> vector<24x16xf32>
    %42 = tpu.reciprocal %39 {approx = true} : vector<24x1xf32> -> vector<24x1xf32>
    %43 = vector.broadcast %42 : vector<24x1xf32> to vector<24x16xf32>
    %44 = arith.mulf %41, %43 : vector<24x16xf32>
    %45 = tpu.concatenate %24, %44 in 1 : vector<24x16xf32>, vector<24x16xf32> -> vector<24x32xf32>
    %46 = arith.truncf %45 : vector<24x32xf32> to vector<24x32xbf16>
    %c0_13 = arith.constant 0 : index
    %c0_14 = arith.constant 0 : index
    %c0_15 = arith.constant 0 : index
    %47 = vector.load %arg2[%c0_13, %c0_14, %c0_15] : memref<1x24x32xbf16, #tpu.memory_space<vmem>>, vector<1x24x32xbf16>
    %48 = vector.shape_cast %47 : vector<1x24x32xbf16> to vector<24x32xbf16>
    %49 = vector.shape_cast %46 : vector<24x32xbf16> to vector<1x24x32xbf16>
    tpu.vector_store %arg2[%c0_13, %c0_14, %c0_15], %49 {strides = array<i32>} : memref<1x24x32xbf16, #tpu.memory_space<vmem>>, vector<1x24x32xbf16>,
    return
  }
  func.func @transform_0(%arg0: i32) -> (i32, i32, i32) {
    %c0_i32 = arith.constant 0 : i32
    %c0_i32_0 = arith.constant 0 : i32
    %c0_i32_1 = arith.constant 0 : i32
    return %arg0, %c0_i32, %c0_i32_0 : i32, i32, i32
  }
  func.func @transform_1(%arg0: i32) -> (i32, i32, i32) {
    %c0_i32 = arith.constant 0 : i32
    %c0_i32_0 = arith.constant 0 : i32
    %c0_i32_1 = arith.constant 0 : i32
    return %arg0, %c0_i32, %c0_i32_0 : i32, i32, i32
  }
}

module attributes {stable_mosaic.version = 11 : i64} {
  func.func @_matmul_kernel(%arg0: i32, %arg1: i32, %arg2: i32, %arg3: memref<48x32xbf16, #tpu.memory_space<vmem>>, %arg4: memref<32x32xbf16, #tpu.memory_space<vmem>>, %arg5: memref<1x32xf32, #tpu.memory_space<vmem>>, %arg6: memref<48x32xbf16, #tpu.memory_space<vmem>>, %arg7: memref<48x32xbf16, #tpu.memory_space<vmem>>, %arg8: memref<48x32xf32, #tpu.memory_space<vmem>>) attributes {dimension_semantics = [#tpu.dimension_semantics<parallel>, #tpu.dimension_semantics<parallel>, #tpu.dimension_semantics<arbitrary>], iteration_bounds = array<i64: 1, 1, 1>, scalar_prefetch = 0 : i64, scratch_operands = 1 : i64, tpu.core_type = #tpu.core_type<tc>, window_params = [{transform_indices = @transform_0, window_bounds = array<i64: 48, 32>}, {transform_indices = @transform_1, window_bounds = array<i64: 32, 32>}, {transform_indices = @transform_2, window_bounds = array<i64: 1, 32>}, {transform_indices = @transform_3, window_bounds = array<i64: 48, 32>}, {transform_indices = @transform_4, window_bounds = array<i64: 48, 32>}]} {
    %c0_i32 = arith.constant 0 : i32
    %0 = arith.cmpi eq, %arg2, %c0_i32 : i32
    %1 = arith.extui %0 : i1 to i32
    %c0_i32_0 = arith.constant 0 : i32
    %2 = arith.cmpi ne, %1, %c0_i32_0 : i32
    scf.if %2 {
      %cst_10 = arith.constant 0.000000e+00 : f32
      %12 = vector.broadcast %cst_10 : f32 to vector<48x32xf32>
      %c0_11 = arith.constant 0 : index
      %c0_12 = arith.constant 0 : index
      %13 = vector.load %arg8[%c0_11, %c0_12] : memref<48x32xf32, #tpu.memory_space<vmem>>, vector<48x32xf32>
      tpu.vector_store %arg8[%c0_11, %c0_12], %12 {strides = array<i32>} : memref<48x32xf32, #tpu.memory_space<vmem>>, vector<48x32xf32>,
    } else {
    }
    %c0 = arith.constant 0 : index
    %c0_1 = arith.constant 0 : index
    %3 = vector.load %arg8[%c0, %c0_1] : memref<48x32xf32, #tpu.memory_space<vmem>>, vector<48x32xf32>
    %c0_2 = arith.constant 0 : index
    %c0_3 = arith.constant 0 : index
    %4 = vector.load %arg3[%c0_2, %c0_3] : memref<48x32xbf16, #tpu.memory_space<vmem>>, vector<48x32xbf16>
    %c0_4 = arith.constant 0 : index
    %c0_5 = arith.constant 0 : index
    %5 = vector.load %arg4[%c0_4, %c0_5] : memref<32x32xbf16, #tpu.memory_space<vmem>>, vector<32x32xbf16>
    %cst = arith.constant dense<0.000000e+00> : vector<48x32xf32>
    %6 = tpu.matmul %4, %5, %cst {dimension_numbers = #tpu.dot_dimension_numbers<[1], [0], [0], [1], [0, 0, 1, 1], [], []>} : vector<48x32xbf16>, vector<32x32xbf16>, vector<48x32xf32> -> vector<48x32xf32>
    %7 = arith.addf %3, %6 : vector<48x32xf32>
    %c0_6 = arith.constant 0 : index
    %c0_7 = arith.constant 0 : index
    %8 = vector.load %arg8[%c0_6, %c0_7] : memref<48x32xf32, #tpu.memory_space<vmem>>, vector<48x32xf32>
    tpu.vector_store %arg8[%c0_6, %c0_7], %7 {strides = array<i32>} : memref<48x32xf32, #tpu.memory_space<vmem>>, vector<48x32xf32>,
    %c0_i32_8 = arith.constant 0 : i32
    %9 = arith.cmpi eq, %arg2, %c0_i32_8 : i32
    %10 = arith.extui %9 : i1 to i32
    %c0_i32_9 = arith.constant 0 : i32
    %11 = arith.cmpi ne, %10, %c0_i32_9 : i32
    scf.if %11 {
      %c0_10 = arith.constant 0 : index
      %c0_11 = arith.constant 0 : index
      %12 = vector.load %arg8[%c0_10, %c0_11] : memref<48x32xf32, #tpu.memory_space<vmem>>, vector<48x32xf32>
      %c0_12 = arith.constant 0 : index
      %c0_13 = arith.constant 0 : index
      %13 = vector.load %arg5[%c0_12, %c0_13] : memref<1x32xf32, #tpu.memory_space<vmem>>, vector<1x32xf32>
      %14 = vector.broadcast %13 : vector<1x32xf32> to vector<48x32xf32>
      %15 = arith.addf %12, %14 : vector<48x32xf32>
      %c0_14 = arith.constant 0 : index
      %c0_15 = arith.constant 0 : index
      %16 = vector.load %arg6[%c0_14, %c0_15] : memref<48x32xbf16, #tpu.memory_space<vmem>>, vector<48x32xbf16>
      %17 = arith.extf %16 : vector<48x32xbf16> to vector<48x32xf32>
      %18 = arith.addf %15, %17 : vector<48x32xf32>
      %19 = arith.truncf %18 : vector<48x32xf32> to vector<48x32xbf16>
      %c0_16 = arith.constant 0 : index
      %c0_17 = arith.constant 0 : index
      %20 = vector.load %arg7[%c0_16, %c0_17] : memref<48x32xbf16, #tpu.memory_space<vmem>>, vector<48x32xbf16>
      tpu.vector_store %arg7[%c0_16, %c0_17], %19 {strides = array<i32>} : memref<48x32xbf16, #tpu.memory_space<vmem>>, vector<48x32xbf16>,
    } else {
    }
    return
  }
  func.func @transform_0(%arg0: i32, %arg1: i32, %arg2: i32) -> (i32, i32) {
    %c0_i32 = arith.constant 0 : i32
    return %arg0, %arg2 : i32, i32
  }
  func.func @transform_1(%arg0: i32, %arg1: i32, %arg2: i32) -> (i32, i32) {
    %c0_i32 = arith.constant 0 : i32
    return %arg2, %arg1 : i32, i32
  }
  func.func @transform_2(%arg0: i32, %arg1: i32, %arg2: i32) -> (i32, i32) {
    %c0_i32 = arith.constant 0 : i32
    %c0_i32_0 = arith.constant 0 : i32
    return %c0_i32, %arg1 : i32, i32
  }
  func.func @transform_3(%arg0: i32, %arg1: i32, %arg2: i32) -> (i32, i32) {
    %c0_i32 = arith.constant 0 : i32
    return %arg0, %arg1 : i32, i32
  }
  func.func @transform_4(%arg0: i32, %arg1: i32, %arg2: i32) -> (i32, i32) {
    %c0_i32 = arith.constant 0 : i32
    return %arg0, %arg1 : i32, i32
  }
}

module attributes {stable_mosaic.version = 11 : i64} {
  func.func @_matmul_kernel(%arg0: i32, %arg1: i32, %arg2: i32, %arg3: memref<48x32xbf16, #tpu.memory_space<vmem>>, %arg4: memref<32x64xbf16, #tpu.memory_space<vmem>>, %arg5: memref<1x64xf32, #tpu.memory_space<vmem>>, %arg6: memref<48x64xbf16, #tpu.memory_space<vmem>>, %arg7: memref<48x64xf32, #tpu.memory_space<vmem>>) attributes {dimension_semantics = [#tpu.dimension_semantics<parallel>, #tpu.dimension_semantics<parallel>, #tpu.dimension_semantics<arbitrary>], iteration_bounds = array<i64: 1, 1, 1>, scalar_prefetch = 0 : i64, scratch_operands = 1 : i64, tpu.core_type = #tpu.core_type<tc>, window_params = [{transform_indices = @transform_0, window_bounds = array<i64: 48, 32>}, {transform_indices = @transform_1, window_bounds = array<i64: 32, 64>}, {transform_indices = @transform_2, window_bounds = array<i64: 1, 64>}, {transform_indices = @transform_3, window_bounds = array<i64: 48, 64>}]} {
    %c0_i32 = arith.constant 0 : i32
    %0 = arith.cmpi eq, %arg2, %c0_i32 : i32
    %1 = arith.extui %0 : i1 to i32
    %c0_i32_0 = arith.constant 0 : i32
    %2 = arith.cmpi ne, %1, %c0_i32_0 : i32
    scf.if %2 {
      %cst_10 = arith.constant 0.000000e+00 : f32
      %12 = vector.broadcast %cst_10 : f32 to vector<48x64xf32>
      %c0_11 = arith.constant 0 : index
      %c0_12 = arith.constant 0 : index
      %13 = vector.load %arg7[%c0_11, %c0_12] : memref<48x64xf32, #tpu.memory_space<vmem>>, vector<48x64xf32>
      tpu.vector_store %arg7[%c0_11, %c0_12], %12 {strides = array<i32>} : memref<48x64xf32, #tpu.memory_space<vmem>>, vector<48x64xf32>,
    } else {
    }
    %c0 = arith.constant 0 : index
    %c0_1 = arith.constant 0 : index
    %3 = vector.load %arg7[%c0, %c0_1] : memref<48x64xf32, #tpu.memory_space<vmem>>, vector<48x64xf32>
    %c0_2 = arith.constant 0 : index
    %c0_3 = arith.constant 0 : index
    %4 = vector.load %arg3[%c0_2, %c0_3] : memref<48x32xbf16, #tpu.memory_space<vmem>>, vector<48x32xbf16>
    %c0_4 = arith.constant 0 : index
    %c0_5 = arith.constant 0 : index
    %5 = vector.load %arg4[%c0_4, %c0_5] : memref<32x64xbf16, #tpu.memory_space<vmem>>, vector<32x64xbf16>
    %cst = arith.constant dense<0.000000e+00> : vector<48x64xf32>
    %6 = tpu.matmul %4, %5, %cst {dimension_numbers = #tpu.dot_dimension_numbers<[1], [0], [0], [1], [0, 0, 1, 1], [], []>} : vector<48x32xbf16>, vector<32x64xbf16>, vector<48x64xf32> -> vector<48x64xf32>
    %7 = arith.addf %3, %6 : vector<48x64xf32>
    %c0_6 = arith.constant 0 : index
    %c0_7 = arith.constant 0 : index
    %8 = vector.load %arg7[%c0_6, %c0_7] : memref<48x64xf32, #tpu.memory_space<vmem>>, vector<48x64xf32>
    tpu.vector_store %arg7[%c0_6, %c0_7], %7 {strides = array<i32>} : memref<48x64xf32, #tpu.memory_space<vmem>>, vector<48x64xf32>,
    %c0_i32_8 = arith.constant 0 : i32
    %9 = arith.cmpi eq, %arg2, %c0_i32_8 : i32
    %10 = arith.extui %9 : i1 to i32
    %c0_i32_9 = arith.constant 0 : i32
    %11 = arith.cmpi ne, %10, %c0_i32_9 : i32
    scf.if %11 {
      %c0_10 = arith.constant 0 : index
      %c0_11 = arith.constant 0 : index
      %12 = vector.load %arg7[%c0_10, %c0_11] : memref<48x64xf32, #tpu.memory_space<vmem>>, vector<48x64xf32>
      %c0_12 = arith.constant 0 : index
      %c0_13 = arith.constant 0 : index
      %13 = vector.load %arg5[%c0_12, %c0_13] : memref<1x64xf32, #tpu.memory_space<vmem>>, vector<1x64xf32>
      %14 = vector.broadcast %13 : vector<1x64xf32> to vector<48x64xf32>
      %15 = arith.addf %12, %14 : vector<48x64xf32>
      %16 = arith.mulf %15, %15 : vector<48x64xf32>
      %17 = arith.mulf %15, %16 : vector<48x64xf32>
      %cst_14 = arith.constant 4.471500e-02 : f32
      %18 = vector.broadcast %cst_14 : f32 to vector<48x64xf32>
      %19 = arith.mulf %18, %17 : vector<48x64xf32>
      %20 = arith.addf %15, %19 : vector<48x64xf32>
      %cst_15 = arith.constant 0.797884583 : f32
      %21 = vector.broadcast %cst_15 : f32 to vector<48x64xf32>
      %22 = arith.mulf %21, %20 : vector<48x64xf32>
      %23 = math.tanh %22 : vector<48x64xf32>
      %cst_16 = arith.constant 1.000000e+00 : f32
      %24 = vector.broadcast %cst_16 : f32 to vector<48x64xf32>
      %25 = arith.addf %24, %23 : vector<48x64xf32>
      %cst_17 = arith.constant 5.000000e-01 : f32
      %26 = vector.broadcast %cst_17 : f32 to vector<48x64xf32>
      %27 = arith.mulf %26, %25 : vector<48x64xf32>
      %28 = arith.mulf %15, %27 : vector<48x64xf32>
      %29 = arith.truncf %28 : vector<48x64xf32> to vector<48x64xbf16>
      %c0_18 = arith.constant 0 : index
      %c0_19 = arith.constant 0 : index
      %30 = vector.load %arg6[%c0_18, %c0_19] : memref<48x64xbf16, #tpu.memory_space<vmem>>, vector<48x64xbf16>
      tpu.vector_store %arg6[%c0_18, %c0_19], %29 {strides = array<i32>} : memref<48x64xbf16, #tpu.memory_space<vmem>>, vector<48x64xbf16>,
    } else {
    }
    return
  }
  func.func @transform_0(%arg0: i32, %arg1: i32, %arg2: i32) -> (i32, i32) {
    %c0_i32 = arith.constant 0 : i32
    return %arg0, %arg2 : i32, i32
  }
  func.func @transform_1(%arg0: i32, %arg1: i32, %arg2: i32) -> (i32, i32) {
    %c0_i32 = arith.constant 0 : i32
    return %arg2, %arg1 : i32, i32
  }
  func.func @transform_2(%arg0: i32, %arg1: i32, %arg2: i32) -> (i32, i32) {
    %c0_i32 = arith.constant 0 : i32
    %c0_i32_0 = arith.constant 0 : i32
    return %c0_i32, %arg1 : i32, i32
  }
  func.func @transform_3(%arg0: i32, %arg1: i32, %arg2: i32) -> (i32, i32) {
    %c0_i32 = arith.constant 0 : i32
    return %arg0, %arg1 : i32, i32
  }
}

module attributes {stable_mosaic.version = 11 : i64} {
  func.func @_layernorm_kernel(%arg0: i32, %arg1: memref<48x32xbf16, #tpu.memory_space<vmem>>, %arg2: memref<1x32xf32, #tpu.memory_space<vmem>>, %arg3: memref<1x32xf32, #tpu.memory_space<vmem>>, %arg4: memref<48x32xbf16, #tpu.memory_space<vmem>>) attributes {dimension_semantics = [#tpu.dimension_semantics<parallel>], iteration_bounds = array<i64: 1>, scalar_prefetch = 0 : i64, scratch_operands = 0 : i64, tpu.core_type = #tpu.core_type<tc>, window_params = [{transform_indices = @transform_0, window_bounds = array<i64: 48, 32>}, {pipeline_mode = #tpu.pipeline_mode<synchronous>, transform_indices = @transform_1, window_bounds = array<i64: 1, 32>}, {pipeline_mode = #tpu.pipeline_mode<synchronous>, transform_indices = @transform_2, window_bounds = array<i64: 1, 32>}, {transform_indices = @transform_3, window_bounds = array<i64: 48, 32>}]} {
    %c0 = arith.constant 0 : index
    %c0_0 = arith.constant 0 : index
    %0 = vector.load %arg1[%c0, %c0_0] : memref<48x32xbf16, #tpu.memory_space<vmem>>, vector<48x32xbf16>
    %1 = arith.extf %0 : vector<48x32xbf16> to vector<48x32xf32>
    %cst = arith.constant dense<0.000000e+00> : vector<48xf32>
    %2 = vector.multi_reduction <add>, %1, %cst [1] : vector<48x32xf32> to vector<48xf32>
    %3 = vector.shape_cast %2 : vector<48xf32> to vector<48x1xf32>
    %cst_1 = arith.constant 3.200000e+01 : f32
    %4 = vector.broadcast %cst_1 : f32 to vector<48x1xf32>
    %5 = arith.divf %3, %4 : vector<48x1xf32>
    %6 = vector.broadcast %5 : vector<48x1xf32> to vector<48x32xf32>
    %7 = arith.subf %1, %6 : vector<48x32xf32>
    %8 = arith.mulf %7, %7 : vector<48x32xf32>
    %cst_2 = arith.constant dense<0.000000e+00> : vector<48xf32>
    %9 = vector.multi_reduction <add>, %8, %cst_2 [1] : vector<48x32xf32> to vector<48xf32>
    %10 = vector.shape_cast %9 : vector<48xf32> to vector<48x1xf32>
    %cst_3 = arith.constant 3.200000e+01 : f32
    %11 = vector.broadcast %cst_3 : f32 to vector<48x1xf32>
    %12 = arith.divf %10, %11 : vector<48x1xf32>
    %13 = vector.broadcast %5 : vector<48x1xf32> to vector<48x32xf32>
    %14 = arith.subf %1, %13 : vector<48x32xf32>
    %cst_4 = arith.constant 9.99999974E-6 : f32
    %15 = vector.broadcast %cst_4 : f32 to vector<48x1xf32>
    %16 = arith.addf %12, %15 : vector<48x1xf32>
    %17 = math.rsqrt %16 : vector<48x1xf32>
    %18 = vector.broadcast %17 : vector<48x1xf32> to vector<48x32xf32>
    %19 = arith.mulf %14, %18 : vector<48x32xf32>
    %c0_5 = arith.constant 0 : index
    %c0_6 = arith.constant 0 : index
    %20 = vector.load %arg2[%c0_5, %c0_6] : memref<1x32xf32, #tpu.memory_space<vmem>>, vector<1x32xf32>
    %21 = vector.broadcast %20 : vector<1x32xf32> to vector<48x32xf32>
    %22 = arith.mulf %19, %21 : vector<48x32xf32>
    %c0_7 = arith.constant 0 : index
    %c0_8 = arith.constant 0 : index
    %23 = vector.load %arg3[%c0_7, %c0_8] : memref<1x32xf32, #tpu.memory_space<vmem>>, vector<1x32xf32>
    %24 = vector.broadcast %23 : vector<1x32xf32> to vector<48x32xf32>
    %25 = arith.addf %22, %24 : vector<48x32xf32>
    %26 = arith.truncf %25 : vector<48x32xf32> to vector<48x32xbf16>
    %c0_9 = arith.constant 0 : index
    %c0_10 = arith.constant 0 : index
    %27 = vector.load %arg4[%c0_9, %c0_10] : memref<48x32xbf16, #tpu.memory_space<vmem>>, vector<48x32xbf16>
    tpu.vector_store %arg4[%c0_9, %c0_10], %26 {strides = array<i32>} : memref<48x32xbf16, #tpu.memory_space<vmem>>, vector<48x32xbf16>,
    return
  }
  func.func @transform_0(%arg0: i32) -> (i32, i32) {
    %c0_i32 = arith.constant 0 : i32
    %c0_i32_0 = arith.constant 0 : i32
    return %arg0, %c0_i32 : i32, i32
  }
  func.func @transform_1(%arg0: i32) -> (i32, i32) {
    %c0_i32 = arith.constant 0 : i32
    %c0_i32_0 = arith.constant 0 : i32
    %c0_i32_1 = arith.constant 0 : i32
    return %c0_i32, %c0_i32_0 : i32, i32
  }
  func.func @transform_2(%arg0: i32) -> (i32, i32) {
    %c0_i32 = arith.constant 0 : i32
    %c0_i32_0 = arith.constant 0 : i32
    %c0_i32_1 = arith.constant 0 : i32
    return %c0_i32, %c0_i32_0 : i32, i32
  }
  func.func @transform_3(%arg0: i32) -> (i32, i32) {
    %c0_i32 = arith.constant 0 : i32
    %c0_i32_0 = arith.constant 0 : i32
    return %arg0, %c0_i32 : i32, i32
  }
}

module attributes {stable_mosaic.version = 11 : i64} {
  func.func @_matmul_kernel(%arg0: i32, %arg1: i32, %arg2: i32, %arg3: memref<48x64xbf16, #tpu.memory_space<vmem>>, %arg4: memref<64x32xbf16, #tpu.memory_space<vmem>>, %arg5: memref<1x32xf32, #tpu.memory_space<vmem>>, %arg6: memref<48x32xbf16, #tpu.memory_space<vmem>>, %arg7: memref<48x32xbf16, #tpu.memory_space<vmem>>, %arg8: memref<48x32xf32, #tpu.memory_space<vmem>>) attributes {dimension_semantics = [#tpu.dimension_semantics<parallel>, #tpu.dimension_semantics<parallel>, #tpu.dimension_semantics<arbitrary>], iteration_bounds = array<i64: 1, 1, 1>, scalar_prefetch = 0 : i64, scratch_operands = 1 : i64, tpu.core_type = #tpu.core_type<tc>, window_params = [{transform_indices = @transform_0, window_bounds = array<i64: 48, 64>}, {transform_indices = @transform_1, window_bounds = array<i64: 64, 32>}, {transform_indices = @transform_2, window_bounds = array<i64: 1, 32>}, {transform_indices = @transform_3, window_bounds = array<i64: 48, 32>}, {transform_indices = @transform_4, window_bounds = array<i64: 48, 32>}]} {
    %c0_i32 = arith.constant 0 : i32
    %0 = arith.cmpi eq, %arg2, %c0_i32 : i32
    %1 = arith.extui %0 : i1 to i32
    %c0_i32_0 = arith.constant 0 : i32
    %2 = arith.cmpi ne, %1, %c0_i32_0 : i32
    scf.if %2 {
      %cst_10 = arith.constant 0.000000e+00 : f32
      %12 = vector.broadcast %cst_10 : f32 to vector<48x32xf32>
      %c0_11 = arith.constant 0 : index
      %c0_12 = arith.constant 0 : index
      %13 = vector.load %arg8[%c0_11, %c0_12] : memref<48x32xf32, #tpu.memory_space<vmem>>, vector<48x32xf32>
      tpu.vector_store %arg8[%c0_11, %c0_12], %12 {strides = array<i32>} : memref<48x32xf32, #tpu.memory_space<vmem>>, vector<48x32xf32>,
    } else {
    }
    %c0 = arith.constant 0 : index
    %c0_1 = arith.constant 0 : index
    %3 = vector.load %arg8[%c0, %c0_1] : memref<48x32xf32, #tpu.memory_space<vmem>>, vector<48x32xf32>
    %c0_2 = arith.constant 0 : index
    %c0_3 = arith.constant 0 : index
    %4 = vector.load %arg3[%c0_2, %c0_3] : memref<48x64xbf16, #tpu.memory_space<vmem>>, vector<48x64xbf16>
    %c0_4 = arith.constant 0 : index
    %c0_5 = arith.constant 0 : index
    %5 = vector.load %arg4[%c0_4, %c0_5] : memref<64x32xbf16, #tpu.memory_space<vmem>>, vector<64x32xbf16>
    %cst = arith.constant dense<0.000000e+00> : vector<48x32xf32>
    %6 = tpu.matmul %4, %5, %cst {dimension_numbers = #tpu.dot_dimension_numbers<[1], [0], [0], [1], [0, 0, 1, 1], [], []>} : vector<48x64xbf16>, vector<64x32xbf16>, vector<48x32xf32> -> vector<48x32xf32>
    %7 = arith.addf %3, %6 : vector<48x32xf32>
    %c0_6 = arith.constant 0 : index
    %c0_7 = arith.constant 0 : index
    %8 = vector.load %arg8[%c0_6, %c0_7] : memref<48x32xf32, #tpu.memory_space<vmem>>, vector<48x32xf32>
    tpu.vector_store %arg8[%c0_6, %c0_7], %7 {strides = array<i32>} : memref<48x32xf32, #tpu.memory_space<vmem>>, vector<48x32xf32>,
    %c0_i32_8 = arith.constant 0 : i32
    %9 = arith.cmpi eq, %arg2, %c0_i32_8 : i32
    %10 = arith.extui %9 : i1 to i32
    %c0_i32_9 = arith.constant 0 : i32
    %11 = arith.cmpi ne, %10, %c0_i32_9 : i32
    scf.if %11 {
      %c0_10 = arith.constant 0 : index
      %c0_11 = arith.constant 0 : index
      %12 = vector.load %arg8[%c0_10, %c0_11] : memref<48x32xf32, #tpu.memory_space<vmem>>, vector<48x32xf32>
      %c0_12 = arith.constant 0 : index
      %c0_13 = arith.constant 0 : index
      %13 = vector.load %arg5[%c0_12, %c0_13] : memref<1x32xf32, #tpu.memory_space<vmem>>, vector<1x32xf32>
      %14 = vector.broadcast %13 : vector<1x32xf32> to vector<48x32xf32>
      %15 = arith.addf %12, %14 : vector<48x32xf32>
      %c0_14 = arith.constant 0 : index
      %c0_15 = arith.constant 0 : index
      %16 = vector.load %arg6[%c0_14, %c0_15] : memref<48x32xbf16, #tpu.memory_space<vmem>>, vector<48x32xbf16>
      %17 = arith.extf %16 : vector<48x32xbf16> to vector<48x32xf32>
      %18 = arith.addf %15, %17 : vector<48x32xf32>
      %19 = arith.truncf %18 : vector<48x32xf32> to vector<48x32xbf16>
      %c0_16 = arith.constant 0 : index
      %c0_17 = arith.constant 0 : index
      %20 = vector.load %arg7[%c0_16, %c0_17] : memref<48x32xbf16, #tpu.memory_space<vmem>>, vector<48x32xbf16>
      tpu.vector_store %arg7[%c0_16, %c0_17], %19 {strides = array<i32>} : memref<48x32xbf16, #tpu.memory_space<vmem>>, vector<48x32xbf16>,
    } else {
    }
    return
  }
  func.func @transform_0(%arg0: i32, %arg1: i32, %arg2: i32) -> (i32, i32) {
    %c0_i32 = arith.constant 0 : i32
    return %arg0, %arg2 : i32, i32
  }
  func.func @transform_1(%arg0: i32, %arg1: i32, %arg2: i32) -> (i32, i32) {
    %c0_i32 = arith.constant 0 : i32
    return %arg2, %arg1 : i32, i32
  }
  func.func @transform_2(%arg0: i32, %arg1: i32, %arg2: i32) -> (i32, i32) {
    %c0_i32 = arith.constant 0 : i32
    %c0_i32_0 = arith.constant 0 : i32
    return %c0_i32, %arg1 : i32, i32
  }
  func.func @transform_3(%arg0: i32, %arg1: i32, %arg2: i32) -> (i32, i32) {
    %c0_i32 = arith.constant 0 : i32
    return %arg0, %arg1 : i32, i32
  }
  func.func @transform_4(%arg0: i32, %arg1: i32, %arg2: i32) -> (i32, i32) {
    %c0_i32 = arith.constant 0 : i32
    return %arg0, %arg1 : i32, i32
  }
}

module attributes {stable_mosaic.version = 11 : i64} {
  func.func @_matmul_kernel(%arg0: i32, %arg1: i32, %arg2: i32, %arg3: memref<2x32xbf16, #tpu.memory_space<vmem>>, %arg4: memref<32x10xbf16, #tpu.memory_space<vmem>>, %arg5: memref<1x10xf32, #tpu.memory_space<vmem>>, %arg6: memref<2x10xf32, #tpu.memory_space<vmem>>, %arg7: memref<2x10xf32, #tpu.memory_space<vmem>>) attributes {dimension_semantics = [#tpu.dimension_semantics<parallel>, #tpu.dimension_semantics<parallel>, #tpu.dimension_semantics<arbitrary>], iteration_bounds = array<i64: 1, 1, 1>, scalar_prefetch = 0 : i64, scratch_operands = 1 : i64, tpu.core_type = #tpu.core_type<tc>, window_params = [{transform_indices = @transform_0, window_bounds = array<i64: 2, 32>}, {transform_indices = @transform_1, window_bounds = array<i64: 32, 10>}, {transform_indices = @transform_2, window_bounds = array<i64: 1, 10>}, {transform_indices = @transform_3, window_bounds = array<i64: 2, 10>}]} {
    %c0_i32 = arith.constant 0 : i32
    %0 = arith.cmpi eq, %arg2, %c0_i32 : i32
    %1 = arith.extui %0 : i1 to i32
    %c0_i32_0 = arith.constant 0 : i32
    %2 = arith.cmpi ne, %1, %c0_i32_0 : i32
    scf.if %2 {
      %cst_10 = arith.constant 0.000000e+00 : f32
      %12 = vector.broadcast %cst_10 : f32 to vector<2x10xf32>
      %c0_11 = arith.constant 0 : index
      %c0_12 = arith.constant 0 : index
      %13 = vector.load %arg7[%c0_11, %c0_12] : memref<2x10xf32, #tpu.memory_space<vmem>>, vector<2x10xf32>
      tpu.vector_store %arg7[%c0_11, %c0_12], %12 {strides = array<i32>} : memref<2x10xf32, #tpu.memory_space<vmem>>, vector<2x10xf32>,
    } else {
    }
    %c0 = arith.constant 0 : index
    %c0_1 = arith.constant 0 : index
    %3 = vector.load %arg7[%c0, %c0_1] : memref<2x10xf32, #tpu.memory_space<vmem>>, vector<2x10xf32>
    %c0_2 = arith.constant 0 : index
    %c0_3 = arith.constant 0 : index
    %4 = vector.load %arg3[%c0_2, %c0_3] : memref<2x32xbf16, #tpu.memory_space<vmem>>, vector<2x32xbf16>
    %c0_4 = arith.constant 0 : index
    %c0_5 = arith.constant 0 : index
    %5 = vector.load %arg4[%c0_4, %c0_5] : memref<32x10xbf16, #tpu.memory_space<vmem>>, vector<32x10xbf16>
    %cst = arith.constant dense<0.000000e+00> : vector<2x10xf32>
    %6 = tpu.matmul %4, %5, %cst {dimension_numbers = #tpu.dot_dimension_numbers<[1], [0], [0], [1], [0, 0, 1, 1], [], []>} : vector<2x32xbf16>, vector<32x10xbf16>, vector<2x10xf32> -> vector<2x10xf32>
    %7 = arith.addf %3, %6 : vector<2x10xf32>
    %c0_6 = arith.constant 0 : index
    %c0_7 = arith.constant 0 : index
    %8 = vector.load %arg7[%c0_6, %c0_7] : memref<2x10xf32, #tpu.memory_space<vmem>>, vector<2x10xf32>
    tpu.vector_store %arg7[%c0_6, %c0_7], %7 {strides = array<i32>} : memref<2x10xf32, #tpu.memory_space<vmem>>, vector<2x10xf32>,
    %c0_i32_8 = arith.constant 0 : i32
    %9 = arith.cmpi eq, %arg2, %c0_i32_8 : i32
    %10 = arith.extui %9 : i1 to i32
    %c0_i32_9 = arith.constant 0 : i32
    %11 = arith.cmpi ne, %10, %c0_i32_9 : i32
    scf.if %11 {
      %c0_10 = arith.constant 0 : index
      %c0_11 = arith.constant 0 : index
      %12 = vector.load %arg7[%c0_10, %c0_11] : memref<2x10xf32, #tpu.memory_space<vmem>>, vector<2x10xf32>
      %c0_12 = arith.constant 0 : index
      %c0_13 = arith.constant 0 : index
      %13 = vector.load %arg5[%c0_12, %c0_13] : memref<1x10xf32, #tpu.memory_space<vmem>>, vector<1x10xf32>
      %14 = vector.broadcast %13 : vector<1x10xf32> to vector<2x10xf32>
      %15 = arith.addf %12, %14 : vector<2x10xf32>
      %c0_14 = arith.constant 0 : index
      %c0_15 = arith.constant 0 : index
      %16 = vector.load %arg6[%c0_14, %c0_15] : memref<2x10xf32, #tpu.memory_space<vmem>>, vector<2x10xf32>
      tpu.vector_store %arg6[%c0_14, %c0_15], %15 {strides = array<i32>} : memref<2x10xf32, #tpu.memory_space<vmem>>, vector<2x10xf32>,
    } else {
    }
    return
  }
  func.func @transform_0(%arg0: i32, %arg1: i32, %arg2: i32) -> (i32, i32) {
    %c0_i32 = arith.constant 0 : i32
    return %arg0, %arg2 : i32, i32
  }
  func.func @transform_1(%arg0: i32, %arg1: i32, %arg2: i32) -> (i32, i32) {
    %c0_i32 = arith.constant 0 : i32
    return %arg2, %arg1 : i32, i32
  }
  func.func @transform_2(%arg0: i32, %arg1: i32, %arg2: i32) -> (i32, i32) {
    %c0_i32 = arith.constant 0 : i32
    %c0_i32_0 = arith.constant 0 : i32
    return %c0_i32, %arg1 : i32, i32
  }
  func.func @transform_3(%arg0: i32, %arg1: i32, %arg2: i32) -> (i32, i32) {
    %c0_i32 = arith.constant 0 : i32
    return %arg0, %arg1 : i32, i32
  }
}

</mosaic_0001>

<bundles_post_ra>
// kernel: convvit_forward.17
= control target key start
LH: loop header
LB: loop body
LE: loop exit
PB: predicated region body
PF: predicated region fallthrough
CT: control target
= control target key end

     0   :  { %s509_s15 = smov 0   ;;  %s570_s0 = inlined_call_operand.vmem [shape: bf16[2,5,5,32], index: 0, kind: input, shape index: {}]   ;;  %s571_s1 = inlined_call_operand.vmem [shape: bf16[2,5,5,32], index: 1, kind: input, shape index: {}]   ;;  %s572_s2 = inlined_call_operand.vmem [shape: bf16[2,5,5,32], index: 2, kind: input, shape index: {}]   ;;  %s573_s3 = inlined_call_operand.vmem [shape: bf16[2,5,5,32], index: 3, kind: input, shape index: {}]   ;;  %s574_s4 = inlined_call_operand.vmem [shape: bf16[2,4,4,32], index: 4, kind: output, shape index: {}]  }
   0x1 LB: > { %s453_s16 = sadd.s32 4294967295, %s482_s15   ;;  %p457_p0 = scmp.ge.s32.totalorder %s482_s15, 1  ;;  %s482_s15 = sphi %s509_s15, %s14_s15  }
   0x2   : > { %p192_p1 = scmp.lt.s32.totalorder %s482_s15, 3 }
   0x4   : > { %p193_p2 = pnand %p457_p0, %p192_p1 }
   0x5   : > { %p233_p3 = scmp.lt.s32.totalorder (!%p193_p2), %s453_s16, 1 }
   0x6   : > { %196 = sbr.rel (%p193_p2) target bundleno = 43 (0x2b), region = 36 }
   0xb   : > { %s576_s16 = smov (!%p233_p3, %s453_s16), 1  ;;  %vm357_vm0 = vcmask 254976  }
   0xc   : > { %s467_s17 = smul.u32 20, %s576_s16  ;;  %s466_s30 = sshll.u32 %s576_s16, 3 }
   0xd   : > { %s257_s7 = scalar_lea.vmem %s574_s4, %s466_s30 }
   0xe   : > { %s523_s20 = scalar_lea.vmem %s570_s0, %s467_s17  ;;  %s528_s23 = scalar_lea.vmem %s571_s1, %s467_s17 }
   0xf   : > { %s533_s26 = scalar_lea.vmem %s572_s2, %s467_s17  ;;  %s538_s29 = scalar_lea.vmem %s573_s3, %s467_s17  ;;  %v258_v0 = vld [vmem:[%s523_s20] sm:$0x7]  ;;  %v259_v1 = vld [vmem:[%s523_s20 + $0x4] sm:$0x7]  ;;  %v260_v11 = vld [vmem:[%s523_s20 + $0x8] sm:$0x7] }
  0x10   : > { %v268_v2 = vld [vmem:[%s528_s23] sm:$0x7]  ;;  %v263_v3 = vunpack.c.l.bf16 %v258_v0  ;;  %v543_v4 = vunpack.c.l.bf16 %v259_v1  ;;  %v269_v5 = vld [vmem:[%s528_s23 + $0x4] sm:$0x7]  ;;  %v270_v12 = vld [vmem:[%s528_s23 + $0x8] sm:$0x7]  ;;  %v265_v21 = vunpack.c.l.bf16 %v260_v11 }
  0x11   : > { %v273_v6 = vunpack.c.l.bf16 %v268_v2  ;;  %v278_v7 = vld [vmem:[%s533_s26] sm:$0x7]  ;;  %v279_v8 = vld [vmem:[%s533_s26 + $0x4] sm:$0x7]  ;;  %v274_v9 = vunpack.c.l.bf16 %v269_v5  ;;  %v280_v17 = vld [vmem:[%s533_s26 + $0x8] sm:$0x7]  ;;  %v275_v22 = vunpack.c.l.bf16 %v270_v12 }
  0x12   : > { %v286_v10 = vld [vmem:[%s538_s29] sm:$0x7]  ;;  %v282_v13 = vunpack.c.l.bf16 %v278_v7  ;;  %v302_v15 = vrot.slane %v263_v3, 1  ;;  %v303_v16 = vrot.slane %v543_v4, 1  ;;  %v287_v18 = vld [vmem:[%s538_s29 + $0x4] sm:$0x7]  ;;  %v283_v19 = vunpack.c.l.bf16 %v279_v8 }
  0x13   : > { %v294_v14 = vmax.f32 %v263_v3, %v273_v6  ;;  %v295_v20 = vmax.f32 %v543_v4, %v274_v9  ;;  %v261_v23 = vld [vmem:[%s523_s20 + $0xc] sm:$0x7]  ;;  %v290_v25 = vunpack.c.l.bf16 %v286_v10  ;;  %v284_v27 = vunpack.c.l.bf16 %v280_v17  ;;  %v288_v29 = vld [vmem:[%s538_s29 + $0x8] sm:$0x7]  ;;  %v262_v55 = vld [vmem:[%s523_s20 + $0x10] sm:$0x7] }
  0x14   : > { %v271_v24 = vld [vmem:[%s528_s23 + $0xc] sm:$0x7]  ;;  %v291_v28 = vunpack.c.l.bf16 %v287_v18  ;;  %v296_v31 = vmax.f32 %v265_v21, %v275_v22  ;;  %v304_v32 = vrot.slane %v265_v21, 1  ;;  %v266_v33 = vunpack.c.l.bf16 %v261_v23  ;;  %v272_v61 = vld [vmem:[%s528_s23 + $0x10] sm:$0x7] }
  0x15   : > { %v310_v26 = vmax.f32 %v294_v14, %v302_v15  ;;  %v311_v30 = vmax.f32 %v295_v20, %v303_v16  ;;  %v281_v34 = vld [vmem:[%s533_s26 + $0xc] sm:$0x7]  ;;  %v326_v36 = vrot.slane %v282_v13, 1  ;;  %v327_v37 = vrot.slane %v283_v19, 1 }
  0x16   : > { %v276_v38 = vunpack.c.l.bf16 %v271_v24  ;;  %v312_v40 = vmax.f32 %v296_v31, %v304_v32  ;;  %v292_v41 = vunpack.c.l.bf16 %v288_v29  ;;  %v305_v42 = vrot.slane %v266_v33, 1  ;;  %v289_v43 = vld [vmem:[%s538_s29 + $0xc] sm:$0x7] }
  0x17   : > { %v314_v35 = vmax.f32 %v310_v26, %v282_v13  ;;  %v315_v39 = vmax.f32 %v311_v30, %v283_v19  ;;  %v285_v45 = vunpack.c.l.bf16 %v281_v34  ;;  %v328_v49 = vrot.slane %v284_v27, 1 }
  0x18   : > { %v297_v46 = vmax.f32 %v266_v33, %v276_v38  ;;  %v316_v47 = vmax.f32 %v312_v40, %v284_v27  ;;  %v293_v52 = vunpack.c.l.bf16 %v289_v43  ;;  %v267_v63 = vunpack.c.l.bf16 %v262_v55 }
  0x19   : > { %v318_v44 = vmax.f32 %v314_v35, %v290_v25  ;;  %v319_v48 = vmax.f32 %v315_v39, %v291_v28  ;;  %v329_v58 = vrot.slane %v285_v45, 1  ;;  %v277_v5 = vunpack.c.l.bf16 %v272_v61 }
  0x1a   : > { %v313_v51 = vmax.f32 %v297_v46, %v305_v42  ;;  %v320_v54 = vmax.f32 %v316_v47, %v292_v41  ;;  %v347_v11 = vrot.slane %v267_v63, 1 }
  0x1b   : > { %v334_v50 = vmax.f32 %v318_v44, %v326_v36  ;;  %v335_v53 = vmax.f32 %v319_v48, %v327_v37 }
  0x1c   : > { %v317_v57 = vmax.f32 %v313_v51, %v285_v45  ;;  %v336_v60 = vmax.f32 %v320_v54, %v328_v49 }
  0x1d   : > { %v338_v56 = vmax.f32 %v334_v50, %v543_v4  ;;  %v339_v59 = vmax.f32 %v335_v53, %v265_v21 }
  0x1e   : > { %v321_v0 = vmax.f32 %v317_v57, %v293_v52  ;;  %v340_v2 = vmax.f32 %v336_v60, %v266_v33 }
  0x1f   : > { %v342_v62 = vmax.f32 %v338_v56, %v274_v9  ;;  %v343_v1 = vmax.f32 %v339_v59, %v275_v22 }
  0x20   : > { %v337_v6 = vmax.f32 %v321_v0, %v329_v58  ;;  %v344_v7 = vmax.f32 %v340_v2, %v276_v38 }
  0x21   : > { %v349_v3 = vmax.f32 %v342_v62, %v303_v16  ;;  %v350_v4 = vmax.f32 %v343_v1, %v304_v32 }
  0x22   : > { %v341_v10 = vmax.f32 %v337_v6, %v267_v63  ;;  %v351_v13 = vmax.f32 %v344_v7, %v305_v42 }
  0x23   : > { %v353_v8 = vpack.c.bf16 %v349_v3, %v349_v3  ;;  %v354_v12 = vpack.c.bf16 %v350_v4, %v350_v4 }
  0x24   : > { %v345_v9 = vmax.f32 %v341_v10, %v277_v5  ;;  %v355_v14 = vpack.c.bf16 %v351_v13, %v351_v13 }
  0x25   : > { %358 = vst.msk [vmem:[%s257_s7] sm:$0x3] %vm357_vm0, %v353_v8  ;;  %359 = vst.msk [vmem:[%s257_s7 + $0x2] sm:$0x3] %vm357_vm0, %v354_v12 }
  0x26   : > { %v352_v15 = vmax.f32 %v345_v9, %v347_v11  ;;  %360 = vst.msk [vmem:[%s257_s7 + $0x4] sm:$0x3] %vm357_vm0, %v355_v14 }
  0x28   : > { %v356_v16 = vpack.c.bf16 %v352_v15, %v352_v15 }
  0x2a   : > { %361 = vst.msk [vmem:[%s257_s7 + $0x6] sm:$0x3] %vm357_vm0, %v356_v16 }
  0x2b PF: > { %s14_s15 = sadd.s32 1, %s482_s15  }
  0x2c   : > { %p11_p4 = scmp.ge.s32.totalorder %s14_s15, 4  }
  0x2e   :  { %13 = sbr.rel (!%p11_p4) target bundleno = 1 (0x1), region = 75 }

// kernel: convvit_forward.16
= control target key start
LH: loop header
LB: loop body
LE: loop exit
PB: predicated region body
PF: predicated region fallthrough
CT: control target
= control target key end

     0   :  { %vm19_vm0 = vcmask 261120   ;;  %v735_v32 = vmov 0.0   ;;  %vm528_vm1 = vcmask 257024   ;;  %s969_s1 = inlined_call_operand.vmem [shape: bf16[256,32], index: 1, kind: input, shape index: {}]   ;;  %s970_s0 = inlined_call_operand.vmem [shape: bf16[128,256], index: 0, kind: input, shape index: {}]   ;;  %s971_s2 = inlined_call_operand.vmem [shape: f32[1,32], index: 2, kind: input, shape index: {}]   ;;  %s972_s3 = inlined_call_operand.vmem [shape: bf16[128,32], index: 3, kind: output, shape index: {}]  }
   0x1   :  { %v695_v0 = vld [vmem:[%s969_s1 + $0x78] sm:$0xff]   ;;  %v697_v2 = vld [vmem:[%s969_s1 + $0x70] sm:$0xff]   ;;  %v699_v4 = vld [vmem:[%s969_s1 + $0x68] sm:$0xff]   ;;  %20 = vst.msk [vmem:[#allocation2] sm:$0xff] %vm19_vm0, %v735_v32 }
   0x2   :  { %v696_v1 = vld [vmem:[%s969_s1 + $0x38] sm:$0xff]   ;;  %614 = vmatprep.subr.bf16.mxu0 %v695_v0  ;;  %678 = vmatprep.subr.bf16.mxu1 %v695_v0  ;;  %v698_v3 = vld [vmem:[%s969_s1 + $0x30] sm:$0xff]   ;;  %v700_v5 = vld [vmem:[%s969_s1 + $0x28] sm:$0xff]   ;;  %21 = vst.msk [vmem:[#allocation2 + $0x8] sm:$0xff] %vm19_vm0, %v735_v32 }
   0x3   :  { %615 = vmatpush3.bf16.msra.mxu0 %v696_v1  ;;  %686 = vmatpush3.bf16.msra.mxu1 %v696_v1  ;;  %v701_v6 = vld [vmem:[%s969_s1 + $0x60] sm:$0xff]   ;;  %v703_v8 = vld [vmem:[%s969_s1 + $0x58] sm:$0xff]   ;;  %v705_v10 = vld [vmem:[%s969_s1 + $0x50] sm:$0xff]   ;;  %22 = vst.msk [vmem:[#allocation2 + $0x10] sm:$0xff] %vm19_vm0, %v735_v32 }
   0x4   :  { %616 = vmatprep.subr.bf16.mxu0 %v697_v2  ;;  %679 = vmatprep.subr.bf16.mxu1 %v697_v2  ;;  %v702_v7 = vld [vmem:[%s969_s1 + $0x20] sm:$0xff]   ;;  %v704_v9 = vld [vmem:[%s969_s1 + $0x18] sm:$0xff]   ;;  %v706_v13 = vld [vmem:[%s969_s1 + $0x10] sm:$0xff]   ;;  %23 = vst.msk [vmem:[#allocation2 + $0x18] sm:$0xff] %vm19_vm0, %v735_v32 }
   0x5   :  { %v713_v11 = vld [vmem:[%s970_s0 + $0x4] ss:$8 sps:$4 sm:$0xff]   ;;  %v711_v18 = vld [vmem:[%s970_s0] ss:$8 sps:$4 sm:$0xff]   ;;  %v717_v20 = vld [vmem:[%s970_s0 + $0x14] ss:$8 sps:$4 sm:$0xff]  }
   0x6   :  { %v716_v12 = vld [vmem:[%s970_s0 + $0x44] ss:$8 sps:$4 sm:$0xff]   ;;  %308 = vmatprep.mubr.bf16.mxu0 %v713_v11  ;;  %v714_v19 = vld [vmem:[%s970_s0 + $0x40] ss:$8 sps:$4 sm:$0xff]   ;;  %v719_v21 = vld [vmem:[%s970_s0 + $0x54] ss:$8 sps:$4 sm:$0xff]  }
   0x7   :  { %617 = vmatpush3.bf16.msra.mxu0 %v698_v3  ;;  %687 = vmatpush3.bf16.msra.mxu1 %v698_v3  ;;  %v707_v14 = vld [vmem:[%s969_s1 + $0x48] sm:$0xff]   ;;  %v709_v16 = vld [vmem:[%s969_s1 + $0x40] sm:$0xff]   ;;  %v721_v22 = vld [vmem:[%s970_s0 + $0x10] ss:$8 sps:$4 sm:$0xff]   ;;  %24 = vst.msk [vmem:[#allocation2 + $0x20] sm:$0xff] %vm19_vm0, %v735_v32 }
   0x8   :  { %618 = vmatprep.subr.bf16.mxu0 %v699_v4  ;;  %680 = vmatprep.subr.bf16.mxu1 %v699_v4  ;;  %v708_v15 = vld [vmem:[%s969_s1 + $0x8] sm:$0xff]   ;;  %v710_v17 = vld [vmem:[%s969_s1] sm:$0xff]   ;;  %v722_v23 = vld [vmem:[%s970_s0 + $0x50] ss:$8 sps:$4 sm:$0xff]   ;;  %25 = vst.msk [vmem:[#allocation2 + $0x28] sm:$0xff] %vm19_vm0, %v735_v32 }
   0x9   :  { %340 = vmatprep.mubr.bf16.mxu1 %v716_v12  ;;  %v723_v24 = vld [vmem:[%s970_s0 + $0x24] ss:$8 sps:$4 sm:$0xff]   ;;  %v727_v26 = vld [vmem:[%s970_s0 + $0x20] ss:$8 sps:$4 sm:$0xff]   ;;  %v729_v28 = vld [vmem:[%s970_s0 + $0x34] ss:$8 sps:$4 sm:$0xff]  }
   0xa   :  { %v725_v25 = vld [vmem:[%s970_s0 + $0x64] ss:$8 sps:$4 sm:$0xff]   ;;  %v728_v27 = vld [vmem:[%s970_s0 + $0x60] ss:$8 sps:$4 sm:$0xff]   ;;  %v731_v29 = vld [vmem:[%s970_s0 + $0x74] ss:$8 sps:$4 sm:$0xff]  }
   0xb   :  { %619 = vmatpush3.bf16.msra.mxu0 %v700_v5  ;;  %688 = vmatpush3.bf16.msra.mxu1 %v700_v5  ;;  %v733_v30 = vld [vmem:[%s970_s0 + $0x30] ss:$8 sps:$4 sm:$0xff]   ;;  %26 = vst.msk [vmem:[#allocation2 + $0x30] sm:$0xff] %vm19_vm0, %v735_v32  ;;  %27 = vst.msk [vmem:[#allocation2 + $0x38] sm:$0xff] %vm19_vm0, %v735_v32  ;;  %v36_v35 = vld [vmem:[#allocation2] sm:$0xff] }
   0xc   :  { %620 = vmatprep.subr.bf16.mxu0 %v701_v6  ;;  %681 = vmatprep.subr.bf16.mxu1 %v701_v6  ;;  %v734_v31 = vld [vmem:[%s970_s0 + $0x70] ss:$8 sps:$4 sm:$0xff]   ;;  %28 = vst.msk [vmem:[#allocation2 + $0x40] sm:$0xff] %vm19_vm0, %v735_v32  ;;  %29 = vst.msk [vmem:[#allocation2 + $0x48] sm:$0xff] %vm19_vm0, %v735_v32  ;;  %v37_v45 = vld [vmem:[#allocation2 + $0x8] sm:$0xff] }
   0xd   :  { %30 = vst.msk [vmem:[#allocation2 + $0x50] sm:$0xff] %vm19_vm0, %v735_v32  ;;  %31 = vst.msk [vmem:[#allocation2 + $0x58] sm:$0xff] %vm19_vm0, %v735_v32  ;;  %v38_v55 = vld [vmem:[#allocation2 + $0x10] sm:$0xff]  ;;  %v875_v61 = vld [vmem:[%s971_s2] ss:$0 sm:$0xff] }
   0xe   :  { %32 = vst.msk [vmem:[#allocation2 + $0x60] sm:$0xff] %vm19_vm0, %v735_v32  ;;  %33 = vst.msk [vmem:[#allocation2 + $0x68] sm:$0xff] %vm19_vm0, %v735_v32  ;;  %v39_v2 = vld [vmem:[#allocation2 + $0x18] sm:$0xff] }
   0xf   :  { %621 = vmatpush3.bf16.msra.mxu0 %v702_v7  ;;  %689 = vmatpush3.bf16.msra.mxu1 %v702_v7  ;;  %34 = vst.msk [vmem:[#allocation2 + $0x70] sm:$0xff] %vm19_vm0, %v735_v32  ;;  %35 = vst.msk [vmem:[#allocation2 + $0x78] sm:$0xff] %vm19_vm0, %v735_v32 }
  0x10   :  { %622 = vmatprep.subr.bf16.mxu0 %v703_v8  ;;  %682 = vmatprep.subr.bf16.mxu1 %v703_v8 }
  0x13   :  { %623 = vmatpush3.bf16.msra.mxu0 %v704_v9  ;;  %690 = vmatpush3.bf16.msra.mxu1 %v704_v9  ;;  %v44_v37 = vld [vmem:[#allocation2 + $0x40] sm:$0xff]  ;;  %v45_v47 = vld [vmem:[#allocation2 + $0x48] sm:$0xff] }
  0x14   :  { %624 = vmatprep.subr.bf16.mxu0 %v705_v10  ;;  %683 = vmatprep.subr.bf16.mxu1 %v705_v10  ;;  %v46_v57 = vld [vmem:[#allocation2 + $0x50] sm:$0xff]  ;;  %v47_v6 = vld [vmem:[#allocation2 + $0x58] sm:$0xff] }
  0x17   :  { %625 = vmatpush3.bf16.msra.mxu0 %v706_v13  ;;  %691 = vmatpush3.bf16.msra.mxu1 %v706_v13 }
  0x18   :  { %626 = vmatprep.subr.bf16.mxu0 %v707_v14  ;;  %684 = vmatprep.subr.bf16.mxu1 %v707_v14 }
  0x1b   :  { %627 = vmatpush3.bf16.msra.mxu0 %v708_v15  ;;  %692 = vmatpush3.bf16.msra.mxu1 %v708_v15 }
  0x1c   :  { %628 = vmatprep.subr.bf16.mxu0 %v709_v16  ;;  %685 = vmatprep.subr.bf16.mxu1 %v709_v16 }
  0x1f   :  { %629 = vmatpush3.bf16.msra.mxu0 %v710_v17  ;;  %693 = vmatpush3.bf16.msra.mxu1 %v710_v17 }
  0x22   :  { %309 = vmatmul.mubr.bf16.vlgmr.msra.gmra.mxu0 %v711_v18  ;;  %341 = vmatmul.mubr.bf16.vlgmr.msra.gmra.mxu1 %v714_v19 }
  0x23   :  { %316 = vmatprep.mubr.bf16.mxu0 %v717_v20  ;;  %348 = vmatprep.mubr.bf16.mxu1 %v719_v21 }
  0x2a   :  { %317 = vmatmul.mubr.bf16.gmra.mxu0 %v721_v22  ;;  %349 = vmatmul.mubr.bf16.gmra.mxu1 %v722_v23 }
  0x2b   :  { %324 = vmatprep.mubr.bf16.mxu0 %v723_v24  ;;  %356 = vmatprep.mubr.bf16.mxu1 %v725_v25 }
  0x32   :  { %325 = vmatmul.mubr.bf16.gmra.mxu0 %v727_v26  ;;  %357 = vmatmul.mubr.bf16.gmra.mxu1 %v728_v27  ;;  %v40_v26 = vld [vmem:[#allocation2 + $0x20] sm:$0xff] }
  0x33   :  { %332 = vmatprep.mubr.bf16.mxu0 %v729_v28  ;;  %364 = vmatprep.mubr.bf16.mxu1 %v731_v29  ;;  %v48_v27 = vld [vmem:[#allocation2 + $0x60] sm:$0xff] }
  0x3a   :  { %333 = vmatmul.mubr.bf16.gmra.mxu0 %v733_v30  ;;  %365 = vmatmul.mubr.bf16.gmra.mxu1 %v734_v31 }
  0xe2   :  { %v630_v33 = vpop.f32.mrf.mxu0  ;;  %v654_v34 = vpop.f32.mrf.mxu1 }
  0xe4   :  { %v631_v36 = vpop.f32.mrf.mxu0  ;;  %v655_v38 = vpop.f32.mrf.mxu1 }
  0xe5   :  { %v632_v39 = vadd.f32 %v631_v36, %v630_v33  ;;  %v656_v40 = vadd.f32 %v655_v38, %v654_v34 }
  0xe6   :  { %v633_v41 = vpop.f32.mrf.mxu0  ;;  %v657_v42 = vpop.f32.mrf.mxu1 }
  0xe7   :  { %v373_v43 = vadd.f32 %v632_v39, %v36_v35  ;;  %v381_v44 = vadd.f32 %v656_v40, %v44_v37 }
  0xe8   :  { %v634_v46 = vpop.f32.mrf.mxu0  ;;  %v658_v48 = vpop.f32.mrf.mxu1 }
  0xe9   :  { %390 = vst.msk [vmem:[#allocation2] sm:$0xff] %vm19_vm0, %v373_v43  ;;  %398 = vst.msk [vmem:[#allocation2 + $0x40] sm:$0xff] %vm19_vm0, %v381_v44  ;;  %v635_v49 = vadd.f32 %v634_v46, %v633_v41  ;;  %v659_v50 = vadd.f32 %v658_v48, %v657_v42  ;;  %v41_v44 = vld [vmem:[#allocation2 + $0x28] sm:$0xff] }
  0xea   :  { %v636_v51 = vpop.f32.mrf.mxu0  ;;  %v660_v52 = vpop.f32.mrf.mxu1 }
  0xeb   :  { %v374_v53 = vadd.f32 %v635_v49, %v37_v45  ;;  %v382_v54 = vadd.f32 %v659_v50, %v45_v47  ;;  %v49_v45 = vld [vmem:[#allocation2 + $0x68] sm:$0xff] }
  0xec   :  { %v637_v56 = vpop.f32.mrf.mxu0  ;;  %v661_v58 = vpop.f32.mrf.mxu1 }
  0xed   :  { %391 = vst.msk [vmem:[#allocation2 + $0x8] sm:$0xff] %vm19_vm0, %v374_v53  ;;  %399 = vst.msk [vmem:[#allocation2 + $0x48] sm:$0xff] %vm19_vm0, %v382_v54  ;;  %v638_v59 = vadd.f32 %v637_v56, %v636_v51  ;;  %v662_v60 = vadd.f32 %v661_v58, %v660_v52 }
  0xee   :  { %v639_v62 = vpop.f32.mrf.mxu0  ;;  %v663_v63 = vpop.f32.mrf.mxu1 }
  0xef   :  { %v375_v0 = vadd.f32 %v638_v59, %v38_v55  ;;  %v383_v1 = vadd.f32 %v662_v60, %v46_v57 }
  0xf0   :  { %v409_v3 = vld [vmem:[#allocation2] sm:$0xff]  ;;  %v640_v5 = vpop.f32.mrf.mxu0  ;;  %v664_v7 = vpop.f32.mrf.mxu1 }
  0xf1   :  { %v417_v4 = vld [vmem:[#allocation2 + $0x40] sm:$0xff]  ;;  %v432_v8 = vadd.f32 %v875_v61, %v409_v3  ;;  %392 = vst.msk [vmem:[#allocation2 + $0x10] sm:$0xff] %vm19_vm0, %v375_v0  ;;  %400 = vst.msk [vmem:[#allocation2 + $0x50] sm:$0xff] %vm19_vm0, %v383_v1  ;;  %v641_v10 = vadd.f32 %v640_v5, %v639_v62  ;;  %v665_v11 = vadd.f32 %v664_v7, %v663_v63  ;;  %v42_v63 = vld [vmem:[#allocation2 + $0x30] sm:$0xff] }
  0xf2   :  { %v440_v9 = vadd.f32 %v875_v61, %v417_v4  ;;  %v642_v12 = vpop.f32.mrf.mxu0  ;;  %v666_v13 = vpop.f32.mrf.mxu1  ;;  %v50_v0 = vld [vmem:[#allocation2 + $0x70] sm:$0xff] }
  0xf3   :  { %v448_v14 = vmax.f32 %v432_v8, 0.0  ;;  %v376_v16 = vadd.f32 %v641_v10, %v39_v2  ;;  %v384_v17 = vadd.f32 %v665_v11, %v47_v6  ;;  %v51_v11 = vld [vmem:[#allocation2 + $0x78] sm:$0xff] }
  0xf4   :  { %v456_v15 = vmax.f32 %v440_v9, 0.0  ;;  %v410_v18 = vld [vmem:[#allocation2 + $0x8] sm:$0xff]  ;;  %v643_v20 = vpop.f32.mrf.mxu0  ;;  %v667_v21 = vpop.f32.mrf.mxu1  ;;  %v43_v9 = vld [vmem:[#allocation2 + $0x38] sm:$0xff] }
  0xf5   :  { %v418_v19 = vld [vmem:[#allocation2 + $0x48] sm:$0xff]  ;;  %v598_v22 = vpack.c.bf16 %v448_v14, %v448_v14  ;;  %v433_v24 = vadd.f32 %v875_v61, %v410_v18  ;;  %393 = vst.msk [vmem:[#allocation2 + $0x18] sm:$0xff] %vm19_vm0, %v376_v16  ;;  %401 = vst.msk [vmem:[#allocation2 + $0x58] sm:$0xff] %vm19_vm0, %v384_v17  ;;  %v644_v28 = vadd.f32 %v643_v20, %v642_v12 }
  0xf6   :  { %v606_v23 = vpack.c.bf16 %v456_v15, %v456_v15  ;;  %v441_v25 = vadd.f32 %v875_v61, %v418_v19  ;;  %v668_v29 = vadd.f32 %v667_v21, %v666_v13  ;;  %v645_v30 = vpop.f32.mrf.mxu0  ;;  %v669_v31 = vpop.f32.mrf.mxu1 }
  0xf7   :  { %529 = vst.msk [vmem:[%s972_s3] sm:$0xf] %vm528_vm1, %v598_v22  ;;  %v449_v32 = vmax.f32 %v433_v24, 0.0  ;;  %v377_v36 = vadd.f32 %v644_v28, %v40_v26 }
  0xf8   :  { %537 = vst.msk [vmem:[%s972_s3 + $0x20] sm:$0xf] %vm528_vm1, %v606_v23  ;;  %v457_v33 = vmax.f32 %v441_v25, 0.0  ;;  %v411_v34 = vld [vmem:[#allocation2 + $0x10] sm:$0xff]  ;;  %v385_v37 = vadd.f32 %v668_v29, %v48_v27  ;;  %v646_v38 = vpop.f32.mrf.mxu0  ;;  %v670_v39 = vpop.f32.mrf.mxu1 }
  0xf9   :  { %v419_v35 = vld [vmem:[#allocation2 + $0x50] sm:$0xff]  ;;  %v599_v40 = vpack.c.bf16 %v449_v32, %v449_v32  ;;  %v434_v42 = vadd.f32 %v875_v61, %v411_v34  ;;  %394 = vst.msk [vmem:[#allocation2 + $0x20] sm:$0xff] %vm19_vm0, %v377_v36  ;;  %v647_v46 = vadd.f32 %v646_v38, %v645_v30  ;;  %v671_v47 = vadd.f32 %v670_v39, %v669_v31 }
  0xfa   :  { %v607_v41 = vpack.c.bf16 %v457_v33, %v457_v33  ;;  %v442_v43 = vadd.f32 %v875_v61, %v419_v35  ;;  %402 = vst.msk [vmem:[#allocation2 + $0x60] sm:$0xff] %vm19_vm0, %v385_v37  ;;  %v648_v48 = vpop.f32.mrf.mxu0  ;;  %v672_v49 = vpop.f32.mrf.mxu1 }
  0xfb   :  { %530 = vst.msk [vmem:[%s972_s3 + $0x4] sm:$0xf] %vm528_vm1, %v599_v40  ;;  %v450_v50 = vmax.f32 %v434_v42, 0.0  ;;  %v378_v54 = vadd.f32 %v647_v46, %v41_v44  ;;  %v386_v55 = vadd.f32 %v671_v47, %v49_v45 }
  0xfc   :  { %538 = vst.msk [vmem:[%s972_s3 + $0x24] sm:$0xf] %vm528_vm1, %v607_v41  ;;  %v458_v51 = vmax.f32 %v442_v43, 0.0  ;;  %v412_v52 = vld [vmem:[#allocation2 + $0x18] sm:$0xff]  ;;  %v649_v56 = vpop.f32.mrf.mxu0  ;;  %v673_v57 = vpop.f32.mrf.mxu1 }
  0xfd   :  { %v420_v53 = vld [vmem:[#allocation2 + $0x58] sm:$0xff]  ;;  %v600_v58 = vpack.c.bf16 %v450_v50, %v450_v50  ;;  %v435_v60 = vadd.f32 %v875_v61, %v412_v52  ;;  %395 = vst.msk [vmem:[#allocation2 + $0x28] sm:$0xff] %vm19_vm0, %v378_v54  ;;  %403 = vst.msk [vmem:[#allocation2 + $0x68] sm:$0xff] %vm19_vm0, %v386_v55  ;;  %v650_v1 = vadd.f32 %v649_v56, %v648_v48 }
  0xfe   :  { %v608_v59 = vpack.c.bf16 %v458_v51, %v458_v51  ;;  %v443_v62 = vadd.f32 %v875_v61, %v420_v53  ;;  %v674_v2 = vadd.f32 %v673_v57, %v672_v49  ;;  %v651_v3 = vpop.f32.mrf.mxu0  ;;  %v675_v4 = vpop.f32.mrf.mxu1 }
  0xff   :  { %531 = vst.msk [vmem:[%s972_s3 + $0x8] sm:$0xf] %vm528_vm1, %v600_v58  ;;  %v451_v5 = vmax.f32 %v435_v60, 0.0  ;;  %v379_v7 = vadd.f32 %v650_v1, %v42_v63 }
 0x100   :  { %539 = vst.msk [vmem:[%s972_s3 + $0x28] sm:$0xf] %vm528_vm1, %v608_v59  ;;  %v459_v6 = vmax.f32 %v443_v62, 0.0  ;;  %v387_v8 = vadd.f32 %v674_v2, %v50_v0  ;;  %v652_v10 = vpop.f32.mrf.mxu0  ;;  %v676_v12 = vpop.f32.mrf.mxu1  ;;  %v413_v15 = vld [vmem:[#allocation2 + $0x20] sm:$0xff] }
 0x101   :  { %v601_v13 = vpack.c.bf16 %v451_v5, %v451_v5  ;;  %v421_v16 = vld [vmem:[#allocation2 + $0x60] sm:$0xff]  ;;  %v653_v17 = vadd.f32 %v652_v10, %v651_v3  ;;  %v677_v18 = vadd.f32 %v676_v12, %v675_v4  ;;  %v436_v19 = vadd.f32 %v875_v61, %v413_v15  ;;  %396 = vst.msk [vmem:[#allocation2 + $0x30] sm:$0xff] %vm19_vm0, %v379_v7 }
 0x102   :  { %v609_v14 = vpack.c.bf16 %v459_v6, %v459_v6  ;;  %v444_v20 = vadd.f32 %v875_v61, %v421_v16  ;;  %404 = vst.msk [vmem:[#allocation2 + $0x70] sm:$0xff] %vm19_vm0, %v387_v8 }
 0x103   :  { %532 = vst.msk [vmem:[%s972_s3 + $0xc] sm:$0xf] %vm528_vm1, %v601_v13  ;;  %v380_v21 = vadd.f32 %v653_v17, %v43_v9  ;;  %v388_v22 = vadd.f32 %v677_v18, %v51_v11  ;;  %v452_v23 = vmax.f32 %v436_v19, 0.0 }
 0x104   :  { %540 = vst.msk [vmem:[%s972_s3 + $0x2c] sm:$0xf] %vm528_vm1, %v609_v14  ;;  %v460_v24 = vmax.f32 %v444_v20, 0.0  ;;  %v414_v25 = vld [vmem:[#allocation2 + $0x28] sm:$0xff] }
 0x105   :  { %v422_v26 = vld [vmem:[#allocation2 + $0x68] sm:$0xff]  ;;  %397 = vst.msk [vmem:[#allocation2 + $0x38] sm:$0xff] %vm19_vm0, %v380_v21  ;;  %405 = vst.msk [vmem:[#allocation2 + $0x78] sm:$0xff] %vm19_vm0, %v388_v22  ;;  %v602_v27 = vpack.c.bf16 %v452_v23, %v452_v23  ;;  %v437_v29 = vadd.f32 %v875_v61, %v414_v25 }
 0x106   :  { %v610_v28 = vpack.c.bf16 %v460_v24, %v460_v24  ;;  %v445_v30 = vadd.f32 %v875_v61, %v422_v26 }
 0x107   :  { %533 = vst.msk [vmem:[%s972_s3 + $0x10] sm:$0xf] %vm528_vm1, %v602_v27  ;;  %v453_v31 = vmax.f32 %v437_v29, 0.0 }
 0x108   :  { %541 = vst.msk [vmem:[%s972_s3 + $0x30] sm:$0xf] %vm528_vm1, %v610_v28  ;;  %v461_v32 = vmax.f32 %v445_v30, 0.0  ;;  %v415_v33 = vld [vmem:[#allocation2 + $0x30] sm:$0xff] }
 0x109   :  { %v423_v34 = vld [vmem:[#allocation2 + $0x70] sm:$0xff]  ;;  %v603_v35 = vpack.c.bf16 %v453_v31, %v453_v31  ;;  %v438_v37 = vadd.f32 %v875_v61, %v415_v33 }
 0x10a   :  { %v611_v36 = vpack.c.bf16 %v461_v32, %v461_v32  ;;  %v446_v38 = vadd.f32 %v875_v61, %v423_v34 }
 0x10b   :  { %534 = vst.msk [vmem:[%s972_s3 + $0x14] sm:$0xf] %vm528_vm1, %v603_v35  ;;  %v454_v39 = vmax.f32 %v438_v37, 0.0 }
 0x10c   :  { %542 = vst.msk [vmem:[%s972_s3 + $0x34] sm:$0xf] %vm528_vm1, %v611_v36  ;;  %v462_v40 = vmax.f32 %v446_v38, 0.0  ;;  %v416_v41 = vld [vmem:[#allocation2 + $0x38] sm:$0xff] }
 0x10d   :  { %v424_v42 = vld [vmem:[#allocation2 + $0x78] sm:$0xff]  ;;  %v439_v43 = vadd.f32 %v875_v61, %v416_v41  ;;  %v604_v45 = vpack.c.bf16 %v454_v39, %v454_v39 }
 0x10e   :  { %v447_v44 = vadd.f32 %v875_v61, %v424_v42  ;;  %v612_v46 = vpack.c.bf16 %v462_v40, %v462_v40 }
 0x10f   :  { %v455_v47 = vmax.f32 %v439_v43, 0.0  ;;  %535 = vst.msk [vmem:[%s972_s3 + $0x18] sm:$0xf] %vm528_vm1, %v604_v45 }
 0x110   :  { %v463_v48 = vmax.f32 %v447_v44, 0.0  ;;  %543 = vst.msk [vmem:[%s972_s3 + $0x38] sm:$0xf] %vm528_vm1, %v612_v46 }
 0x111   :  { %v605_v49 = vpack.c.bf16 %v455_v47, %v455_v47 }
 0x112   :  { %v613_v50 = vpack.c.bf16 %v463_v48, %v463_v48 }
 0x113   :  { %536 = vst.msk [vmem:[%s972_s3 + $0x1c] sm:$0xf] %vm528_vm1, %v605_v49 }
 0x114   :  { %544 = vst.msk [vmem:[%s972_s3 + $0x3c] sm:$0xf] %vm528_vm1, %v613_v50 }

// kernel: convvit_forward.18
= control target key start
LH: loop header
LB: loop body
LE: loop exit
PB: predicated region body
PF: predicated region fallthrough
CT: control target
= control target key end

     0   :  { %vm30_vm0 = vcmask 261120   ;;  %v330_v45 = vmov 0.0   ;;  %vm331_vm1 = vmmov 0   ;;  %vm245_vm2 = vcmask 781312   ;;  %s457_s0 = inlined_call_operand.vmem [shape: bf16[48,32], index: 0, kind: input, shape index: {}]   ;;  %s458_s3 = inlined_call_operand.vmem [shape: bf16[32,96], index: 3, kind: input, shape index: {}]   ;;  %s459_s1 = inlined_call_operand.vmem [shape: f32[1,32], index: 1, kind: input, shape index: {}]   ;;  %s460_s2 = inlined_call_operand.vmem [shape: f32[1,32], index: 2, kind: input, shape index: {}]   ;;  %s461_s4 = inlined_call_operand.vmem [shape: bf16[48,96], index: 4, kind: output, shape index: {}]  }
   0x1   :  { %v287_v0 = vld [vmem:[%s457_s0 + $0x8] sm:$0xff]   ;;  %v276_v1 = vld [vmem:[%s457_s0] sm:$0xff]   ;;  %v288_v5 = vld [vmem:[%s457_s0 + $0x10] sm:$0xff]   ;;  %310 = vmatprep.subr.bf16.mxu1 %v330_v45  ;;  %294 = vmatprep.subr.bf16.mxu0 %v330_v45 }
   0x2   :  { %v281_v2 = vunpack.c.l.bf16 %v287_v0  ;;  %v282_v3 = vunpack.c.h.bf16 %v287_v0  ;;  %v277_v4 = vunpack.c.l.bf16 %v276_v1  ;;  %v278_v6 = vunpack.c.h.bf16 %v276_v1  ;;  %v316_v46 = vld [vmem:[%s458_s3 + $0x8] sm:$0xff]   ;;  %302 = vmatprep.mubr.msk.bf16.mxu1 %vm331_vm1, %v330_v45  ;;  %298 = vmatprep.mubr.msk.bf16.mxu0 %vm331_vm1, %v330_v45  ;;  %v317_v47 = vld [vmem:[%s458_s3] sm:$0xff]  }
   0x3   :  { %v285_v10 = vunpack.c.l.bf16 %v288_v5  ;;  %v286_v12 = vunpack.c.h.bf16 %v288_v5  ;;  %312 = vmatpush3.bf16.msra.mxu1 %v316_v46  ;;  %295 = vmatpush3.bf16.msra.mxu0 %v316_v46 }
   0x4   :  { %v37_v7 = vsel %vm30_vm0, %v281_v2, 0.0  ;;  %v31_v8 = vsel %vm30_vm0, %v277_v4, 0.0  ;;  %v40_v9 = vsel %vm30_vm0, %v282_v3, 0.0  ;;  %v34_v11 = vsel %vm30_vm0, %v278_v6, 0.0  ;;  %311 = vmatprep.subr.bf16.mxu1 %v330_v45  ;;  %296 = vmatprep.subr.bf16.mxu0 %v330_v45 }
   0x5   :  { %38 = vadd.xlane.f32.xlu0 %v37_v7  ;;  %32 = vadd.xlane.f32.xlu1 %v31_v8  ;;  %v43_v13 = vsel %vm30_vm0, %v285_v10, 0.0  ;;  %v46_v14 = vsel %vm30_vm0, %v286_v12, 0.0 }
   0x7   :  { %313 = vmatpush3.bf16.msra.mxu1 %v317_v47  ;;  %297 = vmatpush3.bf16.msra.mxu0 %v317_v47 }
   0x9   :  { %41 = vadd.xlane.f32.xlu0 %v40_v9  ;;  %35 = vadd.xlane.f32.xlu1 %v34_v11 }
   0xd   :  { %44 = vadd.xlane.f32.xlu0 %v43_v13  ;;  %47 = vadd.xlane.f32.xlu1 %v46_v14 }
  0x8e   :  { %v39_v15 = vpop.xlane.xlu0 %38  ;;  %v33_v16 = vpop.xlane.xlu1 %32 }
  0x8f   :  { %v52_v17 = vmul.f32 0.03125, %v39_v15  ;;  %v50_v18 = vmul.f32 0.03125, %v33_v16 }
  0x91   :  { %v372_v19 = vsub.f32 %v281_v2, %v52_v17  ;;  %v374_v20 = vsub.f32 %v277_v4, %v50_v18  ;;  %v256_v4 = vld [vmem:[%s459_s1] ss:$0 sm:$0xff] }
  0x92   :  { %v42_v21 = vpop.xlane.xlu0 %41  ;;  %v36_v22 = vpop.xlane.xlu1 %35 }
  0x93   :  { %v53_v23 = vmul.f32 0.03125, %v42_v21  ;;  %v64_v24 = vmul.f32 %v372_v19, %v372_v19  ;;  %v51_v25 = vmul.f32 0.03125, %v36_v22  ;;  %v62_v26 = vmul.f32 %v374_v20, %v374_v20 }
  0x95   :  { %v380_v27 = vsub.f32 %v282_v3, %v53_v23  ;;  %v74_v28 = vsel %vm30_vm0, %v64_v24, 0.0  ;;  %v383_v29 = vsub.f32 %v278_v6, %v51_v25  ;;  %v68_v31 = vsel %vm30_vm0, %v62_v26, 0.0 }
  0x96   :  { %75 = vadd.xlane.f32.xlu0 %v74_v28  ;;  %v45_v30 = vpop.xlane.xlu0 %44  ;;  %v48_v32 = vpop.xlane.xlu1 %47 }
  0x97   :  { %v54_v33 = vmul.f32 0.03125, %v45_v30  ;;  %v65_v34 = vmul.f32 %v380_v27, %v380_v27  ;;  %v55_v35 = vmul.f32 0.03125, %v48_v32  ;;  %v63_v36 = vmul.f32 %v383_v29, %v383_v29 }
  0x99   :  { %v390_v37 = vsub.f32 %v285_v10, %v54_v33  ;;  %v77_v38 = vsel %vm30_vm0, %v65_v34, 0.0  ;;  %v393_v39 = vsub.f32 %v286_v12, %v55_v35  ;;  %v71_v41 = vsel %vm30_vm0, %v63_v36, 0.0  ;;  %v257_v10 = vld [vmem:[%s460_s2] ss:$0 sm:$0xff] }
  0x9a   :  { %78 = vadd.xlane.f32.xlu1 %v77_v38  ;;  %69 = vadd.xlane.f32.xlu0 %v68_v31 }
  0x9b   :  { %v66_v40 = vmul.f32 %v390_v37, %v390_v37  ;;  %v67_v42 = vmul.f32 %v393_v39, %v393_v39 }
  0x9d   :  { %v80_v43 = vsel %vm30_vm0, %v66_v40, 0.0  ;;  %v83_v44 = vsel %vm30_vm0, %v67_v42, 0.0 }
  0x9e   :  { %81 = vadd.xlane.f32.xlu0 %v80_v43  ;;  %72 = vadd.xlane.f32.xlu1 %v71_v41 }
  0xa2   :  { %84 = vadd.xlane.f32.xlu1 %v83_v44 }
 0x11f   :  { %v76_v48 = vpop.xlane.xlu0 %75 }
 0x120   :  { %v88_v49 = vmul.f32 0.03125, %v76_v48 }
 0x122   :  { %v94_v50 = vadd.f32 1e-05, %v88_v49 }
 0x123   :  { %v70_v51 = vpop.xlane.xlu0 %69  ;;  %v79_v52 = vpop.xlane.xlu1 %78 }
 0x124   :  { %318 = vrsqrt.f32 %v94_v50  ;;  %v86_v53 = vmul.f32 0.03125, %v70_v51  ;;  %v89_v54 = vmul.f32 0.03125, %v79_v52 }
 0x126   :  { %v92_v55 = vadd.f32 1e-05, %v86_v53  ;;  %v95_v56 = vadd.f32 1e-05, %v89_v54 }
 0x127   :  { %v82_v57 = vpop.xlane.xlu0 %81  ;;  %v73_v58 = vpop.xlane.xlu1 %72 }
 0x128   :  { %320 = vrsqrt.f32 %v92_v55  ;;  %v90_v59 = vmul.f32 0.03125, %v82_v57  ;;  %v87_v60 = vmul.f32 0.03125, %v73_v58 }
 0x129   :  { %322 = vrsqrt.f32 %v95_v56 }
 0x12a   :  { %v96_v61 = vadd.f32 1e-05, %v90_v59  ;;  %v93_v62 = vadd.f32 1e-05, %v87_v60 }
 0x12b   :  { %v85_v63 = vpop.xlane.xlu1 %84 }
 0x12c   :  { %324 = vrsqrt.f32 %v96_v61  ;;  %v91_v0 = vmul.f32 0.03125, %v85_v63 }
 0x12d   :  { %326 = vrsqrt.f32 %v93_v62 }
 0x12e   :  { %v97_v1 = vadd.f32 1e-05, %v91_v0 }
 0x130   :  { %328 = vrsqrt.f32 %v97_v1 }
 0x131   :  { %v319_v2 = vpop.eup %318 }
 0x132   :  { %v106_v3 = vmul.f32 %v319_v2, %v372_v19 }
 0x134   :  { %v119_v8 = vmul.f32 %v256_v4, %v106_v3 }
 0x135   :  { %v321_v5 = vpop.eup %320 }
 0x136   :  { %v323_v6 = vpop.eup %322  ;;  %v104_v9 = vmul.f32 %v321_v5, %v374_v20  ;;  %v132_v15 = vadd.f32 %v257_v10, %v119_v8 }
 0x137   :  { %v107_v7 = vmul.f32 %v323_v6, %v380_v27 }
 0x138   :  { %v117_v18 = vmul.f32 %v256_v4, %v104_v9 }
 0x139   :  { %v325_v11 = vpop.eup %324  ;;  %v120_v12 = vmul.f32 %v256_v4, %v107_v7 }
 0x13a   :  { %v327_v13 = vpop.eup %326  ;;  %v108_v14 = vmul.f32 %v325_v11, %v390_v37  ;;  %v130_v24 = vadd.f32 %v257_v10, %v117_v18 }
 0x13b   :  { %v133_v16 = vadd.f32 %v257_v10, %v120_v12  ;;  %v105_v17 = vmul.f32 %v327_v13, %v383_v29 }
 0x13c   :  { %v121_v20 = vmul.f32 %v256_v4, %v108_v14 }
 0x13d   :  { %v329_v19 = vpop.eup %328  ;;  %v137_v21 = vpack.c.bf16 %v133_v16, %v132_v15  ;;  %v118_v22 = vmul.f32 %v256_v4, %v105_v17 }
 0x13e   :  { %v109_v23 = vmul.f32 %v329_v19, %v393_v39  ;;  %v134_v28 = vadd.f32 %v257_v10, %v121_v20 }
 0x13f   :  { %303 = vmatmul.mubr.msk.bf16.vlgmr.msra.gmra.mxu1 %vm30_vm0, %v137_v21  ;;  %v131_v25 = vadd.f32 %v257_v10, %v118_v22 }
 0x140   :  { %306 = vmatprep.mubr.msk.bf16.mxu1 %vm331_vm1, %v330_v45  ;;  %v122_v26 = vmul.f32 %v256_v4, %v109_v23 }
 0x141   :  { %v136_v27 = vpack.c.bf16 %v131_v25, %v130_v24 }
 0x142   :  { %v135_v30 = vadd.f32 %v257_v10, %v122_v26 }
 0x143   :  { %299 = vmatmul.mubr.msk.bf16.vlgmr.msra.gmra.mxu0 %vm30_vm0, %v136_v27 }
 0x144   :  { %v138_v29 = vpack.c.bf16 %v135_v30, %v134_v28 }
 0x147   :  { %307 = vmatmul.mubr.msk.bf16.gmra.mxu1 %vm30_vm0, %v138_v29 }
 0x1ff   :  { %v206_v31 = vpop.f32.mrf.mxu1 }
 0x200   :  { %v271_v32 = vpack.c.bf16 %v206_v31, %v206_v31 }
 0x201   :  { %v304_v33 = vpop.f32.mrf.mxu1 }
 0x202   :  { %248 = vst.msk [vmem:[%s461_s4 + $0x8] sm:$0xf] %vm245_vm2, %v271_v32 }
 0x203   :  { %v198_v34 = vpop.f32.mrf.mxu0  ;;  %v209_v35 = vpop.f32.mrf.mxu1 }
 0x204   :  { %v269_v36 = vpack.c.bf16 %v198_v34, %v198_v34  ;;  %v272_v37 = vpack.c.bf16 %v209_v35, %v209_v35 }
 0x205   :  { %v300_v38 = vpop.f32.mrf.mxu0  ;;  %v305_v39 = vpop.f32.mrf.mxu1 }
 0x206   :  { %246 = vst.msk [vmem:[%s461_s4] sm:$0xf] %vm245_vm2, %v269_v36  ;;  %249 = vst.msk [vmem:[%s461_s4 + $0xc] sm:$0xf] %vm245_vm2, %v272_v37 }
 0x207   :  { %v201_v40 = vpop.f32.mrf.mxu0  ;;  %v214_v41 = vpop.f32.mrf.mxu1 }
 0x208   :  { %v270_v42 = vpack.c.bf16 %v201_v40, %v201_v40  ;;  %v273_v43 = vpack.c.bf16 %v214_v41, %v214_v41 }
 0x209   :  { %v301_v44 = vpop.f32.mrf.mxu0  ;;  %v308_v45 = vpop.f32.mrf.mxu1 }
 0x20a   :  { %247 = vst.msk [vmem:[%s461_s4 + $0x4] sm:$0xf] %vm245_vm2, %v270_v42  ;;  %250 = vst.msk [vmem:[%s461_s4 + $0x10] sm:$0xf] %vm245_vm2, %v273_v43 }
 0x20b   :  { %v217_v46 = vpop.f32.mrf.mxu1 }
 0x20c   :  { %v274_v47 = vpack.c.bf16 %v217_v46, %v217_v46 }
 0x20d   :  { %v309_v48 = vpop.f32.mrf.mxu1 }
 0x20e   :  { %251 = vst.msk [vmem:[%s461_s4 + $0x14] sm:$0xf] %vm245_vm2, %v274_v47 }

// kernel: convvit_forward.19
= control target key start
LH: loop header
LB: loop body
LE: loop exit
PB: predicated region body
PF: predicated region fallthrough
CT: control target
= control target key end

     0   :  { %s709_s6 = smov 0   ;;  %s824_s0 = inlined_call_operand.vmem [shape: bf16[2,24,96], index: 0, kind: input, shape index: {}]   ;;  %s825_s1 = inlined_call_operand.vmem [shape: bf16[2,24,32], index: 1, kind: output, shape index: {}]  }
   0x1 LB: > { %s560_s7 = sadd.s32 4294967295, %s691_s6   ;;  %p564_p0 = scmp.ge.s32.totalorder %s691_s6, 1  ;;  %s691_s6 = sphi %s709_s6, %s11_s6  }
   0x2   : > { %p87_p1 = scmp.lt.s32.totalorder %s691_s6, 3 }
   0x4   : > { %p88_p2 = pnand %p564_p0, %p87_p1 }
   0x5   : > { %p107_p3 = scmp.lt.s32.totalorder (!%p88_p2), %s560_s7, 1  ;;  %s693_s12 = smov (!%p88_p2), 96  }
   0x6   : > { %91 = sbr.rel (%p88_p2) target bundleno = 1211 (0x4bb), region = 24  ;;  %s694_s13 = smov (!%p88_p2), 64  }
   0x7   : > { %s695_s14 = smov (!%p88_p2), 112   ;;  %s696_s15 = smov (!%p88_p2), 80  }
   0x8   : > { %s697_s16 = smov (!%p88_p2), 48   ;;  %s698_s17 = smov (!%p88_p2), 16  }
   0xb   : > { %s827_s7 = smov (!%p107_p3, %s560_s7), 1  ;;  %vm136_vm0 = vcmask 130048   ;;  %vm244_vm1 = vcmask 1043456   ;;  %v121_v9 = vlaneseq  ;;  %vm203_vm3 = vcmask 195584  }
   0xc   : > { %s639_s8 = smul.u32 12, %s827_s7  ;;  %vm501_vm4 = vcmask 257024  }
   0xd   : > { %v743_v10 = vand.u32 127, %v121_v9 }
   0xe   : > { %s111_s11 = scalar_lea.vmem %s824_s0, %s639_s8  ;;  %s116_s20 = scalar_lea.vmem %s825_s1, %s639_s8 }
   0xf   : > { %v725_v0 = vld [vmem:[%s111_s11 + $0x8] ss:$0 sps:$4 sm:$0xff]   ;;  %v727_v1 = vld [vmem:[%s111_s11] sm:$0xff]   ;;  %vm123_vm2 = vcmp.lt.s32.totalorder %v743_v10, 17 }
  0x10   : > { %134 = vrot.lane.b32.xlu0 %v725_v0, %s693_s12  ;;  %605 = vmatprep.mubr.msk.bf16.mxu0 %vm136_vm0, %v727_v1 }
  0x11   : > { %235 = vrot.lane.b32.xlu1 %v725_v0, %s694_s13 }
  0x14   : > { %132 = vrot.lane.b32.xlu0 %v727_v1, %s693_s12 }
  0x15   : > { %233 = vrot.lane.b32.xlu1 %v727_v1, %s694_s13 }
  0x82   : > { %v135_v2 = vpop.permute.xlu0 %134 }
  0x83   : > { %633 = vmatprep.subr.msk.bf16.mxu0 %vm136_vm0, %v135_v2  ;;  %v147_v3 = vsel %vm136_vm0, %v135_v2, 0  ;;  %v236_v6 = vpop.permute.xlu1 %235 }
  0x84   : > { %602 = vmatpush3.bf16.xpose.msra.mxu0 %v147_v3  ;;  %635 = vmatprep.subr.msk.bf16.mxu1 %vm244_vm1, %v236_v6  ;;  %v246_v7 = vsel %vm244_vm1, %v236_v6, 0 }
  0x85   : > { %610 = vmatpush3.bf16.msra.mxu1 %v246_v7 }
  0x86   : > { %v133_v4 = vpop.permute.xlu0 %132 }
  0x87   : > { %634 = vmatprep.subr.msk.bf16.mxu0 %vm136_vm0, %v133_v4  ;;  %v144_v5 = vsel %vm136_vm0, %v133_v4, 0  ;;  %v234_v8 = vpop.permute.xlu1 %233 }
  0x88   : > { %611 = vmatprep.subr.bf16.mxu1 %v234_v8 }
  0x89   : > { %612 = vmatpush3.bf16.msra.mxu1 %v234_v8 }
  0x8c   : > { %604 = vmatpush3.bf16.xpose.msra.mxu0 %v144_v5 }
  0x93   : > { %606 = vmatmul.mubr.msk.bf16.vlgmr.msra.gmra.mxu0 %vm136_vm0, %v725_v0 }
 0x153   : > { %v607_v11 = vpop.f32.mrf.mxu0 }
 0x154   : > { %v199_v12 = vmul.f32 0.25, %v607_v11 }
 0x155   : > { %v183_v13 = vpop.f32.mrf.mxu0 }
 0x156   : > { %v197_v14 = vmul.f32 0.25, %v183_v13  ;;  %v202_v15 = vsel %vm123_vm2, %v199_v12, -1e+30 }
 0x157   : > { %v608_v16 = vpop.f32.mrf.mxu0  ;;  %v210_v17 = vsel %vm203_vm3, %v202_v15, -inf }
 0x158   : > { %211 = vmax.xlane.f32.xlu0 %v210_v17  ;;  %v200_v18 = vsel %vm123_vm2, %v197_v14, -1e+30 }
 0x159   : > { %v186_v19 = vpop.f32.mrf.mxu0  ;;  %v204_v20 = vsel %vm203_vm3, %v200_v18, -inf }
 0x15a   : > { %v198_v21 = vmul.f32 0.25, %v186_v19  ;;  %205 = vmax.xlane.f32.xlu1 %v204_v20 }
 0x15c   : > { %v201_v22 = vsel %vm123_vm2, %v198_v21, -1e+30 }
 0x15d   : > { %v207_v23 = vsel %vm203_vm3, %v201_v22, -inf }
 0x15e   : > { %208 = vmax.xlane.f32.xlu1 %v207_v23 }
 0x16e   : > { %304 = vrot.lane.b32.xlu0 %v725_v0, %s695_s14 }
 0x16f   : > { %308 = vrot.lane.b32.xlu1 %v725_v0, %s696_s15 }
 0x173   : > { %306 = vrot.lane.b32.xlu1 %v727_v1, %s696_s15 }
 0x177   : > { %302 = vrot.lane.b32.xlu1 %v727_v1, %s695_s14 }
 0x1e1   : > { %v212_v24 = vpop.xlane.xlu0 %211 }
 0x1e2   : > { %v215_v25 = vsub.f32 %v202_v15, %v212_v24 }
 0x1e3   : > { %v206_v26 = vpop.xlane.xlu1 %205 }
 0x1e4   : > { %v213_v27 = vsub.f32 %v200_v18, %v206_v26  ;;  %v220_v28 = vmul.f32 1.442695, %v215_v25 }
 0x1e5   : > { %v305_v43 = vpop.permute.xlu0 %304 }
 0x1e6   : > { %v216_v29 = vmul.f32 1.442695, %v213_v27  ;;  %661 = vpow2.f32 %v220_v28 }
 0x1e7   : > { %v209_v30 = vpop.xlane.xlu1 %208 }
 0x1e8   : > { %v214_v31 = vsub.f32 %v201_v22, %v209_v30  ;;  %663 = vpow2.f32 %v216_v29 }
 0x1ea   : > { %v218_v32 = vmul.f32 1.442695, %v214_v31 }
 0x1eb   : > { %v309_v33 = vpop.permute.xlu1 %308 }
 0x1ec   : > { %665 = vpow2.f32 %v218_v32  ;;  %636 = vmatprep.subr.msk.bf16.mxu1 %vm136_vm0, %v309_v33  ;;  %v320_v39 = vsel %vm136_vm0, %v309_v33, 0 }
 0x1ef   : > { %v307_v35 = vpop.permute.xlu1 %306 }
 0x1f0   : > { %v317_v42 = vsel %vm136_vm0, %v307_v35, 0 }
 0x1f3   : > { %v760_v34 = vpop.eup %661  ;;  %v303_v41 = vpop.permute.xlu1 %302 }
 0x1f4   : > { %v232_v40 = vpack.c.bf16 %v760_v34, %v760_v34  ;;  %v228_v17 = vsel %vm203_vm3, %v760_v34, 0.0 }
 0x1f5   : > { %v762_v36 = vpop.eup %663 }
 0x1f6   : > { %v222_v18 = vsel %vm203_vm3, %v762_v36, 0.0 }
 0x1f9   : > { %v764_v37 = vpop.eup %665 }
 0x1fa   : > { %v231_v38 = vpack.c.bf16 %v764_v37, %v762_v36  ;;  %v225_v19 = vsel %vm203_vm3, %v764_v37, 0.0 }
 0x1fc   : > { %613 = vmatprep.mubr.msk.bf16.mxu1 %vm203_vm3, %v231_v38 }
 0x1fd   : > { %614 = vmatmul.mubr.msk.bf16.vlgmr.msra.gmra.mxu1 %vm203_vm3, %v232_v40 }
 0x1fe   : > { %618 = vmatpush3.bf16.xpose.msra.mxu1 %v320_v39  ;;  %621 = vmatprep.mubr.msk.bf16.mxu1 %vm136_vm0, %v303_v41 }
 0x1ff   : > { %637 = vmatprep.subr.msk.bf16.mxu1 %vm136_vm0, %v307_v35 }
 0x206   : > { %620 = vmatpush3.bf16.xpose.msra.mxu1 %v317_v42 }
 0x20d   : > { %622 = vmatmul.mubr.msk.bf16.vlgmr.msra.gmra.mxu1 %vm136_vm0, %v305_v43 }
 0x2bd   : > { %v777_v44 = vpop.f32.mrf.mxu1 }
 0x2bf   : > { %v779_v45 = vpop.f32.mrf.mxu1 }
 0x2c1   : > { %v616_v46 = vpop.f32.mrf.mxu1 }
 0x2c3   : > { %v781_v47 = vpop.f32.mrf.mxu1 }
 0x2cd   : > { %v623_v48 = vpop.f32.mrf.mxu1 }
 0x2ce   : > { %v372_v49 = vmul.f32 0.25, %v623_v48 }
 0x2cf   : > { %v356_v50 = vpop.f32.mrf.mxu1 }
 0x2d0   : > { %v370_v51 = vmul.f32 0.25, %v356_v50  ;;  %v375_v52 = vsel %vm123_vm2, %v372_v49, -1e+30 }
 0x2d1   : > { %v624_v53 = vpop.f32.mrf.mxu1  ;;  %v382_v54 = vsel %vm203_vm3, %v375_v52, -inf }
 0x2d2   : > { %383 = vmax.xlane.f32.xlu1 %v382_v54  ;;  %v373_v55 = vsel %vm123_vm2, %v370_v51, -1e+30 }
 0x2d3   : > { %v359_v56 = vpop.f32.mrf.mxu1  ;;  %v376_v58 = vsel %vm203_vm3, %v373_v55, -inf }
 0x2d4   : > { %v371_v57 = vmul.f32 0.25, %v359_v56 }
 0x2d6   : > { %377 = vmax.xlane.f32.xlu1 %v376_v58  ;;  %v374_v59 = vsel %vm123_vm2, %v371_v57, -1e+30 }
 0x2d7   : > { %v379_v60 = vsel %vm203_vm3, %v374_v59, -inf }
 0x2d8   : > { %380 = vmax.xlane.f32.xlu0 %v379_v60 }
 0x2e7   : > { %407 = vrot.lane.b32.xlu1 %v725_v0, %s697_s16 }
 0x2ee   : > { %405 = vrot.lane.b32.xlu0 %v727_v1, %s697_s16 }
 0x35b   : > { %v384_v61 = vpop.xlane.xlu1 %383 }
 0x35c   : > { %v387_v62 = vsub.f32 %v375_v52, %v384_v61 }
 0x35e   : > { %v392_v3 = vmul.f32 1.442695, %v387_v62 }
 0x35f   : > { %v378_v63 = vpop.xlane.xlu1 %377 }
 0x360   : > { %v385_v2 = vsub.f32 %v373_v55, %v378_v63 }
 0x361   : > { %v381_v4 = vpop.xlane.xlu0 %380 }
 0x362   : > { %v388_v5 = vmul.f32 1.442695, %v385_v2  ;;  %v386_v6 = vsub.f32 %v374_v59, %v381_v4 }
 0x363   : > { %v408_v7 = vpop.permute.xlu1 %407 }
 0x364   : > { %667 = vpow2.f32 %v388_v5  ;;  %v390_v8 = vmul.f32 1.442695, %v386_v6  ;;  %v417_v9 = vsel %vm244_vm1, %v408_v7, 0  ;;  %638 = vmatprep.subr.msk.bf16.mxu0 %vm244_vm1, %v408_v7 }
 0x365   : > { %669 = vpow2.f32 %v392_v3  ;;  %626 = vmatpush3.bf16.msra.mxu0 %v417_v9  ;;  %v406_v0 = vpop.permute.xlu0 %405 }
 0x366   : > { %671 = vpow2.f32 %v390_v8  ;;  %627 = vmatprep.subr.bf16.mxu0 %v406_v0 }
 0x369   : > { %628 = vmatpush3.bf16.msra.mxu0 %v406_v0 }
 0x371   : > { %v668_v1 = vpop.eup %667 }
 0x372   : > { %v670_v10 = vpop.eup %669  ;;  %v394_v11 = vsel %vm203_vm3, %v668_v1, 0.0 }
 0x373   : > { %v672_v12 = vpop.eup %671  ;;  %395 = vadd.xlane.f32.xlu1 %v394_v11  ;;  %v404_v15 = vpack.c.bf16 %v670_v10, %v670_v10  ;;  %v400_v16 = vsel %vm203_vm3, %v670_v10, 0.0 }
 0x374   : > { %v397_v13 = vsel %vm203_vm3, %v672_v12, 0.0  ;;  %v403_v14 = vpack.c.bf16 %v672_v12, %v668_v1 }
 0x375   : > { %398 = vadd.xlane.f32.xlu0 %v397_v13 }
 0x376   : > { %629 = vmatprep.mubr.msk.bf16.mxu0 %vm203_vm3, %v403_v14 }
 0x377   : > { %401 = vadd.xlane.f32.xlu1 %v400_v16  ;;  %630 = vmatmul.mubr.msk.bf16.vlgmr.msra.gmra.mxu0 %vm203_vm3, %v404_v15 }
 0x379   : > { %229 = vadd.xlane.f32.xlu0 %v228_v17 }
 0x37b   : > { %223 = vadd.xlane.f32.xlu1 %v222_v18 }
 0x37f   : > { %226 = vadd.xlane.f32.xlu1 %v225_v19 }
 0x3fc   : > { %v396_v20 = vpop.xlane.xlu1 %395 }
 0x3fe   : > { %v399_v22 = vpop.xlane.xlu0 %398 }
 0x400   : > { %v402_v21 = vpop.xlane.xlu1 %401 }
 0x401   : > { %673 = vrcp.f32 %v402_v21 }
 0x402   : > { %675 = vrcp.f32 %v396_v20  ;;  %v230_v34 = vpop.xlane.xlu0 %229 }
 0x403   : > { %677 = vrcp.f32 %v399_v22 }
 0x404   : > { %679 = vrcp.f32 %v230_v34  ;;  %v224_v35 = vpop.xlane.xlu1 %223 }
 0x405   : > { %681 = vrcp.f32 %v224_v35 }
 0x408   : > { %v227_v36 = vpop.xlane.xlu1 %226 }
 0x409   : > { %683 = vrcp.f32 %v227_v36 }
 0x40e   : > { %v674_v23 = vpop.eup %673 }
 0x40f   : > { %v676_v28 = vpop.eup %675 }
 0x410   : > { %v678_v29 = vpop.eup %677 }
 0x411   : > { %v680_v37 = vpop.eup %679 }
 0x412   : > { %v301_v38 = vmul.f32 %v680_v37, %v777_v44  ;;  %v682_v42 = vpop.eup %681 }
 0x413   : > { %v299_v48 = vmul.f32 %v682_v42, %v779_v45 }
 0x416   : > { %v684_v43 = vpop.eup %683 }
 0x417   : > { %v300_v49 = vmul.f32 %v684_v43, %v781_v47 }
 0x437   : > { %v631_v24 = vpop.f32.mrf.mxu0 }
 0x438   : > { %v472_v25 = vmul.f32 %v674_v23, %v631_v24 }
 0x439   : > { %v453_v26 = vpop.f32.mrf.mxu0 }
 0x43a   : > { %480 = vrot.lane.b32.xlu0 %v472_v25, %s698_s17  ;;  %v470_v31 = vmul.f32 %v676_v28, %v453_v26 }
 0x43b   : > { %v632_v27 = vpop.f32.mrf.mxu0 }
 0x43d   : > { %v456_v30 = vpop.f32.mrf.mxu0 }
 0x43e   : > { %v471_v32 = vmul.f32 %v678_v29, %v456_v30 }
 0x440   : > { %v654_v33 = vpack.i.bf16 %v471_v32, %v470_v31 }
 0x442   : > { %655 = vrot.lane.b32.xlu1 %v654_v33, %s698_s17 }
 0x4ac   : > { %v481_v39 = vpop.permute.xlu0 %480 }
 0x4ad   : > { %v487_v40 = vsel %vm136_vm0, %v301_v38, %v481_v39 }
 0x4ae   : > { %v584_v41 = vpack.c.bf16 %v487_v40, %v487_v40 }
 0x4b0   : > { %504 = vst.msk [vmem:[%s116_s20 + $0x8] sm:$0xf] %vm501_vm4, %v584_v41 }
 0x4b4   : > { %v656_v46 = vpop.permute.xlu1 %655 }
 0x4b5   : > { %v658_v44 = vunpack.i.h.bf16 %v656_v46  ;;  %v657_v50 = vunpack.i.l.bf16 %v656_v46 }
 0x4b7   : > { %v486_v51 = vsel %vm136_vm0, %v300_v49, %v658_v44  ;;  %v485_v52 = vsel %vm136_vm0, %v299_v48, %v657_v50 }
 0x4b8   : > { %v583_v53 = vpack.c.bf16 %v486_v51, %v486_v51  ;;  %v582_v54 = vpack.c.bf16 %v485_v52, %v485_v52 }
 0x4ba   : > { %503 = vst.msk [vmem:[%s116_s20 + $0x4] sm:$0xf] %vm501_vm4, %v583_v53  ;;  %502 = vst.msk [vmem:[%s116_s20] sm:$0xf] %vm501_vm4, %v582_v54 }
 0x4bb PF: > { %s11_s6 = sadd.s32 1, %s691_s6  }
 0x4bc   : > { %p8_p4 = scmp.ge.s32.totalorder %s11_s6, 4  }
 0x4be   :  { %10 = sbr.rel (!%p8_p4) target bundleno = 1 (0x1), region = 54 }

// kernel: convvit_forward.20
= control target key start
LH: loop header
LB: loop body
LE: loop exit
PB: predicated region body
PF: predicated region fallthrough
CT: control target
= control target key end

     0   :  { %vm22_vm0 = vcmask 261120   ;;  %v293_v0 = vmov 0.0   ;;  %vm294_vm1 = vmmov 0   ;;  %vm215_vm2 = vcmask 257024   ;;  %s386_s1 = inlined_call_operand.vmem [shape: bf16[32,32], index: 1, kind: input, shape index: {}]   ;;  %s387_s0 = inlined_call_operand.vmem [shape: bf16[48,32], index: 0, kind: input, shape index: {}]   ;;  %s388_s3 = inlined_call_operand.vmem [shape: bf16[48,32], index: 3, kind: input, shape index: {}]   ;;  %s389_s2 = inlined_call_operand.vmem [shape: f32[1,32], index: 2, kind: input, shape index: {}]   ;;  %s390_s4 = inlined_call_operand.vmem [shape: bf16[48,32], index: 4, kind: output, shape index: {}]  }
   0x1   :  { %282 = vmatprep.subr.bf16.mxu1 %v293_v0  ;;  %v288_v1 = vld [vmem:[%s386_s1 + $0x8] sm:$0xff]   ;;  %266 = vmatprep.subr.bf16.mxu0 %v293_v0  ;;  %23 = vst.msk [vmem:[#allocation2] sm:$0xff] %vm22_vm0, %v293_v0  ;;  %24 = vst.msk [vmem:[#allocation2 + $0x8] sm:$0xff] %vm22_vm0, %v293_v0  ;;  %v289_v2 = vld [vmem:[%s386_s1] sm:$0xff]  }
   0x2   :  { %25 = vst.msk [vmem:[#allocation2 + $0x10] sm:$0xff] %vm22_vm0, %v293_v0  ;;  %26 = vst.msk [vmem:[#allocation2 + $0x18] sm:$0xff] %vm22_vm0, %v293_v0  ;;  %274 = vmatprep.mubr.msk.bf16.mxu1 %vm294_vm1, %v293_v0  ;;  %270 = vmatprep.mubr.msk.bf16.mxu0 %vm294_vm1, %v293_v0  ;;  %v290_v3 = vld [vmem:[%s387_s0 + $0x8] sm:$0xff]   ;;  %v291_v4 = vld [vmem:[%s387_s0] sm:$0xff]  }
   0x3   :  { %27 = vst.msk [vmem:[#allocation2 + $0x20] sm:$0xff] %vm22_vm0, %v293_v0  ;;  %28 = vst.msk [vmem:[#allocation2 + $0x28] sm:$0xff] %vm22_vm0, %v293_v0  ;;  %284 = vmatpush3.bf16.msra.mxu1 %v288_v1  ;;  %267 = vmatpush3.bf16.msra.mxu0 %v288_v1  ;;  %v292_v5 = vld [vmem:[%s387_s0 + $0x10] sm:$0xff]   ;;  %v259_v20 = vld [vmem:[%s388_s3 + $0x8] sm:$0xff]  }
   0x4   :  { %283 = vmatprep.subr.bf16.mxu1 %v293_v0  ;;  %268 = vmatprep.subr.bf16.mxu0 %v293_v0  ;;  %v248_v21 = vld [vmem:[%s388_s3] sm:$0xff]   ;;  %v253_v27 = vunpack.c.l.bf16 %v259_v20  ;;  %v254_v36 = vunpack.c.h.bf16 %v259_v20  ;;  %v260_v44 = vld [vmem:[%s388_s3 + $0x10] sm:$0xff]  }
   0x5   :  { %v234_v25 = vld [vmem:[%s389_s2] ss:$0 sm:$0xff]  ;;  %v249_v28 = vunpack.c.l.bf16 %v248_v21  ;;  %v250_v40 = vunpack.c.h.bf16 %v248_v21  ;;  %v257_v52 = vunpack.c.l.bf16 %v260_v44  ;;  %v258_v58 = vunpack.c.h.bf16 %v260_v44 }
   0x7   :  { %285 = vmatpush3.bf16.msra.mxu1 %v289_v2  ;;  %269 = vmatpush3.bf16.msra.mxu0 %v289_v2 }
   0x8   :  { %v29_v7 = vld [vmem:[#allocation2] sm:$0xff]  ;;  %v30_v15 = vld [vmem:[#allocation2 + $0x8] sm:$0xff] }
   0x9   :  { %v31_v6 = vld [vmem:[#allocation2 + $0x10] sm:$0xff]  ;;  %v32_v14 = vld [vmem:[#allocation2 + $0x18] sm:$0xff] }
   0xa   :  { %275 = vmatmul.mubr.msk.bf16.vlgmr.msra.gmra.mxu1 %vm22_vm0, %v290_v3  ;;  %271 = vmatmul.mubr.msk.bf16.vlgmr.msra.gmra.mxu0 %vm22_vm0, %v291_v4  ;;  %v33_v24 = vld [vmem:[#allocation2 + $0x20] sm:$0xff]  ;;  %v34_v33 = vld [vmem:[#allocation2 + $0x28] sm:$0xff] }
   0xb   :  { %278 = vmatprep.mubr.msk.bf16.mxu1 %vm294_vm1, %v293_v0 }
  0x12   :  { %279 = vmatmul.mubr.msk.bf16.gmra.mxu1 %vm22_vm0, %v292_v5 }
  0xca   :  { %v124_v8 = vpop.f32.mrf.mxu1  ;;  %v116_v9 = vpop.f32.mrf.mxu0 }
  0xcb   :  { %v141_v10 = vadd.f32 %v124_v8, %v31_v6  ;;  %v139_v11 = vadd.f32 %v116_v9, %v29_v7 }
  0xcc   :  { %v276_v12 = vpop.f32.mrf.mxu1  ;;  %v272_v13 = vpop.f32.mrf.mxu0 }
  0xcd   :  { %147 = vst.msk [vmem:[#allocation2 + $0x10] sm:$0xff] %vm22_vm0, %v141_v10  ;;  %145 = vst.msk [vmem:[#allocation2] sm:$0xff] %vm22_vm0, %v139_v11 }
  0xce   :  { %v127_v16 = vpop.f32.mrf.mxu1  ;;  %v119_v17 = vpop.f32.mrf.mxu0 }
  0xcf   :  { %v142_v18 = vadd.f32 %v127_v16, %v32_v14  ;;  %v140_v19 = vadd.f32 %v119_v17, %v30_v15 }
  0xd0   :  { %v277_v22 = vpop.f32.mrf.mxu1  ;;  %v273_v23 = vpop.f32.mrf.mxu0 }
  0xd1   :  { %148 = vst.msk [vmem:[#allocation2 + $0x18] sm:$0xff] %vm22_vm0, %v142_v18  ;;  %146 = vst.msk [vmem:[#allocation2 + $0x8] sm:$0xff] %vm22_vm0, %v140_v19 }
  0xd2   :  { %v132_v26 = vpop.f32.mrf.mxu1 }
  0xd3   :  { %v143_v29 = vadd.f32 %v132_v26, %v33_v24 }
  0xd4   :  { %v156_v30 = vld [vmem:[#allocation2 + $0x10] sm:$0xff]  ;;  %v154_v31 = vld [vmem:[#allocation2] sm:$0xff]  ;;  %v280_v32 = vpop.f32.mrf.mxu1 }
  0xd5   :  { %v169_v34 = vadd.f32 %v234_v25, %v156_v30  ;;  %v167_v35 = vadd.f32 %v234_v25, %v154_v31  ;;  %149 = vst.msk [vmem:[#allocation2 + $0x20] sm:$0xff] %vm22_vm0, %v143_v29 }
  0xd6   :  { %v135_v37 = vpop.f32.mrf.mxu1 }
  0xd7   :  { %v187_v38 = vadd.f32 %v253_v27, %v169_v34  ;;  %v185_v39 = vadd.f32 %v249_v28, %v167_v35  ;;  %v144_v41 = vadd.f32 %v135_v37, %v34_v33 }
  0xd8   :  { %v157_v42 = vld [vmem:[#allocation2 + $0x18] sm:$0xff]  ;;  %v155_v43 = vld [vmem:[#allocation2 + $0x8] sm:$0xff]  ;;  %v281_v45 = vpop.f32.mrf.mxu1 }
  0xd9   :  { %v243_v46 = vpack.c.bf16 %v187_v38, %v187_v38  ;;  %v241_v47 = vpack.c.bf16 %v185_v39, %v185_v39  ;;  %v170_v48 = vadd.f32 %v234_v25, %v157_v42  ;;  %v168_v49 = vadd.f32 %v234_v25, %v155_v43  ;;  %150 = vst.msk [vmem:[#allocation2 + $0x28] sm:$0xff] %vm22_vm0, %v144_v41 }
  0xdb   :  { %218 = vst.msk [vmem:[%s390_s4 + $0x8] sm:$0xf] %vm215_vm2, %v243_v46  ;;  %216 = vst.msk [vmem:[%s390_s4] sm:$0xf] %vm215_vm2, %v241_v47  ;;  %v188_v50 = vadd.f32 %v254_v36, %v170_v48  ;;  %v186_v51 = vadd.f32 %v250_v40, %v168_v49 }
  0xdc   :  { %v158_v53 = vld [vmem:[#allocation2 + $0x20] sm:$0xff] }
  0xdd   :  { %v244_v54 = vpack.c.bf16 %v188_v50, %v188_v50  ;;  %v242_v55 = vpack.c.bf16 %v186_v51, %v186_v51  ;;  %v171_v56 = vadd.f32 %v234_v25, %v158_v53 }
  0xdf   :  { %219 = vst.msk [vmem:[%s390_s4 + $0xc] sm:$0xf] %vm215_vm2, %v244_v54  ;;  %217 = vst.msk [vmem:[%s390_s4 + $0x4] sm:$0xf] %vm215_vm2, %v242_v55  ;;  %v189_v57 = vadd.f32 %v257_v52, %v171_v56 }
  0xe0   :  { %v159_v59 = vld [vmem:[#allocation2 + $0x28] sm:$0xff] }
  0xe1   :  { %v245_v60 = vpack.c.bf16 %v189_v57, %v189_v57  ;;  %v172_v61 = vadd.f32 %v234_v25, %v159_v59 }
  0xe3   :  { %220 = vst.msk [vmem:[%s390_s4 + $0x10] sm:$0xf] %vm215_vm2, %v245_v60  ;;  %v190_v62 = vadd.f32 %v258_v58, %v172_v61 }
  0xe5   :  { %v246_v63 = vpack.c.bf16 %v190_v62, %v190_v62 }
  0xe7   :  { %221 = vst.msk [vmem:[%s390_s4 + $0x14] sm:$0xf] %vm215_vm2, %v246_v63 }

// kernel: convvit_forward.21
= control target key start
LH: loop header
LB: loop body
LE: loop exit
PB: predicated region body
PF: predicated region fallthrough
CT: control target
= control target key end

     0   :  { %vm26_vm0 = vcmask 261120   ;;  %vm156_vm1 = vcmask 257024   ;;  %s293_s0 = inlined_call_operand.vmem [shape: bf16[48,32], index: 0, kind: input, shape index: {}]   ;;  %s294_s1 = inlined_call_operand.vmem [shape: f32[1,32], index: 1, kind: input, shape index: {}]   ;;  %s295_s2 = inlined_call_operand.vmem [shape: f32[1,32], index: 2, kind: input, shape index: {}]   ;;  %s296_s3 = inlined_call_operand.vmem [shape: bf16[48,32], index: 3, kind: output, shape index: {}]  }
   0x1   :  { %v182_v0 = vld [vmem:[%s293_s0] sm:$0xff]   ;;  %v193_v1 = vld [vmem:[%s293_s0 + $0x8] sm:$0xff]   ;;  %v194_v6 = vld [vmem:[%s293_s0 + $0x10] sm:$0xff]  }
   0x2   :  { %v183_v2 = vunpack.c.l.bf16 %v182_v0  ;;  %v187_v3 = vunpack.c.l.bf16 %v193_v1  ;;  %v184_v4 = vunpack.c.h.bf16 %v182_v0  ;;  %v188_v5 = vunpack.c.h.bf16 %v193_v1  ;;  %v167_v0 = vld [vmem:[%s294_s1] ss:$0 sm:$0xff] }
   0x3   :  { %v191_v11 = vunpack.c.l.bf16 %v194_v6  ;;  %v192_v12 = vunpack.c.h.bf16 %v194_v6 }
   0x4   :  { %v27_v7 = vsel %vm26_vm0, %v183_v2, 0.0  ;;  %v33_v8 = vsel %vm26_vm0, %v187_v3, 0.0  ;;  %v30_v9 = vsel %vm26_vm0, %v184_v4, 0.0  ;;  %v36_v10 = vsel %vm26_vm0, %v188_v5, 0.0 }
   0x5   :  { %28 = vadd.xlane.f32.xlu0 %v27_v7  ;;  %34 = vadd.xlane.f32.xlu1 %v33_v8  ;;  %v39_v13 = vsel %vm26_vm0, %v191_v11, 0.0  ;;  %v42_v14 = vsel %vm26_vm0, %v192_v12, 0.0 }
   0x9   :  { %31 = vadd.xlane.f32.xlu0 %v30_v9  ;;  %37 = vadd.xlane.f32.xlu1 %v36_v10 }
   0xd   :  { %40 = vadd.xlane.f32.xlu0 %v39_v13  ;;  %43 = vadd.xlane.f32.xlu1 %v42_v14 }
  0x8e   :  { %v29_v15 = vpop.xlane.xlu0 %28  ;;  %v35_v16 = vpop.xlane.xlu1 %34 }
  0x8f   :  { %v46_v17 = vmul.f32 0.03125, %v29_v15  ;;  %v48_v18 = vmul.f32 0.03125, %v35_v16 }
  0x91   :  { %v52_v19 = vsub.f32 %v183_v2, %v46_v17  ;;  %v242_v20 = vsub.f32 %v187_v3, %v48_v18  ;;  %v168_v2 = vld [vmem:[%s295_s2] ss:$0 sm:$0xff] }
  0x92   :  { %v32_v21 = vpop.xlane.xlu0 %31  ;;  %v38_v22 = vpop.xlane.xlu1 %37 }
  0x93   :  { %v47_v23 = vmul.f32 0.03125, %v32_v21  ;;  %v49_v24 = vmul.f32 0.03125, %v38_v22  ;;  %v58_v25 = vmul.f32 %v52_v19, %v52_v19  ;;  %v60_v26 = vmul.f32 %v242_v20, %v242_v20 }
  0x95   :  { %v53_v27 = vsub.f32 %v184_v4, %v47_v23  ;;  %v246_v28 = vsub.f32 %v188_v5, %v49_v24  ;;  %v64_v29 = vsel %vm26_vm0, %v58_v25, 0.0  ;;  %v70_v32 = vsel %vm26_vm0, %v60_v26, 0.0 }
  0x96   :  { %65 = vadd.xlane.f32.xlu0 %v64_v29  ;;  %v41_v30 = vpop.xlane.xlu0 %40  ;;  %v44_v31 = vpop.xlane.xlu1 %43 }
  0x97   :  { %v50_v33 = vmul.f32 0.03125, %v41_v30  ;;  %v51_v34 = vmul.f32 0.03125, %v44_v31  ;;  %v59_v35 = vmul.f32 %v53_v27, %v53_v27  ;;  %v61_v36 = vmul.f32 %v246_v28, %v246_v28 }
  0x99   :  { %v56_v37 = vsub.f32 %v191_v11, %v50_v33  ;;  %v252_v38 = vsub.f32 %v192_v12, %v51_v34  ;;  %v67_v39 = vsel %vm26_vm0, %v59_v35, 0.0  ;;  %v73_v40 = vsel %vm26_vm0, %v61_v36, 0.0 }
  0x9a   :  { %71 = vadd.xlane.f32.xlu0 %v70_v32  ;;  %68 = vadd.xlane.f32.xlu1 %v67_v39 }
  0x9b   :  { %v62_v41 = vmul.f32 %v56_v37, %v56_v37  ;;  %v63_v42 = vmul.f32 %v252_v38, %v252_v38 }
  0x9d   :  { %v76_v43 = vsel %vm26_vm0, %v62_v41, 0.0  ;;  %v79_v44 = vsel %vm26_vm0, %v63_v42, 0.0 }
  0x9e   :  { %74 = vadd.xlane.f32.xlu1 %v73_v40  ;;  %77 = vadd.xlane.f32.xlu0 %v76_v43 }
  0xa2   :  { %80 = vadd.xlane.f32.xlu1 %v79_v44 }
 0x11f   :  { %v66_v45 = vpop.xlane.xlu0 %65 }
 0x120   :  { %v82_v46 = vmul.f32 0.03125, %v66_v45 }
 0x122   :  { %v88_v47 = vadd.f32 1e-05, %v82_v46 }
 0x123   :  { %v69_v48 = vpop.xlane.xlu1 %68  ;;  %v72_v49 = vpop.xlane.xlu0 %71 }
 0x124   :  { %195 = vrsqrt.f32 %v88_v47  ;;  %v83_v50 = vmul.f32 0.03125, %v69_v48  ;;  %v84_v51 = vmul.f32 0.03125, %v72_v49 }
 0x126   :  { %v89_v52 = vadd.f32 1e-05, %v83_v50  ;;  %v90_v53 = vadd.f32 1e-05, %v84_v51 }
 0x127   :  { %v75_v54 = vpop.xlane.xlu1 %74  ;;  %v78_v55 = vpop.xlane.xlu0 %77 }
 0x128   :  { %197 = vrsqrt.f32 %v89_v52  ;;  %v85_v56 = vmul.f32 0.03125, %v75_v54  ;;  %v86_v57 = vmul.f32 0.03125, %v78_v55 }
 0x129   :  { %199 = vrsqrt.f32 %v90_v53 }
 0x12a   :  { %v91_v58 = vadd.f32 1e-05, %v85_v56  ;;  %v92_v59 = vadd.f32 1e-05, %v86_v57 }
 0x12b   :  { %v81_v60 = vpop.xlane.xlu1 %80 }
 0x12c   :  { %201 = vrsqrt.f32 %v91_v58  ;;  %v87_v61 = vmul.f32 0.03125, %v81_v60 }
 0x12d   :  { %203 = vrsqrt.f32 %v92_v59 }
 0x12e   :  { %v93_v62 = vadd.f32 1e-05, %v87_v61 }
 0x130   :  { %205 = vrsqrt.f32 %v93_v62 }
 0x131   :  { %v196_v63 = vpop.eup %195 }
 0x132   :  { %v100_v1 = vmul.f32 %v196_v63, %v52_v19 }
 0x134   :  { %v113_v3 = vmul.f32 %v167_v0, %v100_v1 }
 0x135   :  { %v198_v4 = vpop.eup %197 }
 0x136   :  { %v200_v5 = vpop.eup %199  ;;  %v126_v6 = vadd.f32 %v168_v2, %v113_v3  ;;  %v101_v7 = vmul.f32 %v198_v4, %v53_v27 }
 0x137   :  { %v102_v8 = vmul.f32 %v200_v5, %v242_v20 }
 0x138   :  { %v175_v9 = vpack.c.bf16 %v126_v6, %v126_v6  ;;  %v114_v10 = vmul.f32 %v167_v0, %v101_v7 }
 0x139   :  { %v202_v11 = vpop.eup %201  ;;  %v115_v12 = vmul.f32 %v167_v0, %v102_v8 }
 0x13a   :  { %v204_v13 = vpop.eup %203  ;;  %157 = vst.msk [vmem:[%s296_s3] sm:$0xf] %vm156_vm1, %v175_v9  ;;  %v127_v14 = vadd.f32 %v168_v2, %v114_v10  ;;  %v103_v15 = vmul.f32 %v202_v11, %v246_v28 }
 0x13b   :  { %v128_v16 = vadd.f32 %v168_v2, %v115_v12  ;;  %v104_v17 = vmul.f32 %v204_v13, %v56_v37 }
 0x13c   :  { %v176_v18 = vpack.c.bf16 %v127_v14, %v127_v14  ;;  %v116_v19 = vmul.f32 %v167_v0, %v103_v15 }
 0x13d   :  { %v206_v21 = vpop.eup %205  ;;  %v177_v22 = vpack.c.bf16 %v128_v16, %v128_v16  ;;  %v117_v20 = vmul.f32 %v167_v0, %v104_v17 }
 0x13e   :  { %158 = vst.msk [vmem:[%s296_s3 + $0x4] sm:$0xf] %vm156_vm1, %v176_v18  ;;  %v129_v23 = vadd.f32 %v168_v2, %v116_v19  ;;  %v105_v24 = vmul.f32 %v206_v21, %v252_v38 }
 0x13f   :  { %159 = vst.msk [vmem:[%s296_s3 + $0x8] sm:$0xf] %vm156_vm1, %v177_v22  ;;  %v130_v25 = vadd.f32 %v168_v2, %v117_v20 }
 0x140   :  { %v178_v26 = vpack.c.bf16 %v129_v23, %v129_v23  ;;  %v118_v27 = vmul.f32 %v167_v0, %v105_v24 }
 0x141   :  { %v179_v28 = vpack.c.bf16 %v130_v25, %v130_v25 }
 0x142   :  { %160 = vst.msk [vmem:[%s296_s3 + $0xc] sm:$0xf] %vm156_vm1, %v178_v26  ;;  %v131_v29 = vadd.f32 %v168_v2, %v118_v27 }
 0x143   :  { %161 = vst.msk [vmem:[%s296_s3 + $0x10] sm:$0xf] %vm156_vm1, %v179_v28 }
 0x144   :  { %v180_v30 = vpack.c.bf16 %v131_v29, %v131_v29 }
 0x146   :  { %162 = vst.msk [vmem:[%s296_s3 + $0x14] sm:$0xf] %vm156_vm1, %v180_v30 }

// kernel: convvit_forward.22
= control target key start
LH: loop header
LB: loop body
LE: loop exit
PB: predicated region body
PF: predicated region fallthrough
CT: control target
= control target key end

     0   :  { %vm19_vm0 = vcmask 523264   ;;  %v325_v0 = vmov 0.0   ;;  %vm326_vm1 = vmmov 0   ;;  %vm69_vm2 = vcmask 261120   ;;  %s404_s1 = inlined_call_operand.vmem [shape: bf16[32,64], index: 1, kind: input, shape index: {}]   ;;  %s405_s0 = inlined_call_operand.vmem [shape: bf16[48,32], index: 0, kind: input, shape index: {}]   ;;  %s406_s2 = inlined_call_operand.vmem [shape: f32[1,64], index: 2, kind: input, shape index: {}]   ;;  %s407_s3 = inlined_call_operand.vmem [shape: bf16[48,64], index: 3, kind: output, shape index: {}]  }
   0x1   :  { %286 = vmatprep.subr.bf16.mxu0 %v325_v0  ;;  %302 = vmatprep.subr.bf16.mxu1 %v325_v0  ;;  %v308_v1 = vld [vmem:[%s404_s1 + $0x8] sm:$0xff]   ;;  %20 = vst.msk [vmem:[#allocation2] sm:$0xff] %vm19_vm0, %v325_v0  ;;  %21 = vst.msk [vmem:[#allocation2 + $0x8] sm:$0xff] %vm19_vm0, %v325_v0  ;;  %v309_v2 = vld [vmem:[%s404_s1] sm:$0xff]   ;;  %vm249_vm3 = vcmask 519168  }
   0x2   :  { %22 = vst.msk [vmem:[#allocation2 + $0x10] sm:$0xff] %vm19_vm0, %v325_v0  ;;  %23 = vst.msk [vmem:[#allocation2 + $0x18] sm:$0xff] %vm19_vm0, %v325_v0  ;;  %290 = vmatprep.mubr.msk.bf16.mxu0 %vm326_vm1, %v325_v0  ;;  %294 = vmatprep.mubr.msk.bf16.mxu1 %vm326_vm1, %v325_v0  ;;  %v310_v3 = vld [vmem:[%s405_s0] sm:$0xff]   ;;  %v311_v4 = vld [vmem:[%s405_s0 + $0x8] sm:$0xff]  }
   0x3   :  { %24 = vst.msk [vmem:[#allocation2 + $0x20] sm:$0xff] %vm19_vm0, %v325_v0  ;;  %25 = vst.msk [vmem:[#allocation2 + $0x28] sm:$0xff] %vm19_vm0, %v325_v0  ;;  %287 = vmatpush3.bf16.msra.mxu0 %v308_v1  ;;  %304 = vmatpush3.bf16.msra.mxu1 %v308_v1  ;;  %v312_v5 = vld [vmem:[%s405_s0 + $0x10] sm:$0xff]   ;;  %v268_v23 = vld [vmem:[%s406_s2] ss:$0 sm:$0xff] }
   0x4   :  { %288 = vmatprep.subr.bf16.mxu0 %v325_v0  ;;  %303 = vmatprep.subr.bf16.mxu1 %v325_v0 }
   0x7   :  { %289 = vmatpush3.bf16.msra.mxu0 %v309_v2  ;;  %305 = vmatpush3.bf16.msra.mxu1 %v309_v2 }
   0x8   :  { %v26_v6 = vld [vmem:[#allocation2] sm:$0xff]  ;;  %v27_v14 = vld [vmem:[#allocation2 + $0x8] sm:$0xff] }
   0x9   :  { %v28_v7 = vld [vmem:[#allocation2 + $0x10] sm:$0xff]  ;;  %v29_v15 = vld [vmem:[#allocation2 + $0x18] sm:$0xff] }
   0xa   :  { %291 = vmatmul.mubr.msk.bf16.vlgmr.msra.gmra.mxu0 %vm69_vm2, %v310_v3  ;;  %295 = vmatmul.mubr.msk.bf16.vlgmr.msra.gmra.mxu1 %vm69_vm2, %v311_v4  ;;  %v30_v22 = vld [vmem:[#allocation2 + $0x20] sm:$0xff]  ;;  %v31_v29 = vld [vmem:[#allocation2 + $0x28] sm:$0xff] }
   0xb   :  { %298 = vmatprep.mubr.msk.bf16.mxu1 %vm326_vm1, %v325_v0 }
  0x12   :  { %299 = vmatmul.mubr.msk.bf16.gmra.mxu1 %vm69_vm2, %v312_v5 }
  0xca   :  { %v113_v8 = vpop.f32.mrf.mxu0  ;;  %v121_v9 = vpop.f32.mrf.mxu1 }
  0xcb   :  { %v136_v10 = vadd.f32 %v113_v8, %v26_v6  ;;  %v138_v11 = vadd.f32 %v121_v9, %v28_v7 }
  0xcc   :  { %v292_v12 = vpop.f32.mrf.mxu0  ;;  %v296_v13 = vpop.f32.mrf.mxu1 }
  0xcd   :  { %143 = vst.msk [vmem:[#allocation2] sm:$0xff] %vm19_vm0, %v136_v10  ;;  %145 = vst.msk [vmem:[#allocation2 + $0x10] sm:$0xff] %vm19_vm0, %v138_v11 }
  0xce   :  { %v116_v16 = vpop.f32.mrf.mxu0  ;;  %v124_v17 = vpop.f32.mrf.mxu1 }
  0xcf   :  { %v137_v18 = vadd.f32 %v116_v16, %v27_v14  ;;  %v139_v19 = vadd.f32 %v124_v17, %v29_v15 }
  0xd0   :  { %v297_v20 = vpop.f32.mrf.mxu1  ;;  %v293_v21 = vpop.f32.mrf.mxu0 }
  0xd1   :  { %144 = vst.msk [vmem:[#allocation2 + $0x8] sm:$0xff] %vm19_vm0, %v137_v18  ;;  %146 = vst.msk [vmem:[#allocation2 + $0x18] sm:$0xff] %vm19_vm0, %v139_v19 }
  0xd2   :  { %v129_v24 = vpop.f32.mrf.mxu1 }
  0xd3   :  { %v140_v25 = vadd.f32 %v129_v24, %v30_v22 }
  0xd4   :  { %v152_v26 = vld [vmem:[#allocation2] sm:$0xff]  ;;  %v154_v27 = vld [vmem:[#allocation2 + $0x10] sm:$0xff]  ;;  %v300_v28 = vpop.f32.mrf.mxu1 }
  0xd5   :  { %v165_v30 = vadd.f32 %v268_v23, %v152_v26  ;;  %v167_v31 = vadd.f32 %v268_v23, %v154_v27  ;;  %147 = vst.msk [vmem:[#allocation2 + $0x20] sm:$0xff] %vm19_vm0, %v140_v25 }
  0xd6   :  { %v132_v32 = vpop.f32.mrf.mxu1 }
  0xd7   :  { %v171_v33 = vmul.f32 %v165_v30, %v165_v30  ;;  %v173_v34 = vmul.f32 %v167_v31, %v167_v31  ;;  %v141_v35 = vadd.f32 %v132_v32, %v31_v29 }
  0xd8   :  { %v153_v36 = vld [vmem:[#allocation2 + $0x8] sm:$0xff]  ;;  %v155_v37 = vld [vmem:[#allocation2 + $0x18] sm:$0xff]  ;;  %v301_v38 = vpop.f32.mrf.mxu1 }
  0xd9   :  { %v177_v39 = vmul.f32 %v171_v33, %v165_v30  ;;  %v179_v40 = vmul.f32 %v173_v34, %v167_v31  ;;  %v166_v41 = vadd.f32 %v268_v23, %v153_v36  ;;  %v168_v42 = vadd.f32 %v268_v23, %v155_v37  ;;  %148 = vst.msk [vmem:[#allocation2 + $0x28] sm:$0xff] %vm19_vm0, %v141_v35 }
  0xdb   :  { %v183_v43 = vmul.f32 0.044715, %v177_v39  ;;  %v185_v44 = vmul.f32 0.044715, %v179_v40  ;;  %v172_v45 = vmul.f32 %v166_v41, %v166_v41  ;;  %v174_v46 = vmul.f32 %v168_v42, %v168_v42 }
  0xdc   :  { %v156_v47 = vld [vmem:[#allocation2 + $0x20] sm:$0xff] }
  0xdd   :  { %v189_v48 = vadd.f32 %v183_v43, %v165_v30  ;;  %v191_v49 = vadd.f32 %v185_v44, %v167_v31  ;;  %v178_v50 = vmul.f32 %v172_v45, %v166_v41  ;;  %v180_v51 = vmul.f32 %v174_v46, %v168_v42 }
  0xde   :  { %v169_v52 = vadd.f32 %v268_v23, %v156_v47 }
  0xdf   :  { %v195_v53 = vmul.f32 0.7978846, %v189_v48  ;;  %v197_v54 = vmul.f32 0.7978846, %v191_v49  ;;  %v184_v55 = vmul.f32 0.044715, %v178_v50 }
  0xe0   :  { %v186_v56 = vmul.f32 0.044715, %v180_v51  ;;  %v175_v57 = vmul.f32 %v169_v52, %v169_v52  ;;  %v157_v58 = vld [vmem:[#allocation2 + $0x28] sm:$0xff] }
  0xe1   :  { %313 = vtanh.f32 %v195_v53  ;;  %v190_v59 = vadd.f32 %v184_v55, %v166_v41  ;;  %v170_v60 = vadd.f32 %v268_v23, %v157_v58 }
  0xe2   :  { %315 = vtanh.f32 %v197_v54  ;;  %v192_v61 = vadd.f32 %v186_v56, %v168_v42  ;;  %v181_v62 = vmul.f32 %v175_v57, %v169_v52 }
  0xe3   :  { %v196_v63 = vmul.f32 0.7978846, %v190_v59  ;;  %v176_v0 = vmul.f32 %v170_v60, %v170_v60 }
  0xe4   :  { %v198_v1 = vmul.f32 0.7978846, %v192_v61  ;;  %v187_v2 = vmul.f32 0.044715, %v181_v62 }
  0xe5   :  { %317 = vtanh.f32 %v196_v63  ;;  %v182_v3 = vmul.f32 %v176_v0, %v170_v60 }
  0xe6   :  { %319 = vtanh.f32 %v198_v1  ;;  %v193_v4 = vadd.f32 %v187_v2, %v169_v52 }
  0xe7   :  { %v188_v5 = vmul.f32 0.044715, %v182_v3 }
  0xe8   :  { %v199_v6 = vmul.f32 0.7978846, %v193_v4 }
  0xe9   :  { %v194_v7 = vadd.f32 %v188_v5, %v170_v60 }
  0xea   :  { %321 = vtanh.f32 %v199_v6 }
  0xeb   :  { %v200_v8 = vmul.f32 0.7978846, %v194_v7 }
  0xed   :  { %323 = vtanh.f32 %v200_v8 }
  0xee   :  { %v314_v9 = vpop.eup %313 }
  0xef   :  { %v316_v10 = vpop.eup %315  ;;  %v207_v11 = vadd.f32 1.0, %v314_v9 }
  0xf0   :  { %v209_v12 = vadd.f32 1.0, %v316_v10 }
  0xf1   :  { %v213_v13 = vmul.f32 0.5, %v207_v11 }
  0xf2   :  { %v318_v14 = vpop.eup %317  ;;  %v215_v15 = vmul.f32 0.5, %v209_v12 }
  0xf3   :  { %v320_v16 = vpop.eup %319  ;;  %v219_v17 = vmul.f32 %v213_v13, %v165_v30  ;;  %v208_v18 = vadd.f32 1.0, %v318_v14 }
  0xf4   :  { %v221_v19 = vmul.f32 %v215_v15, %v167_v31  ;;  %v210_v20 = vadd.f32 1.0, %v320_v16 }
  0xf5   :  { %v275_v21 = vpack.c.bf16 %v219_v17, %v219_v17  ;;  %v214_v22 = vmul.f32 0.5, %v208_v18 }
  0xf6   :  { %v277_v23 = vpack.c.bf16 %v221_v19, %v221_v19  ;;  %v216_v24 = vmul.f32 0.5, %v210_v20 }
  0xf7   :  { %v322_v25 = vpop.eup %321  ;;  %250 = vst.msk [vmem:[%s407_s3] sm:$0xf] %vm249_vm3, %v275_v21  ;;  %v220_v26 = vmul.f32 %v214_v22, %v166_v41 }
  0xf8   :  { %252 = vst.msk [vmem:[%s407_s3 + $0x8] sm:$0xf] %vm249_vm3, %v277_v23  ;;  %v222_v27 = vmul.f32 %v216_v24, %v168_v42  ;;  %v211_v28 = vadd.f32 1.0, %v322_v25 }
  0xf9   :  { %v276_v29 = vpack.c.bf16 %v220_v26, %v220_v26 }
  0xfa   :  { %v324_v30 = vpop.eup %323  ;;  %v278_v31 = vpack.c.bf16 %v222_v27, %v222_v27  ;;  %v217_v32 = vmul.f32 0.5, %v211_v28 }
  0xfb   :  { %251 = vst.msk [vmem:[%s407_s3 + $0x4] sm:$0xf] %vm249_vm3, %v276_v29  ;;  %v212_v33 = vadd.f32 1.0, %v324_v30 }
  0xfc   :  { %253 = vst.msk [vmem:[%s407_s3 + $0xc] sm:$0xf] %vm249_vm3, %v278_v31  ;;  %v223_v34 = vmul.f32 %v217_v32, %v169_v52 }
  0xfd   :  { %v218_v35 = vmul.f32 0.5, %v212_v33 }
  0xfe   :  { %v279_v36 = vpack.c.bf16 %v223_v34, %v223_v34 }
  0xff   :  { %v224_v37 = vmul.f32 %v218_v35, %v170_v60 }
 0x100   :  { %254 = vst.msk [vmem:[%s407_s3 + $0x10] sm:$0xf] %vm249_vm3, %v279_v36 }
 0x101   :  { %v280_v38 = vpack.c.bf16 %v224_v37, %v224_v37 }
 0x103   :  { %255 = vst.msk [vmem:[%s407_s3 + $0x14] sm:$0xf] %vm249_vm3, %v280_v38 }

// kernel: convvit_forward.23
= control target key start
LH: loop header
LB: loop body
LE: loop exit
PB: predicated region body
PF: predicated region fallthrough
CT: control target
= control target key end

     0   :  { %vm22_vm0 = vcmask 261120   ;;  %v324_v0 = vmov 0.0   ;;  %vm325_vm1 = vmmov 0   ;;  %vm88_vm2 = vcmask 523264   ;;  %s423_s1 = inlined_call_operand.vmem [shape: bf16[64,32], index: 1, kind: input, shape index: {}]   ;;  %s424_s0 = inlined_call_operand.vmem [shape: bf16[48,64], index: 0, kind: input, shape index: {}]   ;;  %s425_s3 = inlined_call_operand.vmem [shape: bf16[48,32], index: 3, kind: input, shape index: {}]   ;;  %s426_s2 = inlined_call_operand.vmem [shape: f32[1,32], index: 2, kind: input, shape index: {}]   ;;  %s427_s4 = inlined_call_operand.vmem [shape: bf16[48,32], index: 4, kind: output, shape index: {}]  }
   0x1   :  { %307 = vmatprep.subr.bf16.mxu1 %v324_v0  ;;  %v317_v1 = vld [vmem:[%s423_s1 + $0x18] sm:$0xff]   ;;  %287 = vmatprep.subr.bf16.mxu0 %v324_v0  ;;  %25 = vst.msk [vmem:[#allocation2 + $0x10] sm:$0xff] %vm22_vm0, %v324_v0  ;;  %23 = vst.msk [vmem:[#allocation2] sm:$0xff] %vm22_vm0, %v324_v0  ;;  %v318_v2 = vld [vmem:[%s423_s1 + $0x10] sm:$0xff]   ;;  %vm232_vm3 = vcmask 257024  }
   0x2   :  { %24 = vst.msk [vmem:[#allocation2 + $0x8] sm:$0xff] %vm22_vm0, %v324_v0  ;;  %26 = vst.msk [vmem:[#allocation2 + $0x18] sm:$0xff] %vm22_vm0, %v324_v0  ;;  %299 = vmatprep.mubr.msk.bf16.mxu1 %vm325_vm1, %v324_v0  ;;  %295 = vmatprep.mubr.msk.bf16.mxu0 %vm325_vm1, %v324_v0  ;;  %v319_v3 = vld [vmem:[%s423_s1 + $0x8] sm:$0xff]   ;;  %v320_v4 = vld [vmem:[%s423_s1] sm:$0xff]  }
   0x3   :  { %27 = vst.msk [vmem:[#allocation2 + $0x20] sm:$0xff] %vm22_vm0, %v324_v0  ;;  %28 = vst.msk [vmem:[#allocation2 + $0x28] sm:$0xff] %vm22_vm0, %v324_v0  ;;  %311 = vmatpush3.bf16.msra.mxu1 %v317_v1  ;;  %288 = vmatpush3.bf16.msra.mxu0 %v317_v1  ;;  %v321_v5 = vld [vmem:[%s424_s0 + $0x8] sm:$0xff]   ;;  %v322_v6 = vld [vmem:[%s424_s0] sm:$0xff]  }
   0x4   :  { %308 = vmatprep.subr.bf16.mxu1 %v324_v0  ;;  %289 = vmatprep.subr.bf16.mxu0 %v324_v0  ;;  %v323_v7 = vld [vmem:[%s424_s0 + $0x10] sm:$0xff]   ;;  %v278_v22 = vld [vmem:[%s425_s3 + $0x8] sm:$0xff]   ;;  %v267_v23 = vld [vmem:[%s425_s3] sm:$0xff]  }
   0x5   :  { %v253_v27 = vld [vmem:[%s426_s2] ss:$0 sm:$0xff]  ;;  %v272_v29 = vunpack.c.l.bf16 %v278_v22  ;;  %v268_v30 = vunpack.c.l.bf16 %v267_v23  ;;  %v273_v38 = vunpack.c.h.bf16 %v278_v22  ;;  %v269_v42 = vunpack.c.h.bf16 %v267_v23  ;;  %v279_v46 = vld [vmem:[%s425_s3 + $0x10] sm:$0xff]  }
   0x6   :  { %v276_v54 = vunpack.c.l.bf16 %v279_v46  ;;  %v277_v60 = vunpack.c.h.bf16 %v279_v46 }
   0x7   :  { %312 = vmatpush3.bf16.msra.mxu1 %v318_v2  ;;  %290 = vmatpush3.bf16.msra.mxu0 %v318_v2 }
   0x8   :  { %309 = vmatprep.subr.bf16.mxu1 %v324_v0  ;;  %291 = vmatprep.subr.bf16.mxu0 %v324_v0  ;;  %v31_v8 = vld [vmem:[#allocation2 + $0x10] sm:$0xff]  ;;  %v29_v9 = vld [vmem:[#allocation2] sm:$0xff] }
   0x9   :  { %v32_v16 = vld [vmem:[#allocation2 + $0x18] sm:$0xff]  ;;  %v30_v17 = vld [vmem:[#allocation2 + $0x8] sm:$0xff] }
   0xa   :  { %v33_v26 = vld [vmem:[#allocation2 + $0x20] sm:$0xff]  ;;  %v34_v35 = vld [vmem:[#allocation2 + $0x28] sm:$0xff] }
   0xb   :  { %313 = vmatpush3.bf16.msra.mxu1 %v319_v3  ;;  %292 = vmatpush3.bf16.msra.mxu0 %v319_v3 }
   0xc   :  { %310 = vmatprep.subr.bf16.mxu1 %v324_v0  ;;  %293 = vmatprep.subr.bf16.mxu0 %v324_v0 }
   0xf   :  { %314 = vmatpush3.bf16.msra.mxu1 %v320_v4  ;;  %294 = vmatpush3.bf16.msra.mxu0 %v320_v4 }
  0x12   :  { %300 = vmatmul.mubr.msk.bf16.vlgmr.msra.gmra.mxu1 %vm88_vm2, %v321_v5  ;;  %296 = vmatmul.mubr.msk.bf16.vlgmr.msra.gmra.mxu0 %vm88_vm2, %v322_v6 }
  0x13   :  { %303 = vmatprep.mubr.msk.bf16.mxu1 %vm325_vm1, %v324_v0 }
  0x1a   :  { %304 = vmatmul.mubr.msk.bf16.gmra.mxu1 %vm88_vm2, %v323_v7 }
  0xd2   :  { %v140_v10 = vpop.f32.mrf.mxu1  ;;  %v132_v11 = vpop.f32.mrf.mxu0 }
  0xd3   :  { %v157_v12 = vadd.f32 %v140_v10, %v31_v8  ;;  %v155_v13 = vadd.f32 %v132_v11, %v29_v9 }
  0xd4   :  { %v301_v14 = vpop.f32.mrf.mxu1  ;;  %v297_v15 = vpop.f32.mrf.mxu0 }
  0xd5   :  { %164 = vst.msk [vmem:[#allocation2 + $0x10] sm:$0xff] %vm22_vm0, %v157_v12  ;;  %162 = vst.msk [vmem:[#allocation2] sm:$0xff] %vm22_vm0, %v155_v13 }
  0xd6   :  { %v143_v18 = vpop.f32.mrf.mxu1  ;;  %v135_v19 = vpop.f32.mrf.mxu0 }
  0xd7   :  { %v158_v20 = vadd.f32 %v143_v18, %v32_v16  ;;  %v156_v21 = vadd.f32 %v135_v19, %v30_v17 }
  0xd8   :  { %v302_v24 = vpop.f32.mrf.mxu1  ;;  %v298_v25 = vpop.f32.mrf.mxu0 }
  0xd9   :  { %165 = vst.msk [vmem:[#allocation2 + $0x18] sm:$0xff] %vm22_vm0, %v158_v20  ;;  %163 = vst.msk [vmem:[#allocation2 + $0x8] sm:$0xff] %vm22_vm0, %v156_v21 }
  0xda   :  { %v148_v28 = vpop.f32.mrf.mxu1 }
  0xdb   :  { %v159_v31 = vadd.f32 %v148_v28, %v33_v26 }
  0xdc   :  { %v173_v32 = vld [vmem:[#allocation2 + $0x10] sm:$0xff]  ;;  %v171_v33 = vld [vmem:[#allocation2] sm:$0xff]  ;;  %v305_v34 = vpop.f32.mrf.mxu1 }
  0xdd   :  { %v186_v36 = vadd.f32 %v253_v27, %v173_v32  ;;  %v184_v37 = vadd.f32 %v253_v27, %v171_v33  ;;  %166 = vst.msk [vmem:[#allocation2 + $0x20] sm:$0xff] %vm22_vm0, %v159_v31 }
  0xde   :  { %v151_v39 = vpop.f32.mrf.mxu1 }
  0xdf   :  { %v204_v40 = vadd.f32 %v272_v29, %v186_v36  ;;  %v202_v41 = vadd.f32 %v268_v30, %v184_v37  ;;  %v160_v43 = vadd.f32 %v151_v39, %v34_v35 }
  0xe0   :  { %v174_v44 = vld [vmem:[#allocation2 + $0x18] sm:$0xff]  ;;  %v172_v45 = vld [vmem:[#allocation2 + $0x8] sm:$0xff]  ;;  %v306_v47 = vpop.f32.mrf.mxu1 }
  0xe1   :  { %v262_v48 = vpack.c.bf16 %v204_v40, %v204_v40  ;;  %v260_v49 = vpack.c.bf16 %v202_v41, %v202_v41  ;;  %v187_v50 = vadd.f32 %v253_v27, %v174_v44  ;;  %v185_v51 = vadd.f32 %v253_v27, %v172_v45  ;;  %167 = vst.msk [vmem:[#allocation2 + $0x28] sm:$0xff] %vm22_vm0, %v160_v43 }
  0xe3   :  { %235 = vst.msk [vmem:[%s427_s4 + $0x8] sm:$0xf] %vm232_vm3, %v262_v48  ;;  %233 = vst.msk [vmem:[%s427_s4] sm:$0xf] %vm232_vm3, %v260_v49  ;;  %v205_v52 = vadd.f32 %v273_v38, %v187_v50  ;;  %v203_v53 = vadd.f32 %v269_v42, %v185_v51 }
  0xe4   :  { %v175_v55 = vld [vmem:[#allocation2 + $0x20] sm:$0xff] }
  0xe5   :  { %v263_v56 = vpack.c.bf16 %v205_v52, %v205_v52  ;;  %v261_v57 = vpack.c.bf16 %v203_v53, %v203_v53  ;;  %v188_v58 = vadd.f32 %v253_v27, %v175_v55 }
  0xe7   :  { %236 = vst.msk [vmem:[%s427_s4 + $0xc] sm:$0xf] %vm232_vm3, %v263_v56  ;;  %234 = vst.msk [vmem:[%s427_s4 + $0x4] sm:$0xf] %vm232_vm3, %v261_v57  ;;  %v206_v59 = vadd.f32 %v276_v54, %v188_v58 }
  0xe8   :  { %v176_v61 = vld [vmem:[#allocation2 + $0x28] sm:$0xff] }
  0xe9   :  { %v264_v62 = vpack.c.bf16 %v206_v59, %v206_v59  ;;  %v189_v63 = vadd.f32 %v253_v27, %v176_v61 }
  0xeb   :  { %237 = vst.msk [vmem:[%s427_s4 + $0x10] sm:$0xf] %vm232_vm3, %v264_v62  ;;  %v207_v0 = vadd.f32 %v277_v60, %v189_v63 }
  0xed   :  { %v265_v1 = vpack.c.bf16 %v207_v0, %v207_v0 }
  0xef   :  { %238 = vst.msk [vmem:[%s427_s4 + $0x14] sm:$0xf] %vm232_vm3, %v265_v1 }

// kernel: convvit_forward.31
= control target key start
LH: loop header
LB: loop body
LE: loop exit
PB: predicated region body
PF: predicated region fallthrough
CT: control target
= control target key end

     0   :  { %v156_v1 = vmov 0.0   ;;  %vm157_vm0 = vmmov 0   ;;  %vm20_vm1 = vcmask 74752   ;;  %s197_s0 = inlined_call_operand.vmem [shape: bf16[2,32], index: 0, kind: input, shape index: {}]   ;;  %s198_s1 = inlined_call_operand.vmem [shape: bf16[32,10], index: 1, kind: input, shape index: {}]   ;;  %s199_s2 = inlined_call_operand.vmem [shape: f32[1,10], index: 2, kind: input, shape index: {}]   ;;  %s200_s3 = inlined_call_operand.hbm [shape: f32[2,10], index: 3, kind: output, shape index: {}]  }
   0x1   :  { %v132_v0 = vld [vmem:[%s198_s1 + $0x8] sm:$0xff]   ;;  %121 = vmatprep.subr.bf16.mxu0 %v156_v1  ;;  %v133_v2 = vld [vmem:[%s198_s1] sm:$0xff]   ;;  %125 = vmatprep.mubr.msk.bf16.mxu0 %vm157_vm0, %v156_v1 }
   0x2   :  { %122 = vmatpush3.bf16.msra.mxu0 %v132_v0 }
   0x3   :  { %8 = vsyncpa [#allocation4], 0  ;;  %123 = vmatprep.subr.bf16.mxu0 %v156_v1  ;;  %21 = vst.msk [vmem:[#allocation2] sm:$0x3] %vm20_vm1, %v156_v1  ;;  %v23_v3 = vld [vmem:[%s197_s0] sm:$0x1] }
   0x4   :  { %vm40_vm2 = vcmask 261120   ;;  %v117_v10 = vld [vmem:[%s199_s2] ss:$0 sm:$0xff]  ;;  %s158_s19 = smov [#allocation3]  }
   0x5   :  { %s106_s20 = sshll.u32 %s158_s19, 4  ;;  %s107_s20 = int_to_ptr.vmem [resolvable:$true] %s106_s20 }
   0x6   :  { %124 = vmatpush3.bf16.msra.mxu0 %v133_v2  ;;  %s134_s0 = scalar_lea.vmem %s107_s20, 32  ;;  %p139_p1 = scmp.lt.s32.totalorder %s107_s20, %s107_s20 }
   0x7   :  { %p135_p0 = scmp.ne.s32.totalorder %s107_s20, %s134_s0  ;;  %p140_p2 = scmp.lt.s32.totalorder %s134_s0, %s134_s0 }
   0x9   :  { %126 = vmatmul.mubr.msk.bf16.vlgmr.msra.gmra.mxu0 %vm40_vm2, %v23_v3  ;;  %p141_p3 = por %p140_p2, %p139_p1 }
   0xa   :  { %v22_v4 = vld [vmem:[#allocation2] sm:$0x3] }
   0xb   :  { %p142_p4 = pnand %p141_p3, %p135_p0 }
  0xc9   :  { %v78_v5 = vpop.f32.mrf.mxu0 }
  0xca   :  { %v84_v6 = vadd.f32 %v78_v5, %v22_v4 }
  0xcb   :  { %v127_v7 = vpop.f32.mrf.mxu0 }
  0xcc   :  { %86 = vst.msk [vmem:[#allocation2] sm:$0x3] %vm20_vm1, %v84_v6 }
  0xcd   :  { %v81_v8 = vpop.f32.mrf.mxu0 }
  0xcf   :  { %v128_v9 = vpop.f32.mrf.mxu0 }
  0xd3   :  { %v90_v11 = vld [vmem:[#allocation2] sm:$0x3] }
  0xd4   :  { %v98_v12 = vadd.f32 %v117_v10, %v90_v11 }
  0xd6   :  { %99 = vst.msk [vmem:[#allocation3] sm:$0x3] %vm20_vm1, %v98_v12 }
  0xd7   :  { %145 = shalt.err (!%p142_p4)
}
  0xd8   :  { %109 = dma.vmem_to_hbm [thread:$0]  %s107_s20, 32, %s200_s3, [#allocation4]  }
  0xd9   :  { %154 = dma.done.wait [#allocation4], 32  }
  0xda   :  { %155 = vsyncadd [#allocation4], 4294967264 }
  0xdb   :  { %113 = vsyncpa [#allocation4], 1 }

</bundles_post_ra>
